<compile_context>
chip_gen: v6e
topology: v6e:2x2x1
jax: 0.10.0
libtpu: 0.0.40
codegen_flags: <defaults>
</compile_context>

<pallas_src>
import jax
import jax.numpy as jnp
from jax.experimental import pallas as pl
from jax.experimental.pallas import tpu as pltpu


def _round_up(a, b):
    return (a + b - 1) // b * b


# ----------------------------------------------------------------------------
# Kernel 1: fused (im2col-matmul) * bn_scale + bn_shift -> ReLU -> + residual
# ----------------------------------------------------------------------------
def _mm_bn_relu_res_kernel(x_ref, w_ref, s_ref, t_ref, r_ref, o_ref):
    acc = jnp.dot(x_ref[...], w_ref[...], preferred_element_type=jnp.float32)
    y = jnp.maximum(acc * s_ref[...] + t_ref[...], 0.0) + r_ref[...]
    o_ref[...] = y.astype(o_ref.dtype)


def matmul_bn_relu_res(x, w, scale, shift, residual,
                       out_dtype=jnp.bfloat16, tm_target=512):
    """y = relu((x @ w) * scale + shift) + residual, row-tiled on the MXU.

    x, w are bf16 (halved DMA bytes, native MXU rate); scale/shift/residual and
    the epilogue stay f32. tm is picked so there are >=2 parallel row tiles
    (keeps both v7x TensorCores busy) and so the toy shapes need no padding.
    """
    M, K = x.shape
    N = w.shape[1]
    tm = max(8, min(tm_target, _round_up((M + 1) // 2, 8)))
    tm = min(tm, _round_up(M, 8))
    Mp = _round_up(M, tm)
    if Mp != M:  # ragged tail only; no-op for the demo shapes
        x = jnp.pad(x, ((0, Mp - M), (0, 0)))
        residual = jnp.pad(residual, ((0, Mp - M), (0, 0)))

    out = pl.pallas_call(
        _mm_bn_relu_res_kernel,
        out_shape=jax.ShapeDtypeStruct((Mp, N), out_dtype),
        grid=(Mp // tm,),
        in_specs=[
            pl.BlockSpec((tm, K), lambda i: (i, 0)),
            pl.BlockSpec((K, N), lambda i: (0, 0)),
            pl.BlockSpec((1, N), lambda i: (0, 0)),
            pl.BlockSpec((1, N), lambda i: (0, 0)),
            pl.BlockSpec((tm, N), lambda i: (i, 0)),
        ],
        out_specs=pl.BlockSpec((tm, N), lambda i: (i, 0)),
        compiler_params=pltpu.CompilerParams(dimension_semantics=("parallel",)),
    )(x, w, scale, shift, residual)
    return out if Mp == M else out[:M]


# ----------------------------------------------------------------------------
# Kernel 2: fused conv_cat[0] (3x3x3) + conv_cat[1] (1x1x1) + CMA + residual
# ----------------------------------------------------------------------------
def _conv_cat_cma_kernel(feat_ref, x4_ref,
                         wc0_ref, sc0_ref, tc0_ref,
                         wc1_ref, sc1_ref, tc1_ref,
                         w1_ref, s1_ref, t1_ref,
                         w2_ref, b2_ref, w3_ref, b3_ref,
                         o_ref, pad_ref):
    _, T, Ho, Wo, C = feat_ref.shape
    M = T * Ho * Wo
    mip = s1_ref.shape[1]

    # --- conv_cat[0]: Conv3d(C, C, [3,3,3], padding=1) as 27 shifted matmuls
    # accumulated in VMEM on a zero-padded scratch copy (no im2col in HBM).
    pad_ref[...] = jnp.zeros_like(pad_ref)
    pad_ref[pl.ds(1, T), pl.ds(1, Ho), pl.ds(1, Wo), :] = (
        feat_ref[0].astype(jnp.float32))

    acc = jnp.zeros((M, C), jnp.float32)
    for dt in range(3):
        for dh in range(3):
            for dw in range(3):
                tap = (dt * 3 + dh) * 3 + dw
                win = pad_ref[pl.ds(dt, T), pl.ds(dh, Ho), pl.ds(dw, Wo), :]
                acc = acc + jnp.dot(
                    win.reshape(M, C).astype(jnp.bfloat16),
                    wc0_ref[tap],
                    preferred_element_type=jnp.float32)
    y = jnp.maximum(acc * sc0_ref[...] + tc0_ref[...], 0.0)

    # --- conv_cat[1]: Conv3d(C, C, [1,1,1]) + BN + ReLU fused in the epilogue.
    y = jnp.dot(y.astype(jnp.bfloat16), wc1_ref[...],
                preferred_element_type=jnp.float32)
    y = jnp.maximum(y * sc1_ref[...] + tc1_ref[...], 0.0)
    feat = y.reshape(T, Ho, Wo, C)

    # --- CMA_variant on merged channels c2 = c*T + t, without materialising the
    # (C*T, H, W) view: gating weights come pre-split per time slice.
    yh = jnp.zeros((Ho, mip), jnp.float32)
    yw = jnp.zeros((Wo, mip), jnp.float32)
    for t in range(T):
        ft = feat[t]                                   # (Ho, Wo, C)
        ph = jnp.mean(ft, axis=1)                      # pool over W -> (Ho, C)
        pw = jnp.mean(ft, axis=0)                      # pool over H -> (Wo, C)
        yh = yh + jnp.dot(ph.astype(jnp.bfloat16), w1_ref[t],
                          preferred_element_type=jnp.float32)
        yw = yw + jnp.dot(pw.astype(jnp.bfloat16), w1_ref[t],
                          preferred_element_type=jnp.float32)
    a_h = jnp.maximum(yh * s1_ref[...] + t1_ref[...], 0.0)    # (Ho, mip)
    a_w = jnp.maximum(yw * s1_ref[...] + t1_ref[...], 0.0)    # (Wo, mip)

    for t in range(T):
        g_h = jax.nn.sigmoid(
            jnp.dot(a_h.astype(jnp.bfloat16), w2_ref[t],
                    preferred_element_type=jnp.float32) + b2_ref[t])   # (Ho, C)
        g_w = jax.nn.sigmoid(
            jnp.dot(a_w.astype(jnp.bfloat16), w3_ref[t],
                    preferred_element_type=jnp.float32) + b3_ref[t])   # (Wo, C)
        out_t = feat[t] * g_h[:, None, :] * g_w[None, :, :] + x4_ref[0, t]
        o_ref[0, t] = out_t.astype(o_ref.dtype)


def conv_cat_cma(feat, x4, p):
    """feat: (B, T, Ho, Wo, C) bf16 (conv_down output); x4: same shape, f32."""
    B, T, Ho, Wo, C = feat.shape
    mip = p['s1'].shape[1]
    return pl.pallas_call(
        _conv_cat_cma_kernel,
        out_shape=jax.ShapeDtypeStruct((B, T, Ho, Wo, C), jnp.float32),
        grid=(B,),
        in_specs=[
            pl.BlockSpec((1, T, Ho, Wo, C), lambda b: (b, 0, 0, 0, 0)),  # feat
            pl.BlockSpec((1, T, Ho, Wo, C), lambda b: (b, 0, 0, 0, 0)),  # x4
            pl.BlockSpec((27, C, C), lambda b: (0, 0, 0)),               # w_cat0
            pl.BlockSpec((1, C), lambda b: (0, 0)),                      # s_cat0
            pl.BlockSpec((1, C), lambda b: (0, 0)),                      # t_cat0
            pl.BlockSpec((C, C), lambda b: (0, 0)),                      # w_cat1
            pl.BlockSpec((1, C), lambda b: (0, 0)),                      # s_cat1
            pl.BlockSpec((1, C), lambda b: (0, 0)),                      # t_cat1
            pl.BlockSpec((T, C, mip), lambda b: (0, 0, 0)),              # w1
            pl.BlockSpec((1, mip), lambda b: (0, 0)),                    # s1
            pl.BlockSpec((1, mip), lambda b: (0, 0)),                    # t1
            pl.BlockSpec((T, mip, C), lambda b: (0, 0, 0)),              # w2
            pl.BlockSpec((T, 1, C), lambda b: (0, 0, 0)),                # b2
            pl.BlockSpec((T, mip, C), lambda b: (0, 0, 0)),              # w3
            pl.BlockSpec((T, 1, C), lambda b: (0, 0, 0)),                # b3
        ],
        out_specs=pl.BlockSpec((1, T, Ho, Wo, C), lambda b: (b, 0, 0, 0, 0)),
        scratch_shapes=[pltpu.VMEM((T + 2, Ho + 2, Wo + 2, C), jnp.float32)],
        compiler_params=pltpu.CompilerParams(dimension_semantics=("parallel",)),
    )(feat, x4,
      p['w_cat0'], p['s_cat0'], p['t_cat0'],
      p['w_cat1'], p['s_cat1'], p['t_cat1'],
      p['w1'], p['s1'], p['t1'],
      p['w2'], p['b2'], p['w3'], p['b3'])


# ----------------------------------------------------------------------------
# JAX glue: 9-tap im2col for conv_down (channels-last), BN folding, init
# ----------------------------------------------------------------------------
def im2col3d(x, ksize, stride, pad):
    """x: (B, T, H, W, C). Columns ordered (kt, kh, kw, c_in): contiguous
    channel slabs per tap (plain concatenation, no element-granular relayout)."""
    B, T, H, W, C = x.shape
    kt, kh, kw = ksize
    st, sh, sw = stride
    pt, ph, pw = pad
    To = (T + 2 * pt - kt) // st + 1
    Ho = (H + 2 * ph - kh) // sh + 1
    Wo = (W + 2 * pw - kw) // sw + 1
    xp = jnp.pad(x, ((0, 0), (pt, pt), (ph, ph), (pw, pw), (0, 0)))
    cols = []
    for a in range(kt):
        for b in range(kh):
            for c in range(kw):
                cols.append(xp[:,
                               a:a + st * (To - 1) + 1:st,
                               b:b + sh * (Ho - 1) + 1:sh,
                               c:c + sw * (Wo - 1) + 1:sw, :])
    return jnp.concatenate(cols, axis=-1), (To, Ho, Wo)


def fold_bn(bias, gamma, beta, mean, var, eps=1e-5):
    scale = gamma / jnp.sqrt(var + eps)
    shift = beta + (bias - mean) * scale
    return (scale.reshape(1, -1).astype(jnp.float32),
            shift.reshape(1, -1).astype(jnp.float32))


def init_params(C, T, key):
    """Deterministic inference-mode params. Matmul weights are bf16; BN folded."""
    assert T == 2, "AFCF3 channel merge (C*T == 2*C) requires T == 2"
    C2 = C * T
    mip = max(8, C2)                 # reduction = 1
    ks = jax.random.split(key, 24)
    it = iter(ks)

    def nrm(shape, s=0.1):
        return s * jax.random.normal(next(it), shape, jnp.float32)

    def bn(n):
        gamma = 1.0 + 0.1 * jax.random.normal(next(it), (n,), jnp.float32)
        beta = 0.1 * jax.random.normal(next(it), (n,), jnp.float32)
        return gamma, beta, jnp.zeros((n,), jnp.float32), jnp.ones((n,), jnp.float32)

    p = {}
    # conv_down: rows ordered (kt, kh, kw, c_in) to match im2col concatenation.
    p['w_down'] = nrm((9 * C, C)).astype(jnp.bfloat16)
    p['s_down'], p['t_down'] = fold_bn(nrm((C,), 0.05), *bn(C))

    # conv_cat[0]: per-tap (C_in, C_out) slabs, tap index = (dt*3+dh)*3+dw.
    p['w_cat0'] = nrm((27, C, C)).astype(jnp.bfloat16)
    p['s_cat0'], p['t_cat0'] = fold_bn(nrm((C,), 0.05), *bn(C))

    # conv_cat[1]
    p['w_cat1'] = nrm((C, C)).astype(jnp.bfloat16)
    p['s_cat1'], p['t_cat1'] = fold_bn(nrm((C,), 0.05), *bn(C))

    # CMA_variant(C2, C2, reduction=1); merged channel index c2 = c*T + t,
    # weights pre-split per time slice so the kernel never builds the merged view.
    w1 = nrm((C2, mip))                                           # (c2, mip)
    p['w1'] = jnp.transpose(w1.reshape(C, T, mip), (1, 0, 2)).astype(jnp.bfloat16)
    p['s1'], p['t1'] = fold_bn(nrm((mip,), 0.05), *bn(mip))
    w2, b2 = nrm((mip, C2)), nrm((C2,), 0.05)
    p['w2'] = jnp.transpose(w2.reshape(mip, C, T), (2, 0, 1)).astype(jnp.bfloat16)
    p['b2'] = jnp.transpose(b2.reshape(C, T), (1, 0)).reshape(T, 1, C)
    w3, b3 = nrm((mip, C2)), nrm((C2,), 0.05)
    p['w3'] = jnp.transpose(w3.reshape(mip, C, T), (2, 0, 1)).astype(jnp.bfloat16)
    p['b3'] = jnp.transpose(b3.reshape(C, T), (1, 0)).reshape(T, 1, C)
    return p


# ----------------------------------------------------------------------------
# AFCF3 forward
# ----------------------------------------------------------------------------
@jax.jit
def afcf3_forward(x3, x4, params):
    # x3: (B, C, T, H, W), x4: (B, C, T, H//2, W//2) -- torch NCDHW layout.
    x3c = jnp.transpose(x3.astype(jnp.bfloat16), (0, 2, 3, 4, 1))  # (B,T,H,W,C)
    x4c = jnp.transpose(x4, (0, 2, 3, 4, 1)).astype(jnp.float32)   # (B,T,H2,W2,C)
    B, T, H, W, C = x3c.shape

    # conv_down (+ BN + ReLU) fused with the "+ x4" residual.
    cols, (To, Ho, Wo) = im2col3d(x3c, (1, 3, 3), (1, 2, 2), (0, 1, 1))
    X = cols.reshape(B * To * Ho * Wo, 9 * C)
    R = x4c.reshape(B * To * Ho * Wo, C)
    feat = matmul_bn_relu_res(X, params['w_down'], params['s_down'],
                              params['t_down'], R)
    feat = feat.reshape(B, To, Ho, Wo, C)              # bf16

    # conv_cat[0] + conv_cat[1] + CMA gating + "+ x4" residual, all in one kernel.
    out_cl = conv_cat_cma(feat, x4c, params)           # (B, T, Ho, Wo, C) f32

    # back to torch NCDHW
    return jnp.transpose(out_cl, (0, 4, 1, 2, 3))      # (B, C, T, Ho, Wo)


if __name__ == "__main__":
    B, C, T, H, W = 2, 4, 2, 16, 16      # C*T == channel*2 (AFCF3 requires T == 2)
    key = jax.random.PRNGKey(0)
    k1, k2, k3 = jax.random.split(key, 3)
    x3 = jax.random.normal(k1, (B, C, T, H, W), jnp.float32)
    x4 = jax.random.normal(k2, (B, C, T, H // 2, W // 2), jnp.float32)
    params = init_params(C, T, k3)

    out = afcf3_forward(x3, x4, params)
    jax.block_until_ready(out)
    assert out.shape == (B, C, T, H // 2, W // 2), out.shape
    assert bool(jnp.all(jnp.isfinite(out)))
    print("KERNEL_OK")
</pallas_src>

<mosaic_0001>
module attributes {stable_mosaic.version = 11 : i64} {
  func.func @_mm_bn_relu_res_kernel(%arg0: i32, %arg1: memref<128x36xbf16, #tpu.memory_space<vmem>>, %arg2: memref<36x4xbf16, #tpu.memory_space<vmem>>, %arg3: memref<1x4xf32, #tpu.memory_space<vmem>>, %arg4: memref<1x4xf32, #tpu.memory_space<vmem>>, %arg5: memref<128x4xf32, #tpu.memory_space<vmem>>, %arg6: memref<128x4xbf16, #tpu.memory_space<vmem>>) attributes {dimension_semantics = [#tpu.dimension_semantics<parallel>], iteration_bounds = array<i64: 2>, scalar_prefetch = 0 : i64, scratch_operands = 0 : i64, tpu.core_type = #tpu.core_type<tc>, window_params = [{transform_indices = @transform_0, window_bounds = array<i64: 128, 36>}, {pipeline_mode = #tpu.pipeline_mode<synchronous>, transform_indices = @transform_1, window_bounds = array<i64: 36, 4>}, {pipeline_mode = #tpu.pipeline_mode<synchronous>, transform_indices = @transform_2, window_bounds = array<i64: 1, 4>}, {pipeline_mode = #tpu.pipeline_mode<synchronous>, transform_indices = @transform_3, window_bounds = array<i64: 1, 4>}, {transform_indices = @transform_4, window_bounds = array<i64: 128, 4>}, {transform_indices = @transform_5, window_bounds = array<i64: 128, 4>}]} {
    %c0 = arith.constant 0 : index
    %c0_0 = arith.constant 0 : index
    %0 = vector.load %arg1[%c0, %c0_0] : memref<128x36xbf16, #tpu.memory_space<vmem>>, vector<128x36xbf16>
    %c0_1 = arith.constant 0 : index
    %c0_2 = arith.constant 0 : index
    %1 = vector.load %arg2[%c0_1, %c0_2] : memref<36x4xbf16, #tpu.memory_space<vmem>>, vector<36x4xbf16>
    %cst = arith.constant dense<0.000000e+00> : vector<128x4xf32>
    %2 = tpu.matmul %0, %1, %cst {dimension_numbers = #tpu.dot_dimension_numbers<[1], [0], [0], [1], [0, 0, 1, 1], [], []>} : vector<128x36xbf16>, vector<36x4xbf16>, vector<128x4xf32> -> vector<128x4xf32>
    %c0_3 = arith.constant 0 : index
    %c0_4 = arith.constant 0 : index
    %3 = vector.load %arg3[%c0_3, %c0_4] : memref<1x4xf32, #tpu.memory_space<vmem>>, vector<1x4xf32>
    %4 = vector.broadcast %3 : vector<1x4xf32> to vector<128x4xf32>
    %5 = arith.mulf %2, %4 : vector<128x4xf32>
    %c0_5 = arith.constant 0 : index
    %c0_6 = arith.constant 0 : index
    %6 = vector.load %arg4[%c0_5, %c0_6] : memref<1x4xf32, #tpu.memory_space<vmem>>, vector<1x4xf32>
    %7 = vector.broadcast %6 : vector<1x4xf32> to vector<128x4xf32>
    %8 = arith.addf %5, %7 : vector<128x4xf32>
    %cst_7 = arith.constant 0.000000e+00 : f32
    %9 = vector.broadcast %cst_7 : f32 to vector<128x4xf32>
    %10 = arith.maximumf %8, %9 : vector<128x4xf32>
    %c0_8 = arith.constant 0 : index
    %c0_9 = arith.constant 0 : index
    %11 = vector.load %arg5[%c0_8, %c0_9] : memref<128x4xf32, #tpu.memory_space<vmem>>, vector<128x4xf32>
    %12 = arith.addf %10, %11 : vector<128x4xf32>
    %13 = arith.truncf %12 : vector<128x4xf32> to vector<128x4xbf16>
    %c0_10 = arith.constant 0 : index
    %c0_11 = arith.constant 0 : index
    %14 = vector.load %arg6[%c0_10, %c0_11] : memref<128x4xbf16, #tpu.memory_space<vmem>>, vector<128x4xbf16>
    tpu.vector_store %arg6[%c0_10, %c0_11], %13 {strides = array<i32>} : memref<128x4xbf16, #tpu.memory_space<vmem>>, vector<128x4xbf16>,
    return
  }
  func.func @transform_0(%arg0: i32) -> (i32, i32) {
    %c0_i32 = arith.constant 0 : i32
    %c0_i32_0 = arith.constant 0 : i32
    return %arg0, %c0_i32 : i32, i32
  }
  func.func @transform_1(%arg0: i32) -> (i32, i32) {
    %c0_i32 = arith.constant 0 : i32
    %c0_i32_0 = arith.constant 0 : i32
    %c0_i32_1 = arith.constant 0 : i32
    return %c0_i32, %c0_i32_0 : i32, i32
  }
  func.func @transform_2(%arg0: i32) -> (i32, i32) {
    %c0_i32 = arith.constant 0 : i32
    %c0_i32_0 = arith.constant 0 : i32
    %c0_i32_1 = arith.constant 0 : i32
    return %c0_i32, %c0_i32_0 : i32, i32
  }
  func.func @transform_3(%arg0: i32) -> (i32, i32) {
    %c0_i32 = arith.constant 0 : i32
    %c0_i32_0 = arith.constant 0 : i32
    %c0_i32_1 = arith.constant 0 : i32
    return %c0_i32, %c0_i32_0 : i32, i32
  }
  func.func @transform_4(%arg0: i32) -> (i32, i32) {
    %c0_i32 = arith.constant 0 : i32
    %c0_i32_0 = arith.constant 0 : i32
    return %arg0, %c0_i32 : i32, i32
  }
  func.func @transform_5(%arg0: i32) -> (i32, i32) {
    %c0_i32 = arith.constant 0 : i32
    %c0_i32_0 = arith.constant 0 : i32
    return %arg0, %c0_i32 : i32, i32
  }
}

module attributes {stable_mosaic.version = 11 : i64} {
  func.func @_conv_cat_cma_kernel(%arg0: i32, %arg1: memref<1x2x8x8x4xbf16, #tpu.memory_space<vmem>>, %arg2: memref<1x2x8x8x4xf32, #tpu.memory_space<vmem>>, %arg3: memref<27x4x4xbf16, #tpu.memory_space<vmem>>, %arg4: memref<1x4xf32, #tpu.memory_space<vmem>>, %arg5: memref<1x4xf32, #tpu.memory_space<vmem>>, %arg6: memref<4x4xbf16, #tpu.memory_space<vmem>>, %arg7: memref<1x4xf32, #tpu.memory_space<vmem>>, %arg8: memref<1x4xf32, #tpu.memory_space<vmem>>, %arg9: memref<2x4x8xbf16, #tpu.memory_space<vmem>>, %arg10: memref<1x8xf32, #tpu.memory_space<vmem>>, %arg11: memref<1x8xf32, #tpu.memory_space<vmem>>, %arg12: memref<2x8x4xbf16, #tpu.memory_space<vmem>>, %arg13: memref<2x1x4xf32, #tpu.memory_space<vmem>>, %arg14: memref<2x8x4xbf16, #tpu.memory_space<vmem>>, %arg15: memref<2x1x4xf32, #tpu.memory_space<vmem>>, %arg16: memref<1x2x8x8x4xf32, #tpu.memory_space<vmem>>, %arg17: memref<4x10x10x4xf32, #tpu.memory_space<vmem>>) attributes {dimension_semantics = [#tpu.dimension_semantics<parallel>], iteration_bounds = array<i64: 2>, scalar_prefetch = 0 : i64, scratch_operands = 1 : i64, tpu.core_type = #tpu.core_type<tc>, window_params = [{transform_indices = @transform_0, window_bounds = array<i64: 1, 2, 8, 8, 4>}, {transform_indices = @transform_1, window_bounds = array<i64: 1, 2, 8, 8, 4>}, {pipeline_mode = #tpu.pipeline_mode<synchronous>, transform_indices = @transform_2, window_bounds = array<i64: 27, 4, 4>}, {pipeline_mode = #tpu.pipeline_mode<synchronous>, transform_indices = @transform_3, window_bounds = array<i64: 1, 4>}, {pipeline_mode = #tpu.pipeline_mode<synchronous>, transform_indices = @transform_4, window_bounds = array<i64: 1, 4>}, {pipeline_mode = #tpu.pipeline_mode<synchronous>, transform_indices = @transform_5, window_bounds = array<i64: 4, 4>}, {pipeline_mode = #tpu.pipeline_mode<synchronous>, transform_indices = @transform_6, window_bounds = array<i64: 1, 4>}, {pipeline_mode = #tpu.pipeline_mode<synchronous>, transform_indices = @transform_7, window_bounds = array<i64: 1, 4>}, {pipeline_mode = #tpu.pipeline_mode<synchronous>, transform_indices = @transform_8, window_bounds = array<i64: 2, 4, 8>}, {pipeline_mode = #tpu.pipeline_mode<synchronous>, transform_indices = @transform_9, window_bounds = array<i64: 1, 8>}, {pipeline_mode = #tpu.pipeline_mode<synchronous>, transform_indices = @transform_10, window_bounds = array<i64: 1, 8>}, {pipeline_mode = #tpu.pipeline_mode<synchronous>, transform_indices = @transform_11, window_bounds = array<i64: 2, 8, 4>}, {pipeline_mode = #tpu.pipeline_mode<synchronous>, transform_indices = @transform_12, window_bounds = array<i64: 2, 1, 4>}, {pipeline_mode = #tpu.pipeline_mode<synchronous>, transform_indices = @transform_13, window_bounds = array<i64: 2, 8, 4>}, {pipeline_mode = #tpu.pipeline_mode<synchronous>, transform_indices = @transform_14, window_bounds = array<i64: 2, 1, 4>}, {transform_indices = @transform_15, window_bounds = array<i64: 1, 2, 8, 8, 4>}]} {
    %cst = arith.constant 0.000000e+00 : f32
    %0 = vector.broadcast %cst : f32 to vector<4x10x10x4xf32>
    %c0 = arith.constant 0 : index
    %c0_0 = arith.constant 0 : index
    %c0_1 = arith.constant 0 : index
    %c0_2 = arith.constant 0 : index
    %1 = vector.load %arg17[%c0, %c0_0, %c0_1, %c0_2] : memref<4x10x10x4xf32, #tpu.memory_space<vmem>>, vector<4x10x10x4xf32>
    tpu.vector_store %arg17[%c0, %c0_0, %c0_1, %c0_2], %0 {strides = array<i32>} : memref<4x10x10x4xf32, #tpu.memory_space<vmem>>, vector<4x10x10x4xf32>,
    %c0_3 = arith.constant 0 : index
    %c0_4 = arith.constant 0 : index
    %c0_5 = arith.constant 0 : index
    %c0_6 = arith.constant 0 : index
    %c0_7 = arith.constant 0 : index
    %2 = vector.load %arg1[%c0_3, %c0_4, %c0_5, %c0_6, %c0_7] : memref<1x2x8x8x4xbf16, #tpu.memory_space<vmem>>, vector<1x2x8x8x4xbf16>
    %3 = vector.shape_cast %2 : vector<1x2x8x8x4xbf16> to vector<2x8x8x4xbf16>
    %4 = arith.extf %3 : vector<2x8x8x4xbf16> to vector<2x8x8x4xf32>
    %c1 = arith.constant 1 : index
    %c1_8 = arith.constant 1 : index
    %c1_9 = arith.constant 1 : index
    %c0_10 = arith.constant 0 : index
    %5 = vector.load %arg17[%c1, %c1_8, %c1_9, %c0_10] : memref<4x10x10x4xf32, #tpu.memory_space<vmem>>, vector<2x8x8x4xf32>
    tpu.vector_store %arg17[%c1, %c1_8, %c1_9, %c0_10], %4 {strides = array<i32>} : memref<4x10x10x4xf32, #tpu.memory_space<vmem>>, vector<2x8x8x4xf32>,
    %cst_11 = arith.constant 0.000000e+00 : f32
    %6 = vector.broadcast %cst_11 : f32 to vector<128x4xf32>
    %c0_12 = arith.constant 0 : index
    %c0_13 = arith.constant 0 : index
    %c0_14 = arith.constant 0 : index
    %c0_15 = arith.constant 0 : index
    %7 = vector.load %arg17[%c0_12, %c0_13, %c0_14, %c0_15] : memref<4x10x10x4xf32, #tpu.memory_space<vmem>>, vector<2x8x8x4xf32>
    %8 = vector.shape_cast %7 : vector<2x8x8x4xf32> to vector<128x4xf32>
    %9 = arith.truncf %8 : vector<128x4xf32> to vector<128x4xbf16>
    %c0_16 = arith.constant 0 : index
    %c0_17 = arith.constant 0 : index
    %c0_18 = arith.constant 0 : index
    %10 = vector.load %arg3[%c0_16, %c0_17, %c0_18] : memref<27x4x4xbf16, #tpu.memory_space<vmem>>, vector<1x4x4xbf16>
    %11 = vector.shape_cast %10 : vector<1x4x4xbf16> to vector<4x4xbf16>
    %cst_19 = arith.constant dense<0.000000e+00> : vector<128x4xf32>
    %12 = tpu.matmul %9, %11, %cst_19 {dimension_numbers = #tpu.dot_dimension_numbers<[1], [0], [0], [1], [0, 0, 1, 1], [], []>} : vector<128x4xbf16>, vector<4x4xbf16>, vector<128x4xf32> -> vector<128x4xf32>
    %13 = arith.addf %6, %12 : vector<128x4xf32>
    %c0_20 = arith.constant 0 : index
    %c0_21 = arith.constant 0 : index
    %c1_22 = arith.constant 1 : index
    %c0_23 = arith.constant 0 : index
    %14 = vector.load %arg17[%c0_20, %c0_21, %c1_22, %c0_23] : memref<4x10x10x4xf32, #tpu.memory_space<vmem>>, vector<2x8x8x4xf32>
    %15 = vector.shape_cast %14 : vector<2x8x8x4xf32> to vector<128x4xf32>
    %16 = arith.truncf %15 : vector<128x4xf32> to vector<128x4xbf16>
    %c1_24 = arith.constant 1 : index
    %c0_25 = arith.constant 0 : index
    %c0_26 = arith.constant 0 : index
    %17 = vector.load %arg3[%c1_24, %c0_25, %c0_26] : memref<27x4x4xbf16, #tpu.memory_space<vmem>>, vector<1x4x4xbf16>
    %18 = vector.shape_cast %17 : vector<1x4x4xbf16> to vector<4x4xbf16>
    %cst_27 = arith.constant dense<0.000000e+00> : vector<128x4xf32>
    %19 = tpu.matmul %16, %18, %cst_27 {dimension_numbers = #tpu.dot_dimension_numbers<[1], [0], [0], [1], [0, 0, 1, 1], [], []>} : vector<128x4xbf16>, vector<4x4xbf16>, vector<128x4xf32> -> vector<128x4xf32>
    %20 = arith.addf %13, %19 : vector<128x4xf32>
    %c0_28 = arith.constant 0 : index
    %c0_29 = arith.constant 0 : index
    %c2 = arith.constant 2 : index
    %c0_30 = arith.constant 0 : index
    %21 = vector.load %arg17[%c0_28, %c0_29, %c2, %c0_30] : memref<4x10x10x4xf32, #tpu.memory_space<vmem>>, vector<2x8x8x4xf32>
    %22 = vector.shape_cast %21 : vector<2x8x8x4xf32> to vector<128x4xf32>
    %23 = arith.truncf %22 : vector<128x4xf32> to vector<128x4xbf16>
    %c2_31 = arith.constant 2 : index
    %c0_32 = arith.constant 0 : index
    %c0_33 = arith.constant 0 : index
    %24 = vector.load %arg3[%c2_31, %c0_32, %c0_33] : memref<27x4x4xbf16, #tpu.memory_space<vmem>>, vector<1x4x4xbf16>
    %25 = vector.shape_cast %24 : vector<1x4x4xbf16> to vector<4x4xbf16>
    %cst_34 = arith.constant dense<0.000000e+00> : vector<128x4xf32>
    %26 = tpu.matmul %23, %25, %cst_34 {dimension_numbers = #tpu.dot_dimension_numbers<[1], [0], [0], [1], [0, 0, 1, 1], [], []>} : vector<128x4xbf16>, vector<4x4xbf16>, vector<128x4xf32> -> vector<128x4xf32>
    %27 = arith.addf %20, %26 : vector<128x4xf32>
    %c0_35 = arith.constant 0 : index
    %c1_36 = arith.constant 1 : index
    %c0_37 = arith.constant 0 : index
    %c0_38 = arith.constant 0 : index
    %28 = vector.load %arg17[%c0_35, %c1_36, %c0_37, %c0_38] : memref<4x10x10x4xf32, #tpu.memory_space<vmem>>, vector<2x8x8x4xf32>
    %29 = vector.shape_cast %28 : vector<2x8x8x4xf32> to vector<128x4xf32>
    %30 = arith.truncf %29 : vector<128x4xf32> to vector<128x4xbf16>
    %c3 = arith.constant 3 : index
    %c0_39 = arith.constant 0 : index
    %c0_40 = arith.constant 0 : index
    %31 = vector.load %arg3[%c3, %c0_39, %c0_40] : memref<27x4x4xbf16, #tpu.memory_space<vmem>>, vector<1x4x4xbf16>
    %32 = vector.shape_cast %31 : vector<1x4x4xbf16> to vector<4x4xbf16>
    %cst_41 = arith.constant dense<0.000000e+00> : vector<128x4xf32>
    %33 = tpu.matmul %30, %32, %cst_41 {dimension_numbers = #tpu.dot_dimension_numbers<[1], [0], [0], [1], [0, 0, 1, 1], [], []>} : vector<128x4xbf16>, vector<4x4xbf16>, vector<128x4xf32> -> vector<128x4xf32>
    %34 = arith.addf %27, %33 : vector<128x4xf32>
    %c0_42 = arith.constant 0 : index
    %c1_43 = arith.constant 1 : index
    %c1_44 = arith.constant 1 : index
    %c0_45 = arith.constant 0 : index
    %35 = vector.load %arg17[%c0_42, %c1_43, %c1_44, %c0_45] : memref<4x10x10x4xf32, #tpu.memory_space<vmem>>, vector<2x8x8x4xf32>
    %36 = vector.shape_cast %35 : vector<2x8x8x4xf32> to vector<128x4xf32>
    %37 = arith.truncf %36 : vector<128x4xf32> to vector<128x4xbf16>
    %c4 = arith.constant 4 : index
    %c0_46 = arith.constant 0 : index
    %c0_47 = arith.constant 0 : index
    %38 = vector.load %arg3[%c4, %c0_46, %c0_47] : memref<27x4x4xbf16, #tpu.memory_space<vmem>>, vector<1x4x4xbf16>
    %39 = vector.shape_cast %38 : vector<1x4x4xbf16> to vector<4x4xbf16>
    %cst_48 = arith.constant dense<0.000000e+00> : vector<128x4xf32>
    %40 = tpu.matmul %37, %39, %cst_48 {dimension_numbers = #tpu.dot_dimension_numbers<[1], [0], [0], [1], [0, 0, 1, 1], [], []>} : vector<128x4xbf16>, vector<4x4xbf16>, vector<128x4xf32> -> vector<128x4xf32>
    %41 = arith.addf %34, %40 : vector<128x4xf32>
    %c0_49 = arith.constant 0 : index
    %c1_50 = arith.constant 1 : index
    %c2_51 = arith.constant 2 : index
    %c0_52 = arith.constant 0 : index
    %42 = vector.load %arg17[%c0_49, %c1_50, %c2_51, %c0_52] : memref<4x10x10x4xf32, #tpu.memory_space<vmem>>, vector<2x8x8x4xf32>
    %43 = vector.shape_cast %42 : vector<2x8x8x4xf32> to vector<128x4xf32>
    %44 = arith.truncf %43 : vector<128x4xf32> to vector<128x4xbf16>
    %c5 = arith.constant 5 : index
    %c0_53 = arith.constant 0 : index
    %c0_54 = arith.constant 0 : index
    %45 = vector.load %arg3[%c5, %c0_53, %c0_54] : memref<27x4x4xbf16, #tpu.memory_space<vmem>>, vector<1x4x4xbf16>
    %46 = vector.shape_cast %45 : vector<1x4x4xbf16> to vector<4x4xbf16>
    %cst_55 = arith.constant dense<0.000000e+00> : vector<128x4xf32>
    %47 = tpu.matmul %44, %46, %cst_55 {dimension_numbers = #tpu.dot_dimension_numbers<[1], [0], [0], [1], [0, 0, 1, 1], [], []>} : vector<128x4xbf16>, vector<4x4xbf16>, vector<128x4xf32> -> vector<128x4xf32>
    %48 = arith.addf %41, %47 : vector<128x4xf32>
    %c0_56 = arith.constant 0 : index
    %c2_57 = arith.constant 2 : index
    %c0_58 = arith.constant 0 : index
    %c0_59 = arith.constant 0 : index
    %49 = vector.load %arg17[%c0_56, %c2_57, %c0_58, %c0_59] : memref<4x10x10x4xf32, #tpu.memory_space<vmem>>, vector<2x8x8x4xf32>
    %50 = vector.shape_cast %49 : vector<2x8x8x4xf32> to vector<128x4xf32>
    %51 = arith.truncf %50 : vector<128x4xf32> to vector<128x4xbf16>
    %c6 = arith.constant 6 : index
    %c0_60 = arith.constant 0 : index
    %c0_61 = arith.constant 0 : index
    %52 = vector.load %arg3[%c6, %c0_60, %c0_61] : memref<27x4x4xbf16, #tpu.memory_space<vmem>>, vector<1x4x4xbf16>
    %53 = vector.shape_cast %52 : vector<1x4x4xbf16> to vector<4x4xbf16>
    %cst_62 = arith.constant dense<0.000000e+00> : vector<128x4xf32>
    %54 = tpu.matmul %51, %53, %cst_62 {dimension_numbers = #tpu.dot_dimension_numbers<[1], [0], [0], [1], [0, 0, 1, 1], [], []>} : vector<128x4xbf16>, vector<4x4xbf16>, vector<128x4xf32> -> vector<128x4xf32>
    %55 = arith.addf %48, %54 : vector<128x4xf32>
    %c0_63 = arith.constant 0 : index
    %c2_64 = arith.constant 2 : index
    %c1_65 = arith.constant 1 : index
    %c0_66 = arith.constant 0 : index
    %56 = vector.load %arg17[%c0_63, %c2_64, %c1_65, %c0_66] : memref<4x10x10x4xf32, #tpu.memory_space<vmem>>, vector<2x8x8x4xf32>
    %57 = vector.shape_cast %56 : vector<2x8x8x4xf32> to vector<128x4xf32>
    %58 = arith.truncf %57 : vector<128x4xf32> to vector<128x4xbf16>
    %c7 = arith.constant 7 : index
    %c0_67 = arith.constant 0 : index
    %c0_68 = arith.constant 0 : index
    %59 = vector.load %arg3[%c7, %c0_67, %c0_68] : memref<27x4x4xbf16, #tpu.memory_space<vmem>>, vector<1x4x4xbf16>
    %60 = vector.shape_cast %59 : vector<1x4x4xbf16> to vector<4x4xbf16>
    %cst_69 = arith.constant dense<0.000000e+00> : vector<128x4xf32>
    %61 = tpu.matmul %58, %60, %cst_69 {dimension_numbers = #tpu.dot_dimension_numbers<[1], [0], [0], [1], [0, 0, 1, 1], [], []>} : vector<128x4xbf16>, vector<4x4xbf16>, vector<128x4xf32> -> vector<128x4xf32>
    %62 = arith.addf %55, %61 : vector<128x4xf32>
    %c0_70 = arith.constant 0 : index
    %c2_71 = arith.constant 2 : index
    %c2_72 = arith.constant 2 : index
    %c0_73 = arith.constant 0 : index
    %63 = vector.load %arg17[%c0_70, %c2_71, %c2_72, %c0_73] : memref<4x10x10x4xf32, #tpu.memory_space<vmem>>, vector<2x8x8x4xf32>
    %64 = vector.shape_cast %63 : vector<2x8x8x4xf32> to vector<128x4xf32>
    %65 = arith.truncf %64 : vector<128x4xf32> to vector<128x4xbf16>
    %c8 = arith.constant 8 : index
    %c0_74 = arith.constant 0 : index
    %c0_75 = arith.constant 0 : index
    %66 = vector.load %arg3[%c8, %c0_74, %c0_75] : memref<27x4x4xbf16, #tpu.memory_space<vmem>>, vector<1x4x4xbf16>
    %67 = vector.shape_cast %66 : vector<1x4x4xbf16> to vector<4x4xbf16>
    %cst_76 = arith.constant dense<0.000000e+00> : vector<128x4xf32>
    %68 = tpu.matmul %65, %67, %cst_76 {dimension_numbers = #tpu.dot_dimension_numbers<[1], [0], [0], [1], [0, 0, 1, 1], [], []>} : vector<128x4xbf16>, vector<4x4xbf16>, vector<128x4xf32> -> vector<128x4xf32>
    %69 = arith.addf %62, %68 : vector<128x4xf32>
    %c1_77 = arith.constant 1 : index
    %c0_78 = arith.constant 0 : index
    %c0_79 = arith.constant 0 : index
    %c0_80 = arith.constant 0 : index
    %70 = vector.load %arg17[%c1_77, %c0_78, %c0_79, %c0_80] : memref<4x10x10x4xf32, #tpu.memory_space<vmem>>, vector<2x8x8x4xf32>
    %71 = vector.shape_cast %70 : vector<2x8x8x4xf32> to vector<128x4xf32>
    %72 = arith.truncf %71 : vector<128x4xf32> to vector<128x4xbf16>
    %c9 = arith.constant 9 : index
    %c0_81 = arith.constant 0 : index
    %c0_82 = arith.constant 0 : index
    %73 = vector.load %arg3[%c9, %c0_81, %c0_82] : memref<27x4x4xbf16, #tpu.memory_space<vmem>>, vector<1x4x4xbf16>
    %74 = vector.shape_cast %73 : vector<1x4x4xbf16> to vector<4x4xbf16>
    %cst_83 = arith.constant dense<0.000000e+00> : vector<128x4xf32>
    %75 = tpu.matmul %72, %74, %cst_83 {dimension_numbers = #tpu.dot_dimension_numbers<[1], [0], [0], [1], [0, 0, 1, 1], [], []>} : vector<128x4xbf16>, vector<4x4xbf16>, vector<128x4xf32> -> vector<128x4xf32>
    %76 = arith.addf %69, %75 : vector<128x4xf32>
    %c1_84 = arith.constant 1 : index
    %c0_85 = arith.constant 0 : index
    %c1_86 = arith.constant 1 : index
    %c0_87 = arith.constant 0 : index
    %77 = vector.load %arg17[%c1_84, %c0_85, %c1_86, %c0_87] : memref<4x10x10x4xf32, #tpu.memory_space<vmem>>, vector<2x8x8x4xf32>
    %78 = vector.shape_cast %77 : vector<2x8x8x4xf32> to vector<128x4xf32>
    %79 = arith.truncf %78 : vector<128x4xf32> to vector<128x4xbf16>
    %c10 = arith.constant 10 : index
    %c0_88 = arith.constant 0 : index
    %c0_89 = arith.constant 0 : index
    %80 = vector.load %arg3[%c10, %c0_88, %c0_89] : memref<27x4x4xbf16, #tpu.memory_space<vmem>>, vector<1x4x4xbf16>
    %81 = vector.shape_cast %80 : vector<1x4x4xbf16> to vector<4x4xbf16>
    %cst_90 = arith.constant dense<0.000000e+00> : vector<128x4xf32>
    %82 = tpu.matmul %79, %81, %cst_90 {dimension_numbers = #tpu.dot_dimension_numbers<[1], [0], [0], [1], [0, 0, 1, 1], [], []>} : vector<128x4xbf16>, vector<4x4xbf16>, vector<128x4xf32> -> vector<128x4xf32>
    %83 = arith.addf %76, %82 : vector<128x4xf32>
    %c1_91 = arith.constant 1 : index
    %c0_92 = arith.constant 0 : index
    %c2_93 = arith.constant 2 : index
    %c0_94 = arith.constant 0 : index
    %84 = vector.load %arg17[%c1_91, %c0_92, %c2_93, %c0_94] : memref<4x10x10x4xf32, #tpu.memory_space<vmem>>, vector<2x8x8x4xf32>
    %85 = vector.shape_cast %84 : vector<2x8x8x4xf32> to vector<128x4xf32>
    %86 = arith.truncf %85 : vector<128x4xf32> to vector<128x4xbf16>
    %c11 = arith.constant 11 : index
    %c0_95 = arith.constant 0 : index
    %c0_96 = arith.constant 0 : index
    %87 = vector.load %arg3[%c11, %c0_95, %c0_96] : memref<27x4x4xbf16, #tpu.memory_space<vmem>>, vector<1x4x4xbf16>
    %88 = vector.shape_cast %87 : vector<1x4x4xbf16> to vector<4x4xbf16>
    %cst_97 = arith.constant dense<0.000000e+00> : vector<128x4xf32>
    %89 = tpu.matmul %86, %88, %cst_97 {dimension_numbers = #tpu.dot_dimension_numbers<[1], [0], [0], [1], [0, 0, 1, 1], [], []>} : vector<128x4xbf16>, vector<4x4xbf16>, vector<128x4xf32> -> vector<128x4xf32>
    %90 = arith.addf %83, %89 : vector<128x4xf32>
    %c1_98 = arith.constant 1 : index
    %c1_99 = arith.constant 1 : index
    %c0_100 = arith.constant 0 : index
    %c0_101 = arith.constant 0 : index
    %91 = vector.load %arg17[%c1_98, %c1_99, %c0_100, %c0_101] : memref<4x10x10x4xf32, #tpu.memory_space<vmem>>, vector<2x8x8x4xf32>
    %92 = vector.shape_cast %91 : vector<2x8x8x4xf32> to vector<128x4xf32>
    %93 = arith.truncf %92 : vector<128x4xf32> to vector<128x4xbf16>
    %c12 = arith.constant 12 : index
    %c0_102 = arith.constant 0 : index
    %c0_103 = arith.constant 0 : index
    %94 = vector.load %arg3[%c12, %c0_102, %c0_103] : memref<27x4x4xbf16, #tpu.memory_space<vmem>>, vector<1x4x4xbf16>
    %95 = vector.shape_cast %94 : vector<1x4x4xbf16> to vector<4x4xbf16>
    %cst_104 = arith.constant dense<0.000000e+00> : vector<128x4xf32>
    %96 = tpu.matmul %93, %95, %cst_104 {dimension_numbers = #tpu.dot_dimension_numbers<[1], [0], [0], [1], [0, 0, 1, 1], [], []>} : vector<128x4xbf16>, vector<4x4xbf16>, vector<128x4xf32> -> vector<128x4xf32>
    %97 = arith.addf %90, %96 : vector<128x4xf32>
    %c1_105 = arith.constant 1 : index
    %c1_106 = arith.constant 1 : index
    %c1_107 = arith.constant 1 : index
    %c0_108 = arith.constant 0 : index
    %98 = vector.load %arg17[%c1_105, %c1_106, %c1_107, %c0_108] : memref<4x10x10x4xf32, #tpu.memory_space<vmem>>, vector<2x8x8x4xf32>
    %99 = vector.shape_cast %98 : vector<2x8x8x4xf32> to vector<128x4xf32>
    %100 = arith.truncf %99 : vector<128x4xf32> to vector<128x4xbf16>
    %c13 = arith.constant 13 : index
    %c0_109 = arith.constant 0 : index
    %c0_110 = arith.constant 0 : index
    %101 = vector.load %arg3[%c13, %c0_109, %c0_110] : memref<27x4x4xbf16, #tpu.memory_space<vmem>>, vector<1x4x4xbf16>
    %102 = vector.shape_cast %101 : vector<1x4x4xbf16> to vector<4x4xbf16>
    %cst_111 = arith.constant dense<0.000000e+00> : vector<128x4xf32>
    %103 = tpu.matmul %100, %102, %cst_111 {dimension_numbers = #tpu.dot_dimension_numbers<[1], [0], [0], [1], [0, 0, 1, 1], [], []>} : vector<128x4xbf16>, vector<4x4xbf16>, vector<128x4xf32> -> vector<128x4xf32>
    %104 = arith.addf %97, %103 : vector<128x4xf32>
    %c1_112 = arith.constant 1 : index
    %c1_113 = arith.constant 1 : index
    %c2_114 = arith.constant 2 : index
    %c0_115 = arith.constant 0 : index
    %105 = vector.load %arg17[%c1_112, %c1_113, %c2_114, %c0_115] : memref<4x10x10x4xf32, #tpu.memory_space<vmem>>, vector<2x8x8x4xf32>
    %106 = vector.shape_cast %105 : vector<2x8x8x4xf32> to vector<128x4xf32>
    %107 = arith.truncf %106 : vector<128x4xf32> to vector<128x4xbf16>
    %c14 = arith.constant 14 : index
    %c0_116 = arith.constant 0 : index
    %c0_117 = arith.constant 0 : index
    %108 = vector.load %arg3[%c14, %c0_116, %c0_117] : memref<27x4x4xbf16, #tpu.memory_space<vmem>>, vector<1x4x4xbf16>
    %109 = vector.shape_cast %108 : vector<1x4x4xbf16> to vector<4x4xbf16>
    %cst_118 = arith.constant dense<0.000000e+00> : vector<128x4xf32>
    %110 = tpu.matmul %107, %109, %cst_118 {dimension_numbers = #tpu.dot_dimension_numbers<[1], [0], [0], [1], [0, 0, 1, 1], [], []>} : vector<128x4xbf16>, vector<4x4xbf16>, vector<128x4xf32> -> vector<128x4xf32>
    %111 = arith.addf %104, %110 : vector<128x4xf32>
    %c1_119 = arith.constant 1 : index
    %c2_120 = arith.constant 2 : index
    %c0_121 = arith.constant 0 : index
    %c0_122 = arith.constant 0 : index
    %112 = vector.load %arg17[%c1_119, %c2_120, %c0_121, %c0_122] : memref<4x10x10x4xf32, #tpu.memory_space<vmem>>, vector<2x8x8x4xf32>
    %113 = vector.shape_cast %112 : vector<2x8x8x4xf32> to vector<128x4xf32>
    %114 = arith.truncf %113 : vector<128x4xf32> to vector<128x4xbf16>
    %c15 = arith.constant 15 : index
    %c0_123 = arith.constant 0 : index
    %c0_124 = arith.constant 0 : index
    %115 = vector.load %arg3[%c15, %c0_123, %c0_124] : memref<27x4x4xbf16, #tpu.memory_space<vmem>>, vector<1x4x4xbf16>
    %116 = vector.shape_cast %115 : vector<1x4x4xbf16> to vector<4x4xbf16>
    %cst_125 = arith.constant dense<0.000000e+00> : vector<128x4xf32>
    %117 = tpu.matmul %114, %116, %cst_125 {dimension_numbers = #tpu.dot_dimension_numbers<[1], [0], [0], [1], [0, 0, 1, 1], [], []>} : vector<128x4xbf16>, vector<4x4xbf16>, vector<128x4xf32> -> vector<128x4xf32>
    %118 = arith.addf %111, %117 : vector<128x4xf32>
    %c1_126 = arith.constant 1 : index
    %c2_127 = arith.constant 2 : index
    %c1_128 = arith.constant 1 : index
    %c0_129 = arith.constant 0 : index
    %119 = vector.load %arg17[%c1_126, %c2_127, %c1_128, %c0_129] : memref<4x10x10x4xf32, #tpu.memory_space<vmem>>, vector<2x8x8x4xf32>
    %120 = vector.shape_cast %119 : vector<2x8x8x4xf32> to vector<128x4xf32>
    %121 = arith.truncf %120 : vector<128x4xf32> to vector<128x4xbf16>
    %c16 = arith.constant 16 : index
    %c0_130 = arith.constant 0 : index
    %c0_131 = arith.constant 0 : index
    %122 = vector.load %arg3[%c16, %c0_130, %c0_131] : memref<27x4x4xbf16, #tpu.memory_space<vmem>>, vector<1x4x4xbf16>
    %123 = vector.shape_cast %122 : vector<1x4x4xbf16> to vector<4x4xbf16>
    %cst_132 = arith.constant dense<0.000000e+00> : vector<128x4xf32>
    %124 = tpu.matmul %121, %123, %cst_132 {dimension_numbers = #tpu.dot_dimension_numbers<[1], [0], [0], [1], [0, 0, 1, 1], [], []>} : vector<128x4xbf16>, vector<4x4xbf16>, vector<128x4xf32> -> vector<128x4xf32>
    %125 = arith.addf %118, %124 : vector<128x4xf32>
    %c1_133 = arith.constant 1 : index
    %c2_134 = arith.constant 2 : index
    %c2_135 = arith.constant 2 : index
    %c0_136 = arith.constant 0 : index
    %126 = vector.load %arg17[%c1_133, %c2_134, %c2_135, %c0_136] : memref<4x10x10x4xf32, #tpu.memory_space<vmem>>, vector<2x8x8x4xf32>
    %127 = vector.shape_cast %126 : vector<2x8x8x4xf32> to vector<128x4xf32>
    %128 = arith.truncf %127 : vector<128x4xf32> to vector<128x4xbf16>
    %c17 = arith.constant 17 : index
    %c0_137 = arith.constant 0 : index
    %c0_138 = arith.constant 0 : index
    %129 = vector.load %arg3[%c17, %c0_137, %c0_138] : memref<27x4x4xbf16, #tpu.memory_space<vmem>>, vector<1x4x4xbf16>
    %130 = vector.shape_cast %129 : vector<1x4x4xbf16> to vector<4x4xbf16>
    %cst_139 = arith.constant dense<0.000000e+00> : vector<128x4xf32>
    %131 = tpu.matmul %128, %130, %cst_139 {dimension_numbers = #tpu.dot_dimension_numbers<[1], [0], [0], [1], [0, 0, 1, 1], [], []>} : vector<128x4xbf16>, vector<4x4xbf16>, vector<128x4xf32> -> vector<128x4xf32>
    %132 = arith.addf %125, %131 : vector<128x4xf32>
    %c2_140 = arith.constant 2 : index
    %c0_141 = arith.constant 0 : index
    %c0_142 = arith.constant 0 : index
    %c0_143 = arith.constant 0 : index
    %133 = vector.load %arg17[%c2_140, %c0_141, %c0_142, %c0_143] : memref<4x10x10x4xf32, #tpu.memory_space<vmem>>, vector<2x8x8x4xf32>
    %134 = vector.shape_cast %133 : vector<2x8x8x4xf32> to vector<128x4xf32>
    %135 = arith.truncf %134 : vector<128x4xf32> to vector<128x4xbf16>
    %c18 = arith.constant 18 : index
    %c0_144 = arith.constant 0 : index
    %c0_145 = arith.constant 0 : index
    %136 = vector.load %arg3[%c18, %c0_144, %c0_145] : memref<27x4x4xbf16, #tpu.memory_space<vmem>>, vector<1x4x4xbf16>
    %137 = vector.shape_cast %136 : vector<1x4x4xbf16> to vector<4x4xbf16>
    %cst_146 = arith.constant dense<0.000000e+00> : vector<128x4xf32>
    %138 = tpu.matmul %135, %137, %cst_146 {dimension_numbers = #tpu.dot_dimension_numbers<[1], [0], [0], [1], [0, 0, 1, 1], [], []>} : vector<128x4xbf16>, vector<4x4xbf16>, vector<128x4xf32> -> vector<128x4xf32>
    %139 = arith.addf %132, %138 : vector<128x4xf32>
    %c2_147 = arith.constant 2 : index
    %c0_148 = arith.constant 0 : index
    %c1_149 = arith.constant 1 : index
    %c0_150 = arith.constant 0 : index
    %140 = vector.load %arg17[%c2_147, %c0_148, %c1_149, %c0_150] : memref<4x10x10x4xf32, #tpu.memory_space<vmem>>, vector<2x8x8x4xf32>
    %141 = vector.shape_cast %140 : vector<2x8x8x4xf32> to vector<128x4xf32>
    %142 = arith.truncf %141 : vector<128x4xf32> to vector<128x4xbf16>
    %c19 = arith.constant 19 : index
    %c0_151 = arith.constant 0 : index
    %c0_152 = arith.constant 0 : index
    %143 = vector.load %arg3[%c19, %c0_151, %c0_152] : memref<27x4x4xbf16, #tpu.memory_space<vmem>>, vector<1x4x4xbf16>
    %144 = vector.shape_cast %143 : vector<1x4x4xbf16> to vector<4x4xbf16>
    %cst_153 = arith.constant dense<0.000000e+00> : vector<128x4xf32>
    %145 = tpu.matmul %142, %144, %cst_153 {dimension_numbers = #tpu.dot_dimension_numbers<[1], [0], [0], [1], [0, 0, 1, 1], [], []>} : vector<128x4xbf16>, vector<4x4xbf16>, vector<128x4xf32> -> vector<128x4xf32>
    %146 = arith.addf %139, %145 : vector<128x4xf32>
    %c2_154 = arith.constant 2 : index
    %c0_155 = arith.constant 0 : index
    %c2_156 = arith.constant 2 : index
    %c0_157 = arith.constant 0 : index
    %147 = vector.load %arg17[%c2_154, %c0_155, %c2_156, %c0_157] : memref<4x10x10x4xf32, #tpu.memory_space<vmem>>, vector<2x8x8x4xf32>
    %148 = vector.shape_cast %147 : vector<2x8x8x4xf32> to vector<128x4xf32>
    %149 = arith.truncf %148 : vector<128x4xf32> to vector<128x4xbf16>
    %c20 = arith.constant 20 : index
    %c0_158 = arith.constant 0 : index
    %c0_159 = arith.constant 0 : index
    %150 = vector.load %arg3[%c20, %c0_158, %c0_159] : memref<27x4x4xbf16, #tpu.memory_space<vmem>>, vector<1x4x4xbf16>
    %151 = vector.shape_cast %150 : vector<1x4x4xbf16> to vector<4x4xbf16>
    %cst_160 = arith.constant dense<0.000000e+00> : vector<128x4xf32>
    %152 = tpu.matmul %149, %151, %cst_160 {dimension_numbers = #tpu.dot_dimension_numbers<[1], [0], [0], [1], [0, 0, 1, 1], [], []>} : vector<128x4xbf16>, vector<4x4xbf16>, vector<128x4xf32> -> vector<128x4xf32>
    %153 = arith.addf %146, %152 : vector<128x4xf32>
    %c2_161 = arith.constant 2 : index
    %c1_162 = arith.constant 1 : index
    %c0_163 = arith.constant 0 : index
    %c0_164 = arith.constant 0 : index
    %154 = vector.load %arg17[%c2_161, %c1_162, %c0_163, %c0_164] : memref<4x10x10x4xf32, #tpu.memory_space<vmem>>, vector<2x8x8x4xf32>
    %155 = vector.shape_cast %154 : vector<2x8x8x4xf32> to vector<128x4xf32>
    %156 = arith.truncf %155 : vector<128x4xf32> to vector<128x4xbf16>
    %c21 = arith.constant 21 : index
    %c0_165 = arith.constant 0 : index
    %c0_166 = arith.constant 0 : index
    %157 = vector.load %arg3[%c21, %c0_165, %c0_166] : memref<27x4x4xbf16, #tpu.memory_space<vmem>>, vector<1x4x4xbf16>
    %158 = vector.shape_cast %157 : vector<1x4x4xbf16> to vector<4x4xbf16>
    %cst_167 = arith.constant dense<0.000000e+00> : vector<128x4xf32>
    %159 = tpu.matmul %156, %158, %cst_167 {dimension_numbers = #tpu.dot_dimension_numbers<[1], [0], [0], [1], [0, 0, 1, 1], [], []>} : vector<128x4xbf16>, vector<4x4xbf16>, vector<128x4xf32> -> vector<128x4xf32>
    %160 = arith.addf %153, %159 : vector<128x4xf32>
    %c2_168 = arith.constant 2 : index
    %c1_169 = arith.constant 1 : index
    %c1_170 = arith.constant 1 : index
    %c0_171 = arith.constant 0 : index
    %161 = vector.load %arg17[%c2_168, %c1_169, %c1_170, %c0_171] : memref<4x10x10x4xf32, #tpu.memory_space<vmem>>, vector<2x8x8x4xf32>
    %162 = vector.shape_cast %161 : vector<2x8x8x4xf32> to vector<128x4xf32>
    %163 = arith.truncf %162 : vector<128x4xf32> to vector<128x4xbf16>
    %c22 = arith.constant 22 : index
    %c0_172 = arith.constant 0 : index
    %c0_173 = arith.constant 0 : index
    %164 = vector.load %arg3[%c22, %c0_172, %c0_173] : memref<27x4x4xbf16, #tpu.memory_space<vmem>>, vector<1x4x4xbf16>
    %165 = vector.shape_cast %164 : vector<1x4x4xbf16> to vector<4x4xbf16>
    %cst_174 = arith.constant dense<0.000000e+00> : vector<128x4xf32>
    %166 = tpu.matmul %163, %165, %cst_174 {dimension_numbers = #tpu.dot_dimension_numbers<[1], [0], [0], [1], [0, 0, 1, 1], [], []>} : vector<128x4xbf16>, vector<4x4xbf16>, vector<128x4xf32> -> vector<128x4xf32>
    %167 = arith.addf %160, %166 : vector<128x4xf32>
    %c2_175 = arith.constant 2 : index
    %c1_176 = arith.constant 1 : index
    %c2_177 = arith.constant 2 : index
    %c0_178 = arith.constant 0 : index
    %168 = vector.load %arg17[%c2_175, %c1_176, %c2_177, %c0_178] : memref<4x10x10x4xf32, #tpu.memory_space<vmem>>, vector<2x8x8x4xf32>
    %169 = vector.shape_cast %168 : vector<2x8x8x4xf32> to vector<128x4xf32>
    %170 = arith.truncf %169 : vector<128x4xf32> to vector<128x4xbf16>
    %c23 = arith.constant 23 : index
    %c0_179 = arith.constant 0 : index
    %c0_180 = arith.constant 0 : index
    %171 = vector.load %arg3[%c23, %c0_179, %c0_180] : memref<27x4x4xbf16, #tpu.memory_space<vmem>>, vector<1x4x4xbf16>
    %172 = vector.shape_cast %171 : vector<1x4x4xbf16> to vector<4x4xbf16>
    %cst_181 = arith.constant dense<0.000000e+00> : vector<128x4xf32>
    %173 = tpu.matmul %170, %172, %cst_181 {dimension_numbers = #tpu.dot_dimension_numbers<[1], [0], [0], [1], [0, 0, 1, 1], [], []>} : vector<128x4xbf16>, vector<4x4xbf16>, vector<128x4xf32> -> vector<128x4xf32>
    %174 = arith.addf %167, %173 : vector<128x4xf32>
    %c2_182 = arith.constant 2 : index
    %c2_183 = arith.constant 2 : index
    %c0_184 = arith.constant 0 : index
    %c0_185 = arith.constant 0 : index
    %175 = vector.load %arg17[%c2_182, %c2_183, %c0_184, %c0_185] : memref<4x10x10x4xf32, #tpu.memory_space<vmem>>, vector<2x8x8x4xf32>
    %176 = vector.shape_cast %175 : vector<2x8x8x4xf32> to vector<128x4xf32>
    %177 = arith.truncf %176 : vector<128x4xf32> to vector<128x4xbf16>
    %c24 = arith.constant 24 : index
    %c0_186 = arith.constant 0 : index
    %c0_187 = arith.constant 0 : index
    %178 = vector.load %arg3[%c24, %c0_186, %c0_187] : memref<27x4x4xbf16, #tpu.memory_space<vmem>>, vector<1x4x4xbf16>
    %179 = vector.shape_cast %178 : vector<1x4x4xbf16> to vector<4x4xbf16>
    %cst_188 = arith.constant dense<0.000000e+00> : vector<128x4xf32>
    %180 = tpu.matmul %177, %179, %cst_188 {dimension_numbers = #tpu.dot_dimension_numbers<[1], [0], [0], [1], [0, 0, 1, 1], [], []>} : vector<128x4xbf16>, vector<4x4xbf16>, vector<128x4xf32> -> vector<128x4xf32>
    %181 = arith.addf %174, %180 : vector<128x4xf32>
    %c2_189 = arith.constant 2 : index
    %c2_190 = arith.constant 2 : index
    %c1_191 = arith.constant 1 : index
    %c0_192 = arith.constant 0 : index
    %182 = vector.load %arg17[%c2_189, %c2_190, %c1_191, %c0_192] : memref<4x10x10x4xf32, #tpu.memory_space<vmem>>, vector<2x8x8x4xf32>
    %183 = vector.shape_cast %182 : vector<2x8x8x4xf32> to vector<128x4xf32>
    %184 = arith.truncf %183 : vector<128x4xf32> to vector<128x4xbf16>
    %c25 = arith.constant 25 : index
    %c0_193 = arith.constant 0 : index
    %c0_194 = arith.constant 0 : index
    %185 = vector.load %arg3[%c25, %c0_193, %c0_194] : memref<27x4x4xbf16, #tpu.memory_space<vmem>>, vector<1x4x4xbf16>
    %186 = vector.shape_cast %185 : vector<1x4x4xbf16> to vector<4x4xbf16>
    %cst_195 = arith.constant dense<0.000000e+00> : vector<128x4xf32>
    %187 = tpu.matmul %184, %186, %cst_195 {dimension_numbers = #tpu.dot_dimension_numbers<[1], [0], [0], [1], [0, 0, 1, 1], [], []>} : vector<128x4xbf16>, vector<4x4xbf16>, vector<128x4xf32> -> vector<128x4xf32>
    %188 = arith.addf %181, %187 : vector<128x4xf32>
    %c2_196 = arith.constant 2 : index
    %c2_197 = arith.constant 2 : index
    %c2_198 = arith.constant 2 : index
    %c0_199 = arith.constant 0 : index
    %189 = vector.load %arg17[%c2_196, %c2_197, %c2_198, %c0_199] : memref<4x10x10x4xf32, #tpu.memory_space<vmem>>, vector<2x8x8x4xf32>
    %190 = vector.shape_cast %189 : vector<2x8x8x4xf32> to vector<128x4xf32>
    %191 = arith.truncf %190 : vector<128x4xf32> to vector<128x4xbf16>
    %c26 = arith.constant 26 : index
    %c0_200 = arith.constant 0 : index
    %c0_201 = arith.constant 0 : index
    %192 = vector.load %arg3[%c26, %c0_200, %c0_201] : memref<27x4x4xbf16, #tpu.memory_space<vmem>>, vector<1x4x4xbf16>
    %193 = vector.shape_cast %192 : vector<1x4x4xbf16> to vector<4x4xbf16>
    %cst_202 = arith.constant dense<0.000000e+00> : vector<128x4xf32>
    %194 = tpu.matmul %191, %193, %cst_202 {dimension_numbers = #tpu.dot_dimension_numbers<[1], [0], [0], [1], [0, 0, 1, 1], [], []>} : vector<128x4xbf16>, vector<4x4xbf16>, vector<128x4xf32> -> vector<128x4xf32>
    %195 = arith.addf %188, %194 : vector<128x4xf32>
    %c0_203 = arith.constant 0 : index
    %c0_204 = arith.constant 0 : index
    %196 = vector.load %arg4[%c0_203, %c0_204] : memref<1x4xf32, #tpu.memory_space<vmem>>, vector<1x4xf32>
    %197 = vector.broadcast %196 : vector<1x4xf32> to vector<128x4xf32>
    %198 = arith.mulf %195, %197 : vector<128x4xf32>
    %c0_205 = arith.constant 0 : index
    %c0_206 = arith.constant 0 : index
    %199 = vector.load %arg5[%c0_205, %c0_206] : memref<1x4xf32, #tpu.memory_space<vmem>>, vector<1x4xf32>
    %200 = vector.broadcast %199 : vector<1x4xf32> to vector<128x4xf32>
    %201 = arith.addf %198, %200 : vector<128x4xf32>
    %cst_207 = arith.constant 0.000000e+00 : f32
    %202 = vector.broadcast %cst_207 : f32 to vector<128x4xf32>
    %203 = arith.maximumf %201, %202 : vector<128x4xf32>
    %204 = arith.truncf %203 : vector<128x4xf32> to vector<128x4xbf16>
    %c0_208 = arith.constant 0 : index
    %c0_209 = arith.constant 0 : index
    %205 = vector.load %arg6[%c0_208, %c0_209] : memref<4x4xbf16, #tpu.memory_space<vmem>>, vector<4x4xbf16>
    %cst_210 = arith.constant dense<0.000000e+00> : vector<128x4xf32>
    %206 = tpu.matmul %204, %205, %cst_210 {dimension_numbers = #tpu.dot_dimension_numbers<[1], [0], [0], [1], [0, 0, 1, 1], [], []>} : vector<128x4xbf16>, vector<4x4xbf16>, vector<128x4xf32> -> vector<128x4xf32>
    %c0_211 = arith.constant 0 : index
    %c0_212 = arith.constant 0 : index
    %207 = vector.load %arg7[%c0_211, %c0_212] : memref<1x4xf32, #tpu.memory_space<vmem>>, vector<1x4xf32>
    %208 = vector.broadcast %207 : vector<1x4xf32> to vector<128x4xf32>
    %209 = arith.mulf %206, %208 : vector<128x4xf32>
    %c0_213 = arith.constant 0 : index
    %c0_214 = arith.constant 0 : index
    %210 = vector.load %arg8[%c0_213, %c0_214] : memref<1x4xf32, #tpu.memory_space<vmem>>, vector<1x4xf32>
    %211 = vector.broadcast %210 : vector<1x4xf32> to vector<128x4xf32>
    %212 = arith.addf %209, %211 : vector<128x4xf32>
    %cst_215 = arith.constant 0.000000e+00 : f32
    %213 = vector.broadcast %cst_215 : f32 to vector<128x4xf32>
    %214 = arith.maximumf %212, %213 : vector<128x4xf32>
    %215 = vector.shape_cast %214 : vector<128x4xf32> to vector<2x8x8x4xf32>
    %cst_216 = arith.constant 0.000000e+00 : f32
    %216 = vector.broadcast %cst_216 : f32 to vector<8x8xf32>
    %cst_217 = arith.constant 0.000000e+00 : f32
    %217 = vector.broadcast %cst_217 : f32 to vector<8x8xf32>
    %218 = vector.extract_strided_slice %215 {offsets = [0, 0, 0, 0], sizes = [1, 8, 8, 4], strides = [1, 1, 1, 1]} : vector<2x8x8x4xf32> to vector<1x8x8x4xf32>
    %219 = vector.shape_cast %218 : vector<1x8x8x4xf32> to vector<8x8x4xf32>
    %cst_218 = arith.constant dense<0.000000e+00> : vector<8x4xf32>
    %220 = vector.multi_reduction <add>, %219, %cst_218 [1] : vector<8x8x4xf32> to vector<8x4xf32>
    %cst_219 = arith.constant 8.000000e+00 : f32
    %221 = vector.broadcast %cst_219 : f32 to vector<8x4xf32>
    %222 = arith.divf %220, %221 : vector<8x4xf32>
    %cst_220 = arith.constant dense<0.000000e+00> : vector<8x4xf32>
    %223 = vector.multi_reduction <add>, %219, %cst_220 [0] : vector<8x8x4xf32> to vector<8x4xf32>
    %cst_221 = arith.constant 8.000000e+00 : f32
    %224 = vector.broadcast %cst_221 : f32 to vector<8x4xf32>
    %225 = arith.divf %223, %224 : vector<8x4xf32>
    %226 = arith.truncf %222 : vector<8x4xf32> to vector<8x4xbf16>
    %c0_222 = arith.constant 0 : index
    %c0_223 = arith.constant 0 : index
    %c0_224 = arith.constant 0 : index
    %227 = vector.load %arg9[%c0_222, %c0_223, %c0_224] : memref<2x4x8xbf16, #tpu.memory_space<vmem>>, vector<1x4x8xbf16>
    %228 = vector.shape_cast %227 : vector<1x4x8xbf16> to vector<4x8xbf16>
    %cst_225 = arith.constant dense<0.000000e+00> : vector<8x8xf32>
    %229 = tpu.matmul %226, %228, %cst_225 {dimension_numbers = #tpu.dot_dimension_numbers<[1], [0], [0], [1], [0, 0, 1, 1], [], []>} : vector<8x4xbf16>, vector<4x8xbf16>, vector<8x8xf32> -> vector<8x8xf32>
    %230 = arith.addf %216, %229 : vector<8x8xf32>
    %231 = arith.truncf %225 : vector<8x4xf32> to vector<8x4xbf16>
    %c0_226 = arith.constant 0 : index
    %c0_227 = arith.constant 0 : index
    %c0_228 = arith.constant 0 : index
    %232 = vector.load %arg9[%c0_226, %c0_227, %c0_228] : memref<2x4x8xbf16, #tpu.memory_space<vmem>>, vector<1x4x8xbf16>
    %233 = vector.shape_cast %232 : vector<1x4x8xbf16> to vector<4x8xbf16>
    %cst_229 = arith.constant dense<0.000000e+00> : vector<8x8xf32>
    %234 = tpu.matmul %231, %233, %cst_229 {dimension_numbers = #tpu.dot_dimension_numbers<[1], [0], [0], [1], [0, 0, 1, 1], [], []>} : vector<8x4xbf16>, vector<4x8xbf16>, vector<8x8xf32> -> vector<8x8xf32>
    %235 = arith.addf %217, %234 : vector<8x8xf32>
    %236 = vector.extract_strided_slice %215 {offsets = [1, 0, 0, 0], sizes = [1, 8, 8, 4], strides = [1, 1, 1, 1]} : vector<2x8x8x4xf32> to vector<1x8x8x4xf32>
    %237 = vector.shape_cast %236 : vector<1x8x8x4xf32> to vector<8x8x4xf32>
    %cst_230 = arith.constant dense<0.000000e+00> : vector<8x4xf32>
    %238 = vector.multi_reduction <add>, %237, %cst_230 [1] : vector<8x8x4xf32> to vector<8x4xf32>
    %cst_231 = arith.constant 8.000000e+00 : f32
    %239 = vector.broadcast %cst_231 : f32 to vector<8x4xf32>
    %240 = arith.divf %238, %239 : vector<8x4xf32>
    %cst_232 = arith.constant dense<0.000000e+00> : vector<8x4xf32>
    %241 = vector.multi_reduction <add>, %237, %cst_232 [0] : vector<8x8x4xf32> to vector<8x4xf32>
    %cst_233 = arith.constant 8.000000e+00 : f32
    %242 = vector.broadcast %cst_233 : f32 to vector<8x4xf32>
    %243 = arith.divf %241, %242 : vector<8x4xf32>
    %244 = arith.truncf %240 : vector<8x4xf32> to vector<8x4xbf16>
    %c1_234 = arith.constant 1 : index
    %c0_235 = arith.constant 0 : index
    %c0_236 = arith.constant 0 : index
    %245 = vector.load %arg9[%c1_234, %c0_235, %c0_236] : memref<2x4x8xbf16, #tpu.memory_space<vmem>>, vector<1x4x8xbf16>
    %246 = vector.shape_cast %245 : vector<1x4x8xbf16> to vector<4x8xbf16>
    %cst_237 = arith.constant dense<0.000000e+00> : vector<8x8xf32>
    %247 = tpu.matmul %244, %246, %cst_237 {dimension_numbers = #tpu.dot_dimension_numbers<[1], [0], [0], [1], [0, 0, 1, 1], [], []>} : vector<8x4xbf16>, vector<4x8xbf16>, vector<8x8xf32> -> vector<8x8xf32>
    %248 = arith.addf %230, %247 : vector<8x8xf32>
    %249 = arith.truncf %243 : vector<8x4xf32> to vector<8x4xbf16>
    %c1_238 = arith.constant 1 : index
    %c0_239 = arith.constant 0 : index
    %c0_240 = arith.constant 0 : index
    %250 = vector.load %arg9[%c1_238, %c0_239, %c0_240] : memref<2x4x8xbf16, #tpu.memory_space<vmem>>, vector<1x4x8xbf16>
    %251 = vector.shape_cast %250 : vector<1x4x8xbf16> to vector<4x8xbf16>
    %cst_241 = arith.constant dense<0.000000e+00> : vector<8x8xf32>
    %252 = tpu.matmul %249, %251, %cst_241 {dimension_numbers = #tpu.dot_dimension_numbers<[1], [0], [0], [1], [0, 0, 1, 1], [], []>} : vector<8x4xbf16>, vector<4x8xbf16>, vector<8x8xf32> -> vector<8x8xf32>
    %253 = arith.addf %235, %252 : vector<8x8xf32>
    %c0_242 = arith.constant 0 : index
    %c0_243 = arith.constant 0 : index
    %254 = vector.load %arg10[%c0_242, %c0_243] : memref<1x8xf32, #tpu.memory_space<vmem>>, vector<1x8xf32>
    %255 = vector.broadcast %254 : vector<1x8xf32> to vector<8x8xf32>
    %256 = arith.mulf %248, %255 : vector<8x8xf32>
    %c0_244 = arith.constant 0 : index
    %c0_245 = arith.constant 0 : index
    %257 = vector.load %arg11[%c0_244, %c0_245] : memref<1x8xf32, #tpu.memory_space<vmem>>, vector<1x8xf32>
    %258 = vector.broadcast %257 : vector<1x8xf32> to vector<8x8xf32>
    %259 = arith.addf %256, %258 : vector<8x8xf32>
    %cst_246 = arith.constant 0.000000e+00 : f32
    %260 = vector.broadcast %cst_246 : f32 to vector<8x8xf32>
    %261 = arith.maximumf %259, %260 : vector<8x8xf32>
    %c0_247 = arith.constant 0 : index
    %c0_248 = arith.constant 0 : index
    %262 = vector.load %arg10[%c0_247, %c0_248] : memref<1x8xf32, #tpu.memory_space<vmem>>, vector<1x8xf32>
    %263 = vector.broadcast %262 : vector<1x8xf32> to vector<8x8xf32>
    %264 = arith.mulf %253, %263 : vector<8x8xf32>
    %c0_249 = arith.constant 0 : index
    %c0_250 = arith.constant 0 : index
    %265 = vector.load %arg11[%c0_249, %c0_250] : memref<1x8xf32, #tpu.memory_space<vmem>>, vector<1x8xf32>
    %266 = vector.broadcast %265 : vector<1x8xf32> to vector<8x8xf32>
    %267 = arith.addf %264, %266 : vector<8x8xf32>
    %cst_251 = arith.constant 0.000000e+00 : f32
    %268 = vector.broadcast %cst_251 : f32 to vector<8x8xf32>
    %269 = arith.maximumf %267, %268 : vector<8x8xf32>
    %270 = arith.truncf %261 : vector<8x8xf32> to vector<8x8xbf16>
    %c0_252 = arith.constant 0 : index
    %c0_253 = arith.constant 0 : index
    %c0_254 = arith.constant 0 : index
    %271 = vector.load %arg12[%c0_252, %c0_253, %c0_254] : memref<2x8x4xbf16, #tpu.memory_space<vmem>>, vector<1x8x4xbf16>
    %272 = vector.shape_cast %271 : vector<1x8x4xbf16> to vector<8x4xbf16>
    %cst_255 = arith.constant dense<0.000000e+00> : vector<8x4xf32>
    %273 = tpu.matmul %270, %272, %cst_255 {dimension_numbers = #tpu.dot_dimension_numbers<[1], [0], [0], [1], [0, 0, 1, 1], [], []>} : vector<8x8xbf16>, vector<8x4xbf16>, vector<8x4xf32> -> vector<8x4xf32>
    %c0_256 = arith.constant 0 : index
    %c0_257 = arith.constant 0 : index
    %c0_258 = arith.constant 0 : index
    %274 = vector.load %arg13[%c0_256, %c0_257, %c0_258] : memref<2x1x4xf32, #tpu.memory_space<vmem>>, vector<1x1x4xf32>
    %275 = vector.shape_cast %274 : vector<1x1x4xf32> to vector<1x4xf32>
    %276 = vector.broadcast %275 : vector<1x4xf32> to vector<8x4xf32>
    %277 = arith.addf %273, %276 : vector<8x4xf32>
    %278 = arith.negf %277 : vector<8x4xf32>
    %279 = math.exp %278 : vector<8x4xf32>
    %cst_259 = arith.constant 1.000000e+00 : f32
    %280 = vector.broadcast %cst_259 : f32 to vector<8x4xf32>
    %281 = arith.addf %280, %279 : vector<8x4xf32>
    %282 = arith.divf %280, %281 : vector<8x4xf32>
    %283 = arith.truncf %269 : vector<8x8xf32> to vector<8x8xbf16>
    %c0_260 = arith.constant 0 : index
    %c0_261 = arith.constant 0 : index
    %c0_262 = arith.constant 0 : index
    %284 = vector.load %arg14[%c0_260, %c0_261, %c0_262] : memref<2x8x4xbf16, #tpu.memory_space<vmem>>, vector<1x8x4xbf16>
    %285 = vector.shape_cast %284 : vector<1x8x4xbf16> to vector<8x4xbf16>
    %cst_263 = arith.constant dense<0.000000e+00> : vector<8x4xf32>
    %286 = tpu.matmul %283, %285, %cst_263 {dimension_numbers = #tpu.dot_dimension_numbers<[1], [0], [0], [1], [0, 0, 1, 1], [], []>} : vector<8x8xbf16>, vector<8x4xbf16>, vector<8x4xf32> -> vector<8x4xf32>
    %c0_264 = arith.constant 0 : index
    %c0_265 = arith.constant 0 : index
    %c0_266 = arith.constant 0 : index
    %287 = vector.load %arg15[%c0_264, %c0_265, %c0_266] : memref<2x1x4xf32, #tpu.memory_space<vmem>>, vector<1x1x4xf32>
    %288 = vector.shape_cast %287 : vector<1x1x4xf32> to vector<1x4xf32>
    %289 = vector.broadcast %288 : vector<1x4xf32> to vector<8x4xf32>
    %290 = arith.addf %286, %289 : vector<8x4xf32>
    %291 = arith.negf %290 : vector<8x4xf32>
    %292 = math.exp %291 : vector<8x4xf32>
    %cst_267 = arith.constant 1.000000e+00 : f32
    %293 = vector.broadcast %cst_267 : f32 to vector<8x4xf32>
    %294 = arith.addf %293, %292 : vector<8x4xf32>
    %295 = arith.divf %293, %294 : vector<8x4xf32>
    %296 = vector.extract_strided_slice %215 {offsets = [0, 0, 0, 0], sizes = [1, 8, 8, 4], strides = [1, 1, 1, 1]} : vector<2x8x8x4xf32> to vector<1x8x8x4xf32>
    %297 = vector.shape_cast %296 : vector<1x8x8x4xf32> to vector<8x8x4xf32>
    %298 = vector.shape_cast %282 : vector<8x4xf32> to vector<8x1x4xf32>
    %299 = vector.broadcast %298 : vector<8x1x4xf32> to vector<8x8x4xf32>
    %300 = arith.mulf %297, %299 : vector<8x8x4xf32>
    %301 = vector.shape_cast %295 : vector<8x4xf32> to vector<1x8x4xf32>
    %302 = vector.broadcast %301 : vector<1x8x4xf32> to vector<8x8x4xf32>
    %303 = arith.mulf %300, %302 : vector<8x8x4xf32>
    %c0_268 = arith.constant 0 : index
    %c0_269 = arith.constant 0 : index
    %c0_270 = arith.constant 0 : index
    %c0_271 = arith.constant 0 : index
    %c0_272 = arith.constant 0 : index
    %304 = vector.load %arg2[%c0_268, %c0_269, %c0_270, %c0_271, %c0_272] : memref<1x2x8x8x4xf32, #tpu.memory_space<vmem>>, vector<1x1x8x8x4xf32>
    %305 = vector.shape_cast %304 : vector<1x1x8x8x4xf32> to vector<8x8x4xf32>
    %306 = arith.addf %303, %305 : vector<8x8x4xf32>
    %c0_273 = arith.constant 0 : index
    %c0_274 = arith.constant 0 : index
    %c0_275 = arith.constant 0 : index
    %c0_276 = arith.constant 0 : index
    %c0_277 = arith.constant 0 : index
    %307 = vector.load %arg16[%c0_273, %c0_274, %c0_275, %c0_276, %c0_277] : memref<1x2x8x8x4xf32, #tpu.memory_space<vmem>>, vector<1x1x8x8x4xf32>
    %308 = vector.shape_cast %307 : vector<1x1x8x8x4xf32> to vector<8x8x4xf32>
    %309 = vector.shape_cast %306 : vector<8x8x4xf32> to vector<1x1x8x8x4xf32>
    tpu.vector_store %arg16[%c0_273, %c0_274, %c0_275, %c0_276, %c0_277], %309 {strides = array<i32>} : memref<1x2x8x8x4xf32, #tpu.memory_space<vmem>>, vector<1x1x8x8x4xf32>,
    %310 = arith.truncf %261 : vector<8x8xf32> to vector<8x8xbf16>
    %c1_278 = arith.constant 1 : index
    %c0_279 = arith.constant 0 : index
    %c0_280 = arith.constant 0 : index
    %311 = vector.load %arg12[%c1_278, %c0_279, %c0_280] : memref<2x8x4xbf16, #tpu.memory_space<vmem>>, vector<1x8x4xbf16>
    %312 = vector.shape_cast %311 : vector<1x8x4xbf16> to vector<8x4xbf16>
    %cst_281 = arith.constant dense<0.000000e+00> : vector<8x4xf32>
    %313 = tpu.matmul %310, %312, %cst_281 {dimension_numbers = #tpu.dot_dimension_numbers<[1], [0], [0], [1], [0, 0, 1, 1], [], []>} : vector<8x8xbf16>, vector<8x4xbf16>, vector<8x4xf32> -> vector<8x4xf32>
    %c1_282 = arith.constant 1 : index
    %c0_283 = arith.constant 0 : index
    %c0_284 = arith.constant 0 : index
    %314 = vector.load %arg13[%c1_282, %c0_283, %c0_284] : memref<2x1x4xf32, #tpu.memory_space<vmem>>, vector<1x1x4xf32>
    %315 = vector.shape_cast %314 : vector<1x1x4xf32> to vector<1x4xf32>
    %316 = vector.broadcast %315 : vector<1x4xf32> to vector<8x4xf32>
    %317 = arith.addf %313, %316 : vector<8x4xf32>
    %318 = arith.negf %317 : vector<8x4xf32>
    %319 = math.exp %318 : vector<8x4xf32>
    %cst_285 = arith.constant 1.000000e+00 : f32
    %320 = vector.broadcast %cst_285 : f32 to vector<8x4xf32>
    %321 = arith.addf %320, %319 : vector<8x4xf32>
    %322 = arith.divf %320, %321 : vector<8x4xf32>
    %323 = arith.truncf %269 : vector<8x8xf32> to vector<8x8xbf16>
    %c1_286 = arith.constant 1 : index
    %c0_287 = arith.constant 0 : index
    %c0_288 = arith.constant 0 : index
    %324 = vector.load %arg14[%c1_286, %c0_287, %c0_288] : memref<2x8x4xbf16, #tpu.memory_space<vmem>>, vector<1x8x4xbf16>
    %325 = vector.shape_cast %324 : vector<1x8x4xbf16> to vector<8x4xbf16>
    %cst_289 = arith.constant dense<0.000000e+00> : vector<8x4xf32>
    %326 = tpu.matmul %323, %325, %cst_289 {dimension_numbers = #tpu.dot_dimension_numbers<[1], [0], [0], [1], [0, 0, 1, 1], [], []>} : vector<8x8xbf16>, vector<8x4xbf16>, vector<8x4xf32> -> vector<8x4xf32>
    %c1_290 = arith.constant 1 : index
    %c0_291 = arith.constant 0 : index
    %c0_292 = arith.constant 0 : index
    %327 = vector.load %arg15[%c1_290, %c0_291, %c0_292] : memref<2x1x4xf32, #tpu.memory_space<vmem>>, vector<1x1x4xf32>
    %328 = vector.shape_cast %327 : vector<1x1x4xf32> to vector<1x4xf32>
    %329 = vector.broadcast %328 : vector<1x4xf32> to vector<8x4xf32>
    %330 = arith.addf %326, %329 : vector<8x4xf32>
    %331 = arith.negf %330 : vector<8x4xf32>
    %332 = math.exp %331 : vector<8x4xf32>
    %cst_293 = arith.constant 1.000000e+00 : f32
    %333 = vector.broadcast %cst_293 : f32 to vector<8x4xf32>
    %334 = arith.addf %333, %332 : vector<8x4xf32>
    %335 = arith.divf %333, %334 : vector<8x4xf32>
    %336 = vector.extract_strided_slice %215 {offsets = [1, 0, 0, 0], sizes = [1, 8, 8, 4], strides = [1, 1, 1, 1]} : vector<2x8x8x4xf32> to vector<1x8x8x4xf32>
    %337 = vector.shape_cast %336 : vector<1x8x8x4xf32> to vector<8x8x4xf32>
    %338 = vector.shape_cast %322 : vector<8x4xf32> to vector<8x1x4xf32>
    %339 = vector.broadcast %338 : vector<8x1x4xf32> to vector<8x8x4xf32>
    %340 = arith.mulf %337, %339 : vector<8x8x4xf32>
    %341 = vector.shape_cast %335 : vector<8x4xf32> to vector<1x8x4xf32>
    %342 = vector.broadcast %341 : vector<1x8x4xf32> to vector<8x8x4xf32>
    %343 = arith.mulf %340, %342 : vector<8x8x4xf32>
    %c0_294 = arith.constant 0 : index
    %c1_295 = arith.constant 1 : index
    %c0_296 = arith.constant 0 : index
    %c0_297 = arith.constant 0 : index
    %c0_298 = arith.constant 0 : index
    %344 = vector.load %arg2[%c0_294, %c1_295, %c0_296, %c0_297, %c0_298] : memref<1x2x8x8x4xf32, #tpu.memory_space<vmem>>, vector<1x1x8x8x4xf32>
    %345 = vector.shape_cast %344 : vector<1x1x8x8x4xf32> to vector<8x8x4xf32>
    %346 = arith.addf %343, %345 : vector<8x8x4xf32>
    %c0_299 = arith.constant 0 : index
    %c1_300 = arith.constant 1 : index
    %c0_301 = arith.constant 0 : index
    %c0_302 = arith.constant 0 : index
    %c0_303 = arith.constant 0 : index
    %347 = vector.load %arg16[%c0_299, %c1_300, %c0_301, %c0_302, %c0_303] : memref<1x2x8x8x4xf32, #tpu.memory_space<vmem>>, vector<1x1x8x8x4xf32>
    %348 = vector.shape_cast %347 : vector<1x1x8x8x4xf32> to vector<8x8x4xf32>
    %349 = vector.shape_cast %346 : vector<8x8x4xf32> to vector<1x1x8x8x4xf32>
    tpu.vector_store %arg16[%c0_299, %c1_300, %c0_301, %c0_302, %c0_303], %349 {strides = array<i32>} : memref<1x2x8x8x4xf32, #tpu.memory_space<vmem>>, vector<1x1x8x8x4xf32>,
    return
  }
  func.func @transform_0(%arg0: i32) -> (i32, i32, i32, i32, i32) {
    %c0_i32 = arith.constant 0 : i32
    %c0_i32_0 = arith.constant 0 : i32
    %c0_i32_1 = arith.constant 0 : i32
    %c0_i32_2 = arith.constant 0 : i32
    %c0_i32_3 = arith.constant 0 : i32
    return %arg0, %c0_i32, %c0_i32_0, %c0_i32_1, %c0_i32_2 : i32, i32, i32, i32, i32
  }
  func.func @transform_1(%arg0: i32) -> (i32, i32, i32, i32, i32) {
    %c0_i32 = arith.constant 0 : i32
    %c0_i32_0 = arith.constant 0 : i32
    %c0_i32_1 = arith.constant 0 : i32
    %c0_i32_2 = arith.constant 0 : i32
    %c0_i32_3 = arith.constant 0 : i32
    return %arg0, %c0_i32, %c0_i32_0, %c0_i32_1, %c0_i32_2 : i32, i32, i32, i32, i32
  }
  func.func @transform_2(%arg0: i32) -> (i32, i32, i32) {
    %c0_i32 = arith.constant 0 : i32
    %c0_i32_0 = arith.constant 0 : i32
    %c0_i32_1 = arith.constant 0 : i32
    %c0_i32_2 = arith.constant 0 : i32
    return %c0_i32, %c0_i32_0, %c0_i32_1 : i32, i32, i32
  }
  func.func @transform_3(%arg0: i32) -> (i32, i32) {
    %c0_i32 = arith.constant 0 : i32
    %c0_i32_0 = arith.constant 0 : i32
    %c0_i32_1 = arith.constant 0 : i32
    return %c0_i32, %c0_i32_0 : i32, i32
  }
  func.func @transform_4(%arg0: i32) -> (i32, i32) {
    %c0_i32 = arith.constant 0 : i32
    %c0_i32_0 = arith.constant 0 : i32
    %c0_i32_1 = arith.constant 0 : i32
    return %c0_i32, %c0_i32_0 : i32, i32
  }
  func.func @transform_5(%arg0: i32) -> (i32, i32) {
    %c0_i32 = arith.constant 0 : i32
    %c0_i32_0 = arith.constant 0 : i32
    %c0_i32_1 = arith.constant 0 : i32
    return %c0_i32, %c0_i32_0 : i32, i32
  }
  func.func @transform_6(%arg0: i32) -> (i32, i32) {
    %c0_i32 = arith.constant 0 : i32
    %c0_i32_0 = arith.constant 0 : i32
    %c0_i32_1 = arith.constant 0 : i32
    return %c0_i32, %c0_i32_0 : i32, i32
  }
  func.func @transform_7(%arg0: i32) -> (i32, i32) {
    %c0_i32 = arith.constant 0 : i32
    %c0_i32_0 = arith.constant 0 : i32
    %c0_i32_1 = arith.constant 0 : i32
    return %c0_i32, %c0_i32_0 : i32, i32
  }
  func.func @transform_8(%arg0: i32) -> (i32, i32, i32) {
    %c0_i32 = arith.constant 0 : i32
    %c0_i32_0 = arith.constant 0 : i32
    %c0_i32_1 = arith.constant 0 : i32
    %c0_i32_2 = arith.constant 0 : i32
    return %c0_i32, %c0_i32_0, %c0_i32_1 : i32, i32, i32
  }
  func.func @transform_9(%arg0: i32) -> (i32, i32) {
    %c0_i32 = arith.constant 0 : i32
    %c0_i32_0 = arith.constant 0 : i32
    %c0_i32_1 = arith.constant 0 : i32
    return %c0_i32, %c0_i32_0 : i32, i32
  }
  func.func @transform_10(%arg0: i32) -> (i32, i32) {
    %c0_i32 = arith.constant 0 : i32
    %c0_i32_0 = arith.constant 0 : i32
    %c0_i32_1 = arith.constant 0 : i32
    return %c0_i32, %c0_i32_0 : i32, i32
  }
  func.func @transform_11(%arg0: i32) -> (i32, i32, i32) {
    %c0_i32 = arith.constant 0 : i32
    %c0_i32_0 = arith.constant 0 : i32
    %c0_i32_1 = arith.constant 0 : i32
    %c0_i32_2 = arith.constant 0 : i32
    return %c0_i32, %c0_i32_0, %c0_i32_1 : i32, i32, i32
  }
  func.func @transform_12(%arg0: i32) -> (i32, i32, i32) {
    %c0_i32 = arith.constant 0 : i32
    %c0_i32_0 = arith.constant 0 : i32
    %c0_i32_1 = arith.constant 0 : i32
    %c0_i32_2 = arith.constant 0 : i32
    return %c0_i32, %c0_i32_0, %c0_i32_1 : i32, i32, i32
  }
  func.func @transform_13(%arg0: i32) -> (i32, i32, i32) {
    %c0_i32 = arith.constant 0 : i32
    %c0_i32_0 = arith.constant 0 : i32
    %c0_i32_1 = arith.constant 0 : i32
    %c0_i32_2 = arith.constant 0 : i32
    return %c0_i32, %c0_i32_0, %c0_i32_1 : i32, i32, i32
  }
  func.func @transform_14(%arg0: i32) -> (i32, i32, i32) {
    %c0_i32 = arith.constant 0 : i32
    %c0_i32_0 = arith.constant 0 : i32
    %c0_i32_1 = arith.constant 0 : i32
    %c0_i32_2 = arith.constant 0 : i32
    return %c0_i32, %c0_i32_0, %c0_i32_1 : i32, i32, i32
  }
  func.func @transform_15(%arg0: i32) -> (i32, i32, i32, i32, i32) {
    %c0_i32 = arith.constant 0 : i32
    %c0_i32_0 = arith.constant 0 : i32
    %c0_i32_1 = arith.constant 0 : i32
    %c0_i32_2 = arith.constant 0 : i32
    %c0_i32_3 = arith.constant 0 : i32
    return %arg0, %c0_i32, %c0_i32_0, %c0_i32_1, %c0_i32_2 : i32, i32, i32, i32, i32
  }
}

</mosaic_0001>

<bundles_post_ra>
// kernel: afcf3_forward.2
= control target key start
LH: loop header
LB: loop body
LE: loop exit
PB: predicated region body
PF: predicated region fallthrough
CT: control target
= control target key end

     0   :  { %s860_s18 = smov 0   ;;  %s999_s0 = inlined_call_operand.vmem [shape: bf16[256,36], index: 0, kind: input, shape index: {}]   ;;  %s1000_s1 = inlined_call_operand.vmem [shape: bf16[36,4], index: 1, kind: input, shape index: {}]   ;;  %s1001_s2 = inlined_call_operand.vmem [shape: f32[1,4], index: 2, kind: input, shape index: {}]   ;;  %s1002_s3 = inlined_call_operand.vmem [shape: f32[1,4], index: 3, kind: input, shape index: {}]   ;;  %s1003_s4 = inlined_call_operand.vmem [shape: f32[256,4], index: 4, kind: input, shape index: {}]   ;;  %s1004_s5 = inlined_call_operand.vmem [shape: bf16[256,4], index: 5, kind: output, shape index: {}]  }
   0x1 LB: > { %s696_s19 = sadd.s32 4294967295, %s828_s18   ;;  %p700_p0 = scmp.ge.s32.totalorder %s828_s18, 1  ;;  %s828_s18 = sphi %s860_s18, %s15_s18  }
   0x2   : > { %p199_p1 = scmp.lt.s32.totalorder %s828_s18, 3 }
   0x4   : > { %p200_p2 = pnand %p700_p0, %p199_p1 }
   0x5   : > { %s701_s24 = sshll.u32 (!%p200_p2), %s696_s19, 4 }
   0x6   : > { %203 = sbr.rel (%p200_p2) target bundleno = 246 (0xf6), region = 40  ;;  %p233_p3 = scmp.lt.s32.totalorder (!%p200_p2), %s701_s24, 31 }
   0xb   : > { %v811_v0 = vld [vmem:[%s1000_s1 + $0x10] ss:$0 sps:$4 sm:$0x33]   ;;  %vm352_vm0 = vcmask 1041408   ;;  %v812_v1 = vld [vmem:[%s1000_s1 + $0x8] sm:$0xff]   ;;  %v813_v3 = vld [vmem:[%s1000_s1] sm:$0xff]  }
   0xc   : > { %801 = vmatprep.subr.msk.bf16.mxu0 %vm352_vm0, %v811_v0  ;;  %802 = vmatprep.subr.msk.bf16.mxu1 %vm352_vm0, %v811_v0  ;;  %v354_v2 = vsel %vm352_vm0, %v811_v0, 0  ;;  %s1006_s24 = smov (!%p233_p3, %s701_s24), 31  ;;  %vm327_vm1 = vcmask 293888   ;;  %v897_v12 = vld [vmem:[%s1001_s2] ss:$0 sm:$0xff]  ;;  %vm611_vm2 = vcmask 27648  }
   0xd   : > { %774 = vmatpush3.bf16.msra.mxu0 %v354_v2  ;;  %798 = vmatpush3.bf16.msra.mxu1 %v354_v2  ;;  %s702_s27 = sshll.u32 %s1006_s24, 2  ;;  %s704_s6 = sshll.u32 %s1006_s24, 3  ;;  %v902_v14 = vld [vmem:[%s1002_s3] ss:$0 sm:$0xff] }
   0xe   : > { %775 = vmatprep.subr.bf16.mxu0 %v812_v1  ;;  %796 = vmatprep.subr.bf16.mxu1 %v812_v1  ;;  %s236_s30 = scalar_lea.vmem %s999_s0, %s702_s27  ;;  %s907_s13 = scalar_lea.vmem %s1003_s4, %s704_s6 }
   0xf   : > { %v814_v4 = vld [vmem:[%s236_s30] sm:$0xff]   ;;  %v816_v6 = vld [vmem:[%s236_s30 + $0x8] sm:$0xff]   ;;  %v818_v8 = vld [vmem:[%s236_s30 + $0x10] sm:$0xff]   ;;  %s928_s16 = scalar_lea.vmem %s1004_s5, %s702_s27 }
  0x10   : > { %v815_v5 = vld [vmem:[%s236_s30 + $0x20] sm:$0xff]   ;;  %779 = vmatprep.mubr.msk.bf16.mxu0 %vm327_vm1, %v814_v4  ;;  %v817_v7 = vld [vmem:[%s236_s30 + $0x28] sm:$0xff]   ;;  %v819_v9 = vld [vmem:[%s236_s30 + $0x30] sm:$0xff]  }
  0x11   : > { %776 = vmatpush3.bf16.msra.mxu0 %v812_v1  ;;  %799 = vmatpush3.bf16.msra.mxu1 %v812_v1  ;;  %v820_v10 = vld [vmem:[%s236_s30 + $0x18] sm:$0xff]   ;;  %v517_v24 = vld [vmem:[%s907_s13 + $0x10] sm:$0xff]  ;;  %v515_v32 = vld [vmem:[%s907_s13] sm:$0xff] }
  0x12   : > { %777 = vmatprep.subr.bf16.mxu0 %v813_v3  ;;  %797 = vmatprep.subr.bf16.mxu1 %v813_v3  ;;  %v821_v11 = vld [vmem:[%s236_s30 + $0x38] sm:$0xff]   ;;  %v525_v25 = vld [vmem:[%s907_s13 + $0x50] sm:$0xff]  ;;  %v523_v33 = vld [vmem:[%s907_s13 + $0x40] sm:$0xff] }
  0x13   : > { %787 = vmatprep.mubr.msk.bf16.mxu1 %vm327_vm1, %v815_v5  ;;  %v518_v52 = vld [vmem:[%s907_s13 + $0x18] sm:$0xff]  ;;  %v516_v62 = vld [vmem:[%s907_s13 + $0x8] sm:$0xff] }
  0x14   : > { %v526_v53 = vld [vmem:[%s907_s13 + $0x58] sm:$0xff]  ;;  %v524_v63 = vld [vmem:[%s907_s13 + $0x48] sm:$0xff] }
  0x15   : > { %778 = vmatpush3.bf16.msra.mxu0 %v813_v3  ;;  %800 = vmatpush3.bf16.msra.mxu1 %v813_v3 }
  0x18   : > { %780 = vmatmul.mubr.msk.bf16.vlgmr.msra.gmra.mxu0 %vm327_vm1, %v816_v6  ;;  %788 = vmatmul.mubr.msk.bf16.vlgmr.msra.gmra.mxu1 %vm327_vm1, %v817_v7 }
  0x19   : > { %783 = vmatprep.mubr.msk.bf16.mxu0 %vm327_vm1, %v818_v8  ;;  %791 = vmatprep.mubr.msk.bf16.mxu1 %vm327_vm1, %v819_v9 }
  0x20   : > { %784 = vmatmul.mubr.msk.bf16.gmra.mxu0 %vm327_vm1, %v820_v10  ;;  %792 = vmatmul.mubr.msk.bf16.gmra.mxu1 %vm327_vm1, %v821_v11 }
  0xd8   : > { %v781_v13 = vpop.f32.mrf.mxu0  ;;  %v789_v15 = vpop.f32.mrf.mxu1 }
  0xd9   : > { %v462_v16 = vmul.f32 %v781_v13, %v897_v12  ;;  %v470_v17 = vmul.f32 %v789_v15, %v897_v12 }
  0xda   : > { %v390_v18 = vpop.f32.mrf.mxu0  ;;  %v422_v19 = vpop.f32.mrf.mxu1 }
  0xdb   : > { %v485_v20 = vadd.f32 %v902_v14, %v462_v16  ;;  %v493_v21 = vadd.f32 %v902_v14, %v470_v17  ;;  %v460_v22 = vmul.f32 %v897_v12, %v390_v18  ;;  %v468_v23 = vmul.f32 %v897_v12, %v422_v19  ;;  %v521_v18 = vld [vmem:[%s907_s13 + $0x30] sm:$0xff] }
  0xdc   : > { %v782_v26 = vpop.f32.mrf.mxu0  ;;  %v790_v27 = vpop.f32.mrf.mxu1  ;;  %v529_v19 = vld [vmem:[%s907_s13 + $0x70] sm:$0xff] }
  0xdd   : > { %v501_v28 = vmax.f32 %v485_v20, 0.0  ;;  %v509_v29 = vmax.f32 %v493_v21, 0.0  ;;  %v483_v30 = vadd.f32 %v902_v14, %v460_v22  ;;  %v491_v31 = vadd.f32 %v902_v14, %v468_v23 }
  0xde   : > { %v463_v34 = vmul.f32 %v782_v26, %v897_v12  ;;  %v471_v35 = vmul.f32 %v790_v27, %v897_v12  ;;  %v393_v36 = vpop.f32.mrf.mxu0  ;;  %v425_v37 = vpop.f32.mrf.mxu1 }
  0xdf   : > { %v533_v38 = vadd.f32 %v517_v24, %v501_v28  ;;  %v541_v39 = vadd.f32 %v525_v25, %v509_v29  ;;  %v499_v40 = vmax.f32 %v483_v30, 0.0  ;;  %v507_v41 = vmax.f32 %v491_v31, 0.0  ;;  %v519_v28 = vld [vmem:[%s907_s13 + $0x20] sm:$0xff] }
  0xe0   : > { %v486_v42 = vadd.f32 %v902_v14, %v463_v34  ;;  %v494_v43 = vadd.f32 %v902_v14, %v471_v35  ;;  %v461_v44 = vmul.f32 %v897_v12, %v393_v36  ;;  %v469_v45 = vmul.f32 %v897_v12, %v425_v37  ;;  %v785_v46 = vpop.f32.mrf.mxu0  ;;  %v793_v47 = vpop.f32.mrf.mxu1  ;;  %v527_v29 = vld [vmem:[%s907_s13 + $0x60] sm:$0xff] }
  0xe1   : > { %v748_v48 = vpack.c.bf16 %v533_v38, %v533_v38  ;;  %v756_v49 = vpack.c.bf16 %v541_v39, %v541_v39  ;;  %v531_v50 = vadd.f32 %v515_v32, %v499_v40  ;;  %v539_v51 = vadd.f32 %v523_v33, %v507_v41 }
  0xe2   : > { %v502_v54 = vmax.f32 %v486_v42, 0.0  ;;  %v510_v55 = vmax.f32 %v494_v43, 0.0  ;;  %v484_v56 = vadd.f32 %v902_v14, %v461_v44  ;;  %v492_v57 = vadd.f32 %v902_v14, %v469_v45  ;;  %v406_v58 = vpop.f32.mrf.mxu0  ;;  %v438_v59 = vpop.f32.mrf.mxu1  ;;  %v522_v44 = vld [vmem:[%s907_s13 + $0x38] sm:$0xff] }
  0xe3   : > { %614 = vst.msk [vmem:[%s928_s16 + $0x8] sm:$0xf] %vm611_vm2, %v748_v48  ;;  %622 = vst.msk [vmem:[%s928_s16 + $0x28] sm:$0xf] %vm611_vm2, %v756_v49  ;;  %v746_v60 = vpack.c.bf16 %v531_v50, %v531_v50  ;;  %v754_v61 = vpack.c.bf16 %v539_v51, %v539_v51  ;;  %v466_v0 = vmul.f32 %v785_v46, %v897_v12  ;;  %v530_v45 = vld [vmem:[%s907_s13 + $0x78] sm:$0xff]  ;;  %v520_v51 = vld [vmem:[%s907_s13 + $0x28] sm:$0xff] }
  0xe4   : > { %v474_v1 = vmul.f32 %v793_v47, %v897_v12  ;;  %v534_v2 = vadd.f32 %v518_v52, %v502_v54  ;;  %v542_v3 = vadd.f32 %v526_v53, %v510_v55  ;;  %v500_v4 = vmax.f32 %v484_v56, 0.0  ;;  %v786_v6 = vpop.f32.mrf.mxu0  ;;  %v794_v7 = vpop.f32.mrf.mxu1  ;;  %v528_v52 = vld [vmem:[%s907_s13 + $0x68] sm:$0xff] }
  0xe5   : > { %v508_v5 = vmax.f32 %v492_v57, 0.0  ;;  %612 = vst.msk [vmem:[%s928_s16] sm:$0xf] %vm611_vm2, %v746_v60  ;;  %620 = vst.msk [vmem:[%s928_s16 + $0x20] sm:$0xf] %vm611_vm2, %v754_v61  ;;  %v489_v8 = vadd.f32 %v902_v14, %v466_v0  ;;  %v464_v10 = vmul.f32 %v897_v12, %v406_v58  ;;  %v472_v11 = vmul.f32 %v897_v12, %v438_v59 }
  0xe6   : > { %v497_v9 = vadd.f32 %v902_v14, %v474_v1  ;;  %v749_v13 = vpack.c.bf16 %v534_v2, %v534_v2  ;;  %v757_v15 = vpack.c.bf16 %v542_v3, %v542_v3  ;;  %v532_v16 = vadd.f32 %v516_v62, %v500_v4  ;;  %v409_v24 = vpop.f32.mrf.mxu0  ;;  %v441_v25 = vpop.f32.mrf.mxu1 }
  0xe7   : > { %v540_v17 = vadd.f32 %v524_v63, %v508_v5  ;;  %v505_v20 = vmax.f32 %v489_v8, 0.0  ;;  %v487_v22 = vadd.f32 %v902_v14, %v464_v10  ;;  %v495_v23 = vadd.f32 %v902_v14, %v472_v11 }
  0xe8   : > { %v513_v21 = vmax.f32 %v497_v9, 0.0  ;;  %615 = vst.msk [vmem:[%s928_s16 + $0xc] sm:$0xf] %vm611_vm2, %v749_v13  ;;  %623 = vst.msk [vmem:[%s928_s16 + $0x2c] sm:$0xf] %vm611_vm2, %v757_v15  ;;  %v747_v26 = vpack.c.bf16 %v532_v16, %v532_v16  ;;  %v467_v30 = vmul.f32 %v786_v6, %v897_v12  ;;  %v475_v31 = vmul.f32 %v794_v7, %v897_v12 }
  0xe9   : > { %v755_v27 = vpack.c.bf16 %v540_v17, %v540_v17  ;;  %v537_v32 = vadd.f32 %v521_v18, %v505_v20  ;;  %v503_v34 = vmax.f32 %v487_v22, 0.0  ;;  %v511_v35 = vmax.f32 %v495_v23, 0.0 }
  0xea   : > { %v545_v33 = vadd.f32 %v529_v19, %v513_v21  ;;  %613 = vst.msk [vmem:[%s928_s16 + $0x4] sm:$0xf] %vm611_vm2, %v747_v26  ;;  %v490_v36 = vadd.f32 %v902_v14, %v467_v30  ;;  %v498_v37 = vadd.f32 %v902_v14, %v475_v31  ;;  %v465_v38 = vmul.f32 %v897_v12, %v409_v24 }
  0xeb   : > { %621 = vst.msk [vmem:[%s928_s16 + $0x24] sm:$0xf] %vm611_vm2, %v755_v27  ;;  %v473_v39 = vmul.f32 %v897_v12, %v441_v25  ;;  %v752_v40 = vpack.c.bf16 %v537_v32, %v537_v32  ;;  %v535_v42 = vadd.f32 %v519_v28, %v503_v34  ;;  %v543_v43 = vadd.f32 %v527_v29, %v511_v35 }
  0xec   : > { %v760_v41 = vpack.c.bf16 %v545_v33, %v545_v33  ;;  %v506_v46 = vmax.f32 %v490_v36, 0.0  ;;  %v514_v47 = vmax.f32 %v498_v37, 0.0  ;;  %v488_v48 = vadd.f32 %v902_v14, %v465_v38 }
  0xed   : > { %v496_v49 = vadd.f32 %v902_v14, %v473_v39  ;;  %618 = vst.msk [vmem:[%s928_s16 + $0x18] sm:$0xf] %vm611_vm2, %v752_v40  ;;  %v750_v12 = vpack.c.bf16 %v535_v42, %v535_v42  ;;  %v758_v50 = vpack.c.bf16 %v543_v43, %v543_v43 }
  0xee   : > { %626 = vst.msk [vmem:[%s928_s16 + $0x38] sm:$0xf] %vm611_vm2, %v760_v41  ;;  %v538_v53 = vadd.f32 %v522_v44, %v506_v46  ;;  %v546_v54 = vadd.f32 %v530_v45, %v514_v47  ;;  %v504_v55 = vmax.f32 %v488_v48, 0.0 }
  0xef   : > { %v512_v56 = vmax.f32 %v496_v49, 0.0  ;;  %616 = vst.msk [vmem:[%s928_s16 + $0x10] sm:$0xf] %vm611_vm2, %v750_v12  ;;  %624 = vst.msk [vmem:[%s928_s16 + $0x30] sm:$0xf] %vm611_vm2, %v758_v50 }
  0xf0   : > { %v753_v14 = vpack.c.bf16 %v538_v53, %v538_v53  ;;  %v761_v57 = vpack.c.bf16 %v546_v54, %v546_v54  ;;  %v536_v58 = vadd.f32 %v520_v51, %v504_v55 }
  0xf1   : > { %v544_v59 = vadd.f32 %v528_v52, %v512_v56 }
  0xf2   : > { %619 = vst.msk [vmem:[%s928_s16 + $0x1c] sm:$0xf] %vm611_vm2, %v753_v14  ;;  %627 = vst.msk [vmem:[%s928_s16 + $0x3c] sm:$0xf] %vm611_vm2, %v761_v57  ;;  %v751_v60 = vpack.c.bf16 %v536_v58, %v536_v58 }
  0xf3   : > { %v759_v61 = vpack.c.bf16 %v544_v59, %v544_v59 }
  0xf4   : > { %617 = vst.msk [vmem:[%s928_s16 + $0x14] sm:$0xf] %vm611_vm2, %v751_v60 }
  0xf5   : > { %625 = vst.msk [vmem:[%s928_s16 + $0x34] sm:$0xf] %vm611_vm2, %v759_v61 }
  0xf6 PF: > { %s15_s18 = sadd.s32 1, %s828_s18  }
  0xf7   : > { %p12_p4 = scmp.ge.s32.totalorder %s15_s18, 4  }
  0xf9   :  { %14 = sbr.rel (!%p12_p4) target bundleno = 1 (0x1), region = 73 }

// kernel: afcf3_forward.3
= control target key start
LH: loop header
LB: loop body
LE: loop exit
PB: predicated region body
PF: predicated region fallthrough
CT: control target
= control target key end

     0   :  { %s7665_s18 = smov 0   ;;  %s10053_s0 = inlined_call_operand.vmem [shape: bf16[2,2,8,8,4], index: 0, kind: input, shape index: {}]   ;;  %s10054_s1 = inlined_call_operand.vmem [shape: f32[2,2,8,8,4], index: 1, kind: input, shape index: {}]   ;;  %s10055_s2 = inlined_call_operand.vmem [shape: bf16[27,4,4], index: 2, kind: input, shape index: {}]   ;;  %s10056_s3 = inlined_call_operand.vmem [shape: f32[1,4], index: 3, kind: input, shape index: {}]   ;;  %s10057_s4 = inlined_call_operand.vmem [shape: f32[1,4], index: 4, kind: input, shape index: {}]   ;;  %s10058_s5 = inlined_call_operand.vmem [shape: bf16[4,4], index: 5, kind: input, shape index: {}]   ;;  %s10059_s6 = inlined_call_operand.vmem [shape: f32[1,4], index: 6, kind: input, shape index: {}]   ;;  %s10060_s7 = inlined_call_operand.vmem [shape: f32[1,4], index: 7, kind: input, shape index: {}]   ;;  %s10061_s8 = inlined_call_operand.vmem [shape: bf16[2,4,8], index: 8, kind: input, shape index: {}]   ;;  %s10062_s9 = inlined_call_operand.vmem [shape: f32[1,8], index: 9, kind: input, shape index: {}]   ;;  %s10063_s10 = inlined_call_operand.vmem [shape: f32[1,8], index: 10, kind: input, shape index: {}]   ;;  %s10064_s11 = inlined_call_operand.vmem [shape: bf16[2,8,4], index: 11, kind: input, shape index: {}]   ;;  %s10065_s12 = inlined_call_operand.vmem [shape: f32[2,1,4], index: 12, kind: input, shape index: {}]   ;;  %s10066_s13 = inlined_call_operand.vmem [shape: bf16[2,8,4], index: 13, kind: input, shape index: {}]   ;;  %s10067_s14 = inlined_call_operand.vmem [shape: f32[2,1,4], index: 14, kind: input, shape index: {}]   ;;  %s10068_s15 = inlined_call_operand.vmem [shape: f32[2,2,8,8,4], index: 15, kind: output, shape index: {}]  }
   0x1 LB: > { %s6351_s19 = sadd.s32 4294967295, %s7580_s18   ;;  %p6355_p0 = scmp.ge.s32.totalorder %s7580_s18, 1  ;;  %s7580_s18 = sphi %s7665_s18, %s25_s18  }
   0x2   : > { %p447_p1 = scmp.lt.s32.totalorder %s7580_s18, 3 }
   0x4   : > { %p448_p2 = pnand %p6355_p0, %p447_p1 }
   0x6   : > { %451 = sbr.rel (%p448_p2) target bundleno = 1410 (0x582), region = 80 }
   0xb   : > { %v6362_v0 = vld [vmem:[%s10055_s2 + $0x2] sm:$0x3]  ;;  %vm722_vm0 = vcmask 1041408   ;;  %v671_v1 = vld [vmem:[%s10055_s2] sm:$0x3]  ;;  %vm516_vm1 = vcmask 31744  }
   0xc   : > { %7519 = vmatprep.subr.msk.bf16.mxu0 %vm722_vm0, %v6362_v0  ;;  %v724_v2 = vsel %vm722_vm0, %v6362_v0, 0  ;;  %7520 = vmatprep.subr.msk.bf16.mxu1 %vm722_vm0, %v671_v1  ;;  %v848_v3 = vsel %vm722_vm0, %v671_v1, 0  ;;  %vm518_vm2 = vcmask 25600   ;;  %v7686_v4 = vld [vmem:[%s10055_s2 + $0x4] sm:$0x3]  ;;  %v10069_v5 = vmov 0.0  }
   0xd   : > { %6968 = vmatpush3.bf16.msra.mxu0 %v724_v2  ;;  %6986 = vmatpush3.bf16.msra.mxu1 %v848_v3  ;;  %517 = vst.msk [vmem:[#allocation2] sm:$0xff] %vm516_vm1, %v10069_v5  ;;  %520 = vst.msk [vmem:[#allocation2 + $0x10] sm:$0xff] %vm516_vm1, %v10069_v5  ;;  %p500_p3 = scmp.lt.s32.totalorder %s6351_s19, 1  ;;  %v6388_v6 = vld [vmem:[%s10055_s2 + $0x6] sm:$0x3]  ;;  %v998_v21 = vsel %vm722_vm0, %v7686_v4, 0 }
   0xe   : > { %519 = vst.msk [vmem:[#allocation2 + $0x8] sm:$0x3] %vm518_vm2, %v10069_v5  ;;  %521 = vst.msk [vmem:[#allocation2 + $0x18] sm:$0x3] %vm518_vm2, %v10069_v5  ;;  %7521 = vmatprep.subr.msk.bf16.mxu0 %vm722_vm0, %v7686_v4  ;;  %7522 = vmatprep.subr.msk.bf16.mxu1 %vm722_vm0, %v6388_v6  ;;  %v1165_v30 = vsel %vm722_vm0, %v6388_v6, 0  ;;  %vm7583_vm3 = vmmov 0  }
   0xf   : > { %522 = vst.msk [vmem:[#allocation2 + $0x20] sm:$0xff] %vm516_vm1, %v10069_v5  ;;  %524 = vst.msk [vmem:[#allocation2 + $0x30] sm:$0xff] %vm516_vm1, %v10069_v5  ;;  %s10164_s19 = smov (!%p500_p3, %s6351_s19), 1  ;;  %v7919_v31 = vld [vmem:[%s10055_s2 + $0x8] sm:$0x3]  ;;  %vm5542_vm4 = vcmask 1041409  }
  0x10   : > { %523 = vst.msk [vmem:[#allocation2 + $0x28] sm:$0x3] %vm518_vm2, %v10069_v5  ;;  %525 = vst.msk [vmem:[#allocation2 + $0x38] sm:$0x3] %vm518_vm2, %v10069_v5  ;;  %s6657_s28 = sshll.u32 %s10164_s19, 6  ;;  %vm5544_vm5 = vcmask 1042434  }
  0x11   : > { %526 = vst.msk [vmem:[#allocation2 + $0x40] sm:$0xff] %vm516_vm1, %v10069_v5  ;;  %528 = vst.msk [vmem:[#allocation2 + $0x50] sm:$0xff] %vm516_vm1, %v10069_v5  ;;  %s7864_s16 = scalar_lea.vmem %s10053_s0, %s6657_s28  ;;  %v7930_v34 = vld [vmem:[%s10055_s2 + $0xa] sm:$0x3]  ;;  %vm5546_vm6 = vcmask 1043459   ;;  %vm5548_vm7 = vcmask 1044484  }
  0x12   : > { %527 = vst.msk [vmem:[#allocation2 + $0x48] sm:$0x3] %vm518_vm2, %v10069_v5  ;;  %529 = vst.msk [vmem:[#allocation2 + $0x58] sm:$0x3] %vm518_vm2, %v10069_v5  ;;  %v6661_v7 = vld [vmem:[%s7864_s16] sm:$0xff]   ;;  %v6692_v44 = vld [vmem:[%s7864_s16 + $0x8] sm:$0xff]  }
  0x13   : > { %530 = vst.msk [vmem:[#allocation2 + $0x60] sm:$0xff] %vm516_vm1, %v10069_v5  ;;  %532 = vst.msk [vmem:[#allocation2 + $0x70] sm:$0xff] %vm516_vm1, %v10069_v5  ;;  %v6662_v11 = vunpack.c.l.bf16 %v6661_v7  ;;  %v6663_v12 = vunpack.c.h.bf16 %v6661_v7  ;;  %v6666_v46 = vunpack.c.l.bf16 %v6692_v44  ;;  %v6667_v47 = vunpack.c.h.bf16 %v6692_v44  ;;  %v6693_v48 = vld [vmem:[%s7864_s16 + $0x10] sm:$0xff]   ;;  %v6694_v49 = vld [vmem:[%s7864_s16 + $0x18] sm:$0xff]   ;;  %s6658_s21 = sshll.u32 %s10164_s19, 7 }
  0x14   : > { %531 = vst.msk [vmem:[#allocation2 + $0x68] sm:$0x3] %vm518_vm2, %v10069_v5  ;;  %533 = vst.msk [vmem:[#allocation2 + $0x78] sm:$0x3] %vm518_vm2, %v10069_v5  ;;  %v647_v10 = vld [vmem:[#allocation2] sm:$0xff]  ;;  %v7870_v14 = vld [vmem:[#allocation2 + $0x10] sm:$0xff]  ;;  %v6670_v50 = vunpack.c.l.bf16 %v6693_v48  ;;  %v6671_v51 = vunpack.c.h.bf16 %v6693_v48  ;;  %v6674_v52 = vunpack.c.l.bf16 %v6694_v49  ;;  %v6675_v53 = vunpack.c.h.bf16 %v6694_v49  ;;  %s9938_s24 = scalar_lea.vmem %s10054_s1, %s6658_s21  ;;  %s9962_s27 = scalar_lea.vmem %s10068_s15, %s6658_s21 }
  0x15   : > { %534 = vst.msk [vmem:[#allocation2 + $0x80] sm:$0xff] %vm516_vm1, %v10069_v5  ;;  %536 = vst.msk [vmem:[#allocation2 + $0x90] sm:$0xff] %vm516_vm1, %v10069_v5  ;;  %v672_v8 = vld [vmem:[#allocation2 + $0x1] sm:$0xff]  ;;  %v7867_v9 = vld [vmem:[#allocation2 + $0x11] sm:$0xff]  ;;  %v663_v17 = vpack.c.bf16 %v7870_v14, %v647_v10  ;;  %vm5550_vm8 = vcmask 1045509   ;;  %vm5552_vm9 = vcmask 1046534  }
  0x16   : > { %535 = vst.msk [vmem:[#allocation2 + $0x88] sm:$0x3] %vm518_vm2, %v10069_v5  ;;  %537 = vst.msk [vmem:[#allocation2 + $0x98] sm:$0x3] %vm518_vm2, %v10069_v5  ;;  %v688_v13 = vpack.c.bf16 %v7867_v9, %v672_v8  ;;  %v7881_v19 = vld [vmem:[#allocation2 + $0x20] sm:$0xff]  ;;  %v7883_v20 = vld [vmem:[#allocation2 + $0x30] sm:$0xff] }
  0x17   : > { %538 = vst.msk [vmem:[#allocation2 + $0xa0] sm:$0xff] %vm516_vm1, %v10069_v5  ;;  %540 = vst.msk [vmem:[#allocation2 + $0xb0] sm:$0xff] %vm516_vm1, %v10069_v5  ;;  %v7872_v15 = vld [vmem:[#allocation2 + $0x21] sm:$0xff]  ;;  %v7874_v16 = vld [vmem:[#allocation2 + $0x31] sm:$0xff]  ;;  %v7894_v23 = vpack.c.bf16 %v7883_v20, %v7881_v19  ;;  %6987 = vmatprep.mubr.msk.bf16.mxu1 %vm516_vm1, %v663_v17  ;;  %vm5554_vm10 = vcmask 1047559   ;;  %vm5793_vm11 = vcmask 1043456  }
  0x18   : > { %539 = vst.msk [vmem:[#allocation2 + $0xa8] sm:$0x3] %vm518_vm2, %v10069_v5  ;;  %541 = vst.msk [vmem:[#allocation2 + $0xb8] sm:$0x3] %vm518_vm2, %v10069_v5  ;;  %v7879_v18 = vpack.c.bf16 %v7874_v16, %v7872_v15  ;;  %6969 = vmatprep.mubr.msk.bf16.mxu0 %vm516_vm1, %v688_v13  ;;  %v7898_v25 = vld [vmem:[#allocation2 + $0x40] sm:$0xff]  ;;  %v7900_v26 = vld [vmem:[#allocation2 + $0x50] sm:$0xff] }
  0x19   : > { %542 = vst.msk [vmem:[#allocation2 + $0xc0] sm:$0xff] %vm516_vm1, %v10069_v5  ;;  %544 = vst.msk [vmem:[#allocation2 + $0xd0] sm:$0xff] %vm516_vm1, %v10069_v5  ;;  %v7887_v22 = vld [vmem:[#allocation2 + $0x41] sm:$0xff]  ;;  %v7896_v24 = vld [vmem:[#allocation2 + $0x51] sm:$0xff]  ;;  %v7913_v29 = vpack.c.bf16 %v7900_v26, %v7898_v25  ;;  %6988 = vmatmul.mubr.msk.bf16.vlgmr.msra.gmra.mxu1 %vm516_vm1, %v7894_v23  ;;  %vm5789_vm12 = vcmask 64512  }
  0x1a   : > { %543 = vst.msk [vmem:[#allocation2 + $0xc8] sm:$0x3] %vm518_vm2, %v10069_v5  ;;  %545 = vst.msk [vmem:[#allocation2 + $0xd8] sm:$0x3] %vm518_vm2, %v10069_v5  ;;  %v1297_v27 = vpack.c.bf16 %v7887_v22, %v7874_v16  ;;  %6970 = vmatmul.mubr.msk.bf16.vlgmr.msra.gmra.mxu0 %vm516_vm1, %v7879_v18  ;;  %v7909_v28 = vpack.c.bf16 %v7896_v24, %v7887_v22  ;;  %v7936_v35 = vld [vmem:[#allocation2 + $0x60] sm:$0xff]  ;;  %v7938_v36 = vld [vmem:[#allocation2 + $0x70] sm:$0xff]  ;;  %7022 = vmatpush3.bf16.msra.mxu1 %v1165_v30 }
  0x1b   : > { %546 = vst.msk [vmem:[#allocation2 + $0xe0] sm:$0xff] %vm516_vm1, %v10069_v5  ;;  %548 = vst.msk [vmem:[#allocation2 + $0xf0] sm:$0xff] %vm516_vm1, %v10069_v5  ;;  %7004 = vmatpush3.bf16.msra.mxu0 %v998_v21  ;;  %v7923_v32 = vld [vmem:[#allocation2 + $0x61] sm:$0xff]  ;;  %v7925_v33 = vld [vmem:[#allocation2 + $0x71] sm:$0xff]  ;;  %6991 = vmatprep.mubr.msk.bf16.mxu1 %vm516_vm1, %v7913_v29  ;;  %v7950_v39 = vpack.c.bf16 %v7938_v36, %v7936_v35 }
  0x1c   : > { %547 = vst.msk [vmem:[#allocation2 + $0xe8] sm:$0x3] %vm518_vm2, %v10069_v5  ;;  %549 = vst.msk [vmem:[#allocation2 + $0xf8] sm:$0x3] %vm518_vm2, %v10069_v5  ;;  %6973 = vmatprep.mubr.msk.bf16.mxu0 %vm516_vm1, %v7909_v28  ;;  %7523 = vmatprep.subr.msk.bf16.mxu0 %vm722_vm0, %v7919_v31  ;;  %v7944_v38 = vpack.c.bf16 %v7925_v33, %v7923_v32  ;;  %v6695_v56 = vld [vmem:[%s7864_s16 + $0x20] sm:$0xff]   ;;  %v6696_v57 = vld [vmem:[%s7864_s16 + $0x28] sm:$0xff]  }
  0x1d   : > { %550 = vst.msk [vmem:[#allocation2 + $0x100] sm:$0xff] %vm516_vm1, %v10069_v5  ;;  %552 = vst.msk [vmem:[#allocation2 + $0x110] sm:$0xff] %vm516_vm1, %v10069_v5  ;;  %7524 = vmatprep.subr.msk.bf16.mxu1 %vm722_vm0, %v7930_v34  ;;  %v6697_v58 = vld [vmem:[%s7864_s16 + $0x30] sm:$0xff]   ;;  %v6678_v62 = vunpack.c.l.bf16 %v6695_v56  ;;  %v6679_v63 = vunpack.c.h.bf16 %v6695_v56  ;;  %v6682_v0 = vunpack.c.l.bf16 %v6696_v57  ;;  %v6683_v1 = vunpack.c.h.bf16 %v6696_v57  ;;  %v8037_v44 = vld [vmem:[%s7864_s16 + $0x38] sm:$0xff]  }
  0x1e   : > { %551 = vst.msk [vmem:[#allocation2 + $0x108] sm:$0x3] %vm518_vm2, %v10069_v5  ;;  %553 = vst.msk [vmem:[#allocation2 + $0x118] sm:$0x3] %vm518_vm2, %v10069_v5  ;;  %v655_v42 = vld [vmem:[#allocation2 + $0xa0] sm:$0xff]  ;;  %v6686_v8 = vunpack.c.l.bf16 %v6697_v58  ;;  %v6690_v48 = vunpack.c.l.bf16 %v8037_v44  ;;  %v8059_v56 = vld [vmem:[#allocation2 + $0x52] sm:$0xff] }
  0x1f   : > { %554 = vst.msk [vmem:[#allocation2 + $0x120] sm:$0xff] %vm516_vm1, %v10069_v5  ;;  %556 = vst.msk [vmem:[#allocation2 + $0x130] sm:$0xff] %vm516_vm1, %v10069_v5  ;;  %v680_v37 = vld [vmem:[#allocation2 + $0xa1] sm:$0xff] }
  0x20   : > { %555 = vst.msk [vmem:[#allocation2 + $0x128] sm:$0x3] %vm518_vm2, %v10069_v5  ;;  %557 = vst.msk [vmem:[#allocation2 + $0x138] sm:$0x3] %vm518_vm2, %v10069_v5 }
  0x21   : > { %558 = vst.msk [vmem:[#allocation2 + $0x140] sm:$0xff] %vm516_vm1, %v10069_v5  ;;  %560 = vst.msk [vmem:[#allocation2 + $0x150] sm:$0xff] %vm516_vm1, %v10069_v5  ;;  %6992 = vmatmul.mubr.msk.bf16.gmra.mxu1 %vm516_vm1, %v7950_v39 }
  0x22   : > { %559 = vst.msk [vmem:[#allocation2 + $0x148] sm:$0x3] %vm518_vm2, %v10069_v5  ;;  %561 = vst.msk [vmem:[#allocation2 + $0x158] sm:$0x3] %vm518_vm2, %v10069_v5  ;;  %6974 = vmatmul.mubr.msk.bf16.gmra.mxu0 %vm516_vm1, %v7944_v38 }
  0x23   : > { %562 = vst.msk [vmem:[#allocation2 + $0x160] sm:$0xff] %vm516_vm1, %v10069_v5  ;;  %564 = vst.msk [vmem:[#allocation2 + $0x170] sm:$0xff] %vm516_vm1, %v10069_v5 }
  0x24   : > { %563 = vst.msk [vmem:[#allocation2 + $0x168] sm:$0x3] %vm518_vm2, %v10069_v5  ;;  %565 = vst.msk [vmem:[#allocation2 + $0x178] sm:$0x3] %vm518_vm2, %v10069_v5 }
  0x25   : > { %566 = vst.msk [vmem:[#allocation2 + $0x180] sm:$0xff] %vm516_vm1, %v10069_v5  ;;  %568 = vst.msk [vmem:[#allocation2 + $0x190] sm:$0xff] %vm516_vm1, %v10069_v5 }
  0x26   : > { %567 = vst.msk [vmem:[#allocation2 + $0x188] sm:$0x3] %vm518_vm2, %v10069_v5  ;;  %569 = vst.msk [vmem:[#allocation2 + $0x198] sm:$0x3] %vm518_vm2, %v10069_v5 }
  0x27   : > { %570 = vst.msk [vmem:[#allocation2 + $0x1a0] sm:$0xff] %vm516_vm1, %v10069_v5  ;;  %572 = vst.msk [vmem:[#allocation2 + $0x1b0] sm:$0xff] %vm516_vm1, %v10069_v5 }
  0x28   : > { %571 = vst.msk [vmem:[#allocation2 + $0x1a8] sm:$0x3] %vm518_vm2, %v10069_v5  ;;  %573 = vst.msk [vmem:[#allocation2 + $0x1b8] sm:$0x3] %vm518_vm2, %v10069_v5 }
  0x29   : > { %574 = vst.msk [vmem:[#allocation2 + $0x1c0] sm:$0xff] %vm516_vm1, %v10069_v5  ;;  %576 = vst.msk [vmem:[#allocation2 + $0x1d0] sm:$0xff] %vm516_vm1, %v10069_v5 }
  0x2a   : > { %575 = vst.msk [vmem:[#allocation2 + $0x1c8] sm:$0x3] %vm518_vm2, %v10069_v5  ;;  %577 = vst.msk [vmem:[#allocation2 + $0x1d8] sm:$0x3] %vm518_vm2, %v10069_v5 }
  0x2b   : > { %578 = vst.msk [vmem:[#allocation2 + $0x1e0] sm:$0xff] %vm516_vm1, %v10069_v5  ;;  %580 = vst.msk [vmem:[#allocation2 + $0x1f0] sm:$0xff] %vm516_vm1, %v10069_v5 }
  0x2c   : > { %579 = vst.msk [vmem:[#allocation2 + $0x1e8] sm:$0x3] %vm518_vm2, %v10069_v5  ;;  %581 = vst.msk [vmem:[#allocation2 + $0x1f8] sm:$0x3] %vm518_vm2, %v10069_v5 }
  0x2d   : > { %582 = vst.msk [vmem:[#allocation2 + $0x200] sm:$0xff] %vm516_vm1, %v10069_v5  ;;  %584 = vst.msk [vmem:[#allocation2 + $0x210] sm:$0xff] %vm516_vm1, %v10069_v5 }
  0x2e   : > { %583 = vst.msk [vmem:[#allocation2 + $0x208] sm:$0x3] %vm518_vm2, %v10069_v5  ;;  %585 = vst.msk [vmem:[#allocation2 + $0x218] sm:$0x3] %vm518_vm2, %v10069_v5 }
  0x2f   : > { %586 = vst.msk [vmem:[#allocation2 + $0x220] sm:$0xff] %vm516_vm1, %v10069_v5  ;;  %588 = vst.msk [vmem:[#allocation2 + $0x230] sm:$0xff] %vm516_vm1, %v10069_v5 }
  0x30   : > { %587 = vst.msk [vmem:[#allocation2 + $0x228] sm:$0x3] %vm518_vm2, %v10069_v5  ;;  %589 = vst.msk [vmem:[#allocation2 + $0x238] sm:$0x3] %vm518_vm2, %v10069_v5 }
  0x31   : > { %590 = vst.msk [vmem:[#allocation2 + $0x240] sm:$0xff] %vm516_vm1, %v10069_v5  ;;  %592 = vst.msk [vmem:[#allocation2 + $0x250] sm:$0xff] %vm516_vm1, %v10069_v5 }
  0x32   : > { %591 = vst.msk [vmem:[#allocation2 + $0x248] sm:$0x3] %vm518_vm2, %v10069_v5  ;;  %593 = vst.msk [vmem:[#allocation2 + $0x258] sm:$0x3] %vm518_vm2, %v10069_v5 }
  0x33   : > { %594 = vst.msk [vmem:[#allocation2 + $0x260] sm:$0xff] %vm516_vm1, %v10069_v5  ;;  %596 = vst.msk [vmem:[#allocation2 + $0x270] sm:$0xff] %vm516_vm1, %v10069_v5 }
  0x34   : > { %595 = vst.msk [vmem:[#allocation2 + $0x268] sm:$0x3] %vm518_vm2, %v10069_v5  ;;  %597 = vst.msk [vmem:[#allocation2 + $0x278] sm:$0x3] %vm518_vm2, %v10069_v5 }
  0x35   : > { %631 = vst.msk [vmem:[#allocation2 + $0xb1] sm:$0xff] %vm516_vm1, %v6662_v11  ;;  %632 = vst.msk [vmem:[#allocation2 + $0xc1] sm:$0xff] %vm516_vm1, %v6663_v12  ;;  %v6687_v12 = vunpack.c.h.bf16 %v6697_v58  ;;  %v1331_v58 = vsel %vm722_vm0, %v7919_v31, 0  ;;  %v954_v31 = vld [vmem:[#allocation2 + $0x72] sm:$0xff] }
  0x36   : > { %633 = vst.msk [vmem:[#allocation2 + $0xd1] sm:$0xff] %vm516_vm1, %v6666_v46  ;;  %634 = vst.msk [vmem:[#allocation2 + $0xe1] sm:$0xff] %vm516_vm1, %v6667_v47 }
  0x37   : > { %635 = vst.msk [vmem:[#allocation2 + $0xf1] sm:$0xff] %vm516_vm1, %v6670_v50  ;;  %636 = vst.msk [vmem:[#allocation2 + $0x101] sm:$0xff] %vm516_vm1, %v6671_v51  ;;  %v1130_v50 = vpack.c.bf16 %v7881_v19, %v7870_v14  ;;  %v949_v51 = vld [vmem:[#allocation2 + $0x22] sm:$0xff]  ;;  %v1131_v19 = vpack.c.bf16 %v7898_v25, %v7883_v20  ;;  %v6415_v20 = vld [vmem:[%s10055_s2 + $0xc] sm:$0x3] }
  0x38   : > { %637 = vst.msk [vmem:[#allocation2 + $0x111] sm:$0xff] %vm516_vm1, %v6674_v52  ;;  %638 = vst.msk [vmem:[#allocation2 + $0x121] sm:$0xff] %vm516_vm1, %v6675_v53  ;;  %v8056_v52 = vld [vmem:[#allocation2 + $0x32] sm:$0xff]  ;;  %v951_v53 = vld [vmem:[#allocation2 + $0x42] sm:$0xff]  ;;  %v1664_v5 = vsel %vm722_vm0, %v6415_v20, 0 }
  0x39   : > { %639 = vst.msk [vmem:[#allocation2 + $0x151] sm:$0xff] %vm516_vm1, %v6678_v62  ;;  %640 = vst.msk [vmem:[#allocation2 + $0x161] sm:$0xff] %vm516_vm1, %v6679_v63  ;;  %v8062_v14 = vpack.c.bf16 %v8056_v52, %v949_v51  ;;  %v8067_v57 = vpack.c.bf16 %v8059_v56, %v951_v53  ;;  %v1132_v62 = vpack.c.bf16 %v7936_v35, %v7900_v26  ;;  %v1497_v63 = vsel %vm722_vm0, %v7930_v34, 0  ;;  %v6424_v25 = vld [vmem:[%s10055_s2 + $0xe] sm:$0x3]  ;;  %v953_v26 = vld [vmem:[#allocation2 + $0x62] sm:$0xff] }
  0x3a   : > { %641 = vst.msk [vmem:[#allocation2 + $0x171] sm:$0xff] %vm516_vm1, %v6682_v0  ;;  %642 = vst.msk [vmem:[#allocation2 + $0x181] sm:$0xff] %vm516_vm1, %v6683_v1  ;;  %v8086_v34 = vld [vmem:[#allocation2 + $0x80] sm:$0xff]  ;;  %v8091_v1 = vpack.c.bf16 %v954_v31, %v953_v26 }
  0x3b   : > { %643 = vst.msk [vmem:[#allocation2 + $0x191] sm:$0xff] %vm516_vm1, %v6686_v8  ;;  %644 = vst.msk [vmem:[#allocation2 + $0x1a1] sm:$0xff] %vm516_vm1, %v6687_v12  ;;  %v955_v35 = vld [vmem:[#allocation2 + $0xa2] sm:$0xff]  ;;  %v1133_v8 = vpack.c.bf16 %v8086_v34, %v7938_v36 }
  0x3c   : > { %v7952_v40 = vld [vmem:[#allocation2 + $0xb1] sm:$0xff]  ;;  %v7979_v54 = vld [vmem:[#allocation2 + $0xc1] sm:$0xff]  ;;  %645 = vst.msk [vmem:[#allocation2 + $0x1b1] sm:$0xff] %vm516_vm1, %v6690_v48 }
  0x3d   : > { %v7955_v41 = vpack.c.bf16 %v7952_v40, %v680_v37  ;;  %v7957_v43 = vld [vmem:[#allocation2 + $0xb0] sm:$0xff]  ;;  %v7981_v55 = vld [vmem:[#allocation2 + $0xc0] sm:$0xff] }
  0x3e   : > { %v7963_v45 = vpack.c.bf16 %v7957_v43, %v655_v42  ;;  %v7986_v59 = vld [vmem:[#allocation2 + $0xd1] sm:$0xff]  ;;  %v7990_v61 = vld [vmem:[#allocation2 + $0xe1] sm:$0xff] }
  0x3f   : > { %6977 = vmatprep.mubr.msk.bf16.mxu0 %vm516_vm1, %v7955_v41  ;;  %v7988_v60 = vld [vmem:[#allocation2 + $0xd0] sm:$0xff]  ;;  %v7994_v2 = vpack.c.bf16 %v7986_v59, %v7979_v54  ;;  %v8002_v6 = vld [vmem:[#allocation2 + $0xe0] sm:$0xff] }
  0x40   : > { %6995 = vmatprep.mubr.msk.bf16.mxu1 %vm516_vm1, %v7963_v45  ;;  %v7998_v3 = vpack.c.bf16 %v7988_v60, %v7981_v55  ;;  %v8000_v4 = vld [vmem:[#allocation2 + $0xf1] sm:$0xff]  ;;  %v8022_v13 = vld [vmem:[#allocation2 + $0x101] sm:$0xff] }
  0x41   : > { %v8004_v7 = vld [vmem:[#allocation2 + $0xf0] sm:$0xff]  ;;  %v8008_v10 = vpack.c.bf16 %v8000_v4, %v7990_v61  ;;  %6978 = vmatmul.mubr.msk.bf16.gmra.mxu0 %vm516_vm1, %v7994_v2  ;;  %v661_v21 = vld [vmem:[#allocation2 + $0x100] sm:$0xff] }
  0x42   : > { %v8012_v11 = vpack.c.bf16 %v8004_v7, %v8002_v6  ;;  %6996 = vmatmul.mubr.msk.bf16.gmra.mxu1 %vm516_vm1, %v7998_v3  ;;  %v8029_v17 = vld [vmem:[#allocation2 + $0x111] sm:$0xff]  ;;  %v947_v37 = vld [vmem:[#allocation2 + $0x2] sm:$0xff] }
  0x43   : > { %6981 = vmatprep.mubr.msk.bf16.mxu0 %vm516_vm1, %v8008_v10  ;;  %v8031_v30 = vld [vmem:[#allocation2 + $0x110] sm:$0xff]  ;;  %v8041_v46 = vpack.c.bf16 %v8029_v17, %v8022_v13  ;;  %v957_v48 = vld [vmem:[#allocation2 + $0xc2] sm:$0xff] }
  0x44   : > { %6999 = vmatprep.mubr.msk.bf16.mxu1 %vm516_vm1, %v8012_v11  ;;  %v8034_v42 = vld [vmem:[#allocation2 + $0x12] sm:$0xff]  ;;  %v8044_v47 = vpack.c.bf16 %v8031_v30, %v661_v21  ;;  %v959_v36 = vld [vmem:[#allocation2 + $0xe2] sm:$0xff] }
  0x45   : > { %v963_v49 = vpack.c.bf16 %v8034_v42, %v947_v37  ;;  %v956_v0 = vld [vmem:[#allocation2 + $0xb2] sm:$0xff]  ;;  %v8099_v37 = vpack.c.bf16 %v7981_v55, %v7957_v43  ;;  %v8112_v43 = vpack.c.bf16 %v8002_v6, %v7988_v60  ;;  %v8127_v60 = vld [vmem:[#allocation2 + $0x120] sm:$0xff] }
  0x46   : > { %v8095_v12 = vpack.c.bf16 %v956_v0, %v955_v35  ;;  %v1462_v35 = vpack.c.bf16 %v949_v51, %v8034_v42  ;;  %v6433_v42 = vld [vmem:[%s10055_s2 + $0x10] sm:$0x3]  ;;  %v8162_v51 = vld [vmem:[#allocation2 + $0x82] sm:$0xff] }
  0x47   : > { %v1465_v22 = vpack.c.bf16 %v8162_v51, %v954_v31 }
  0x49   : > { %6982 = vmatmul.mubr.msk.bf16.gmra.mxu0 %vm516_vm1, %v8041_v46 }
  0x4a   : > { %7000 = vmatmul.mubr.msk.bf16.gmra.mxu1 %vm516_vm1, %v8044_v47  ;;  %7005 = vmatprep.mubr.msk.bf16.mxu0 %vm516_vm1, %v963_v49  ;;  %v958_v49 = vld [vmem:[#allocation2 + $0xd2] sm:$0xff] }
  0x4b   : > { %7023 = vmatprep.mubr.msk.bf16.mxu1 %vm516_vm1, %v1130_v50  ;;  %v960_v50 = vld [vmem:[#allocation2 + $0xf2] sm:$0xff] }
  0x4c   : > { %v8114_v55 = vpack.c.bf16 %v960_v50, %v959_v36 }
  0x51   : > { %7006 = vmatmul.mubr.msk.bf16.vlgmr.msra.gmra.mxu0 %vm516_vm1, %v8062_v14 }
  0x52   : > { %7024 = vmatmul.mubr.msk.bf16.vlgmr.msra.gmra.mxu1 %vm516_vm1, %v1131_v19  ;;  %7040 = vmatpush3.bf16.msra.mxu0 %v1331_v58  ;;  %v8108_v19 = vpack.c.bf16 %v958_v49, %v957_v48  ;;  %v8117_v58 = vpack.c.bf16 %v661_v21, %v8004_v7  ;;  %v8133_v7 = vpack.c.bf16 %v8127_v60, %v8031_v30 }
  0x53   : > { %7009 = vmatprep.mubr.msk.bf16.mxu0 %vm516_vm1, %v8067_v57  ;;  %7027 = vmatprep.mubr.msk.bf16.mxu1 %vm516_vm1, %v1132_v62  ;;  %v961_v62 = vld [vmem:[#allocation2 + $0x102] sm:$0xff]  ;;  %v1296_v21 = vpack.c.bf16 %v7872_v15, %v7867_v9  ;;  %v1298_v30 = vpack.c.bf16 %v7923_v32, %v7896_v24  ;;  %v1464_v9 = vpack.c.bf16 %v953_v26, %v8059_v56  ;;  %v1830_v15 = vsel %vm722_vm0, %v6424_v25, 0  ;;  %v6442_v24 = vld [vmem:[%s10055_s2 + $0x12] sm:$0x3]  ;;  %v6451_v56 = vld [vmem:[%s10055_s2 + $0x14] sm:$0x3] }
  0x54   : > { %7058 = vmatpush3.bf16.msra.mxu1 %v1497_v63  ;;  %7525 = vmatprep.subr.msk.bf16.mxu0 %vm722_vm0, %v6415_v20  ;;  %v962_v63 = vld [vmem:[#allocation2 + $0x112] sm:$0xff]  ;;  %v1287_v32 = vld [vmem:[#allocation2 + $0x81] sm:$0xff]  ;;  %v2329_v31 = vsel %vm722_vm0, %v6451_v56, 0 }
  0x55   : > { %7526 = vmatprep.subr.msk.bf16.mxu1 %vm722_vm0, %v6424_v25  ;;  %v8129_v6 = vpack.c.bf16 %v962_v63, %v961_v62  ;;  %v1299_v16 = vpack.c.bf16 %v1287_v32, %v7925_v33  ;;  %v8183_v33 = vpack.c.bf16 %v7990_v61, %v7986_v59  ;;  %v1295_v59 = vld [vmem:[#allocation2 + $0x121] sm:$0xff]  ;;  %v1786_v20 = vld [vmem:[#allocation2 + $0x91] sm:$0xff] }
  0x56   : > { %v8203_v61 = vld [vmem:[#allocation2 + $0x122] sm:$0xff] }
  0x59   : > { %7010 = vmatmul.mubr.msk.bf16.gmra.mxu0 %vm516_vm1, %v8091_v1 }
  0x5a   : > { %7028 = vmatmul.mubr.msk.bf16.gmra.mxu1 %vm516_vm1, %v1133_v8  ;;  %7013 = vmatprep.mubr.msk.bf16.mxu0 %vm516_vm1, %v8095_v12  ;;  %v1463_v8 = vpack.c.bf16 %v951_v53, %v8056_v52  ;;  %v8185_v52 = vpack.c.bf16 %v959_v36, %v958_v49  ;;  %v8192_v53 = vpack.c.bf16 %v961_v62, %v960_v50  ;;  %v8300_v36 = vld [vmem:[#allocation2 + $0x180] sm:$0xff]  ;;  %v8302_v50 = vld [vmem:[#allocation2 + $0x190] sm:$0xff] }
  0x5b   : > { %7031 = vmatprep.mubr.msk.bf16.mxu1 %vm516_vm1, %v8099_v37 }
  0x61   : > { %7014 = vmatmul.mubr.msk.bf16.gmra.mxu0 %vm516_vm1, %v8108_v19 }
  0x62   : > { %7032 = vmatmul.mubr.msk.bf16.gmra.mxu1 %vm516_vm1, %v8112_v43  ;;  %7017 = vmatprep.mubr.msk.bf16.mxu0 %vm516_vm1, %v8114_v55 }
  0x63   : > { %7035 = vmatprep.mubr.msk.bf16.mxu1 %vm516_vm1, %v8117_v58 }
  0x69   : > { %7018 = vmatmul.mubr.msk.bf16.gmra.mxu0 %vm516_vm1, %v8129_v6 }
  0x6a   : > { %7036 = vmatmul.mubr.msk.bf16.gmra.mxu1 %vm516_vm1, %v8133_v7  ;;  %7041 = vmatprep.mubr.msk.bf16.mxu0 %vm516_vm1, %v1296_v21  ;;  %v8324_v21 = vld [vmem:[#allocation2 + $0x1b0] sm:$0xff] }
  0x6b   : > { %7059 = vmatprep.mubr.msk.bf16.mxu1 %vm516_vm1, %v1462_v35 }
  0x71   : > { %7042 = vmatmul.mubr.msk.bf16.vlgmr.msra.gmra.mxu0 %vm516_vm1, %v1297_v27  ;;  %v8171_v27 = vpack.c.bf16 %v7979_v54, %v7952_v40  ;;  %v6691_v40 = vunpack.c.h.bf16 %v8037_v44  ;;  %v8190_v54 = vpack.c.bf16 %v8022_v13, %v8000_v4  ;;  %v8206_v4 = vpack.c.bf16 %v1295_v59, %v8029_v17 }
  0x72   : > { %7060 = vmatmul.mubr.msk.bf16.vlgmr.msra.gmra.mxu1 %vm516_vm1, %v1463_v8  ;;  %7076 = vmatpush3.bf16.msra.mxu0 %v1664_v5  ;;  %v8173_v5 = vpack.c.bf16 %v957_v48, %v956_v0  ;;  %v8209_v13 = vpack.c.bf16 %v8203_v61, %v962_v63  ;;  %v1996_v44 = vsel %vm722_vm0, %v6433_v42, 0  ;;  %v2163_v17 = vsel %vm722_vm0, %v6442_v24, 0  ;;  %v6469_v0 = vld [vmem:[%s10055_s2 + $0x18] sm:$0x3]  ;;  %v8281_v48 = vld [vmem:[#allocation2 + $0x150] sm:$0xff] }
  0x73   : > { %7045 = vmatprep.mubr.msk.bf16.mxu0 %vm516_vm1, %v1298_v30  ;;  %7063 = vmatprep.mubr.msk.bf16.mxu1 %vm516_vm1, %v1464_v9  ;;  %646 = vst.msk [vmem:[#allocation2 + $0x1c1] sm:$0xff] %vm516_vm1, %v6691_v40  ;;  %v8318_v63 = vld [vmem:[#allocation2 + $0x132] sm:$0xff]  ;;  %v2661_v30 = vsel %vm722_vm0, %v6469_v0, 0 }
  0x74   : > { %7094 = vmatpush3.bf16.msra.mxu1 %v1830_v15  ;;  %7527 = vmatprep.subr.msk.bf16.mxu0 %vm722_vm0, %v6433_v42  ;;  %v1968_v35 = vpack.c.bf16 %v8318_v63, %v8203_v61  ;;  %v6487_v15 = vld [vmem:[%s10055_s2 + $0x1c] sm:$0x3]  ;;  %v2452_v42 = vld [vmem:[#allocation2 + $0x142] sm:$0xff]  ;;  %v8382_v40 = vld [vmem:[#allocation2 + $0x191] sm:$0xff] }
  0x75   : > { %7528 = vmatprep.subr.msk.bf16.mxu1 %vm722_vm0, %v6442_v24 }
  0x79   : > { %7046 = vmatmul.mubr.msk.bf16.gmra.mxu0 %vm516_vm1, %v1299_v16  ;;  %v8378_v16 = vld [vmem:[#allocation2 + $0x172] sm:$0xff] }
  0x7a   : > { %7064 = vmatmul.mubr.msk.bf16.gmra.mxu1 %vm516_vm1, %v1465_v22  ;;  %7049 = vmatprep.mubr.msk.bf16.mxu0 %vm516_vm1, %v8171_v27  ;;  %v8380_v22 = vld [vmem:[#allocation2 + $0x181] sm:$0xff] }
  0x7b   : > { %7067 = vmatprep.mubr.msk.bf16.mxu1 %vm516_vm1, %v8173_v5 }
  0x81   : > { %7050 = vmatmul.mubr.msk.bf16.gmra.mxu0 %vm516_vm1, %v8183_v33 }
  0x82   : > { %7068 = vmatmul.mubr.msk.bf16.gmra.mxu1 %vm516_vm1, %v8185_v52  ;;  %7053 = vmatprep.mubr.msk.bf16.mxu0 %vm516_vm1, %v8190_v54 }
  0x83   : > { %7071 = vmatprep.mubr.msk.bf16.mxu1 %vm516_vm1, %v8192_v53 }
  0x89   : > { %7054 = vmatmul.mubr.msk.bf16.gmra.mxu0 %vm516_vm1, %v8206_v4 }
  0x8a   : > { %7072 = vmatmul.mubr.msk.bf16.gmra.mxu1 %vm516_vm1, %v8209_v13  ;;  %7077 = vmatprep.mubr.msk.bf16.mxu0 %vm516_vm1, %v7894_v23  ;;  %v6460_v23 = vld [vmem:[%s10055_s2 + $0x16] sm:$0x3] }
  0x8b   : > { %7095 = vmatprep.mubr.msk.bf16.mxu1 %vm516_vm1, %v7879_v18  ;;  %v1620_v18 = vld [vmem:[#allocation2 + $0x90] sm:$0xff] }
  0x91   : > { %7078 = vmatmul.mubr.msk.bf16.vlgmr.msra.gmra.mxu0 %vm516_vm1, %v7913_v29  ;;  %v1798_v29 = vpack.c.bf16 %v1786_v20, %v1287_v32  ;;  %v8418_v20 = vld [vmem:[#allocation2 + $0x1b2] sm:$0xff] }
  0x92   : > { %7096 = vmatmul.mubr.msk.bf16.vlgmr.msra.gmra.mxu1 %vm516_vm1, %v7909_v28  ;;  %7112 = vmatpush3.bf16.msra.mxu0 %v1996_v44  ;;  %v1632_v28 = vpack.c.bf16 %v1620_v18, %v8086_v34  ;;  %v2495_v34 = vsel %vm722_vm0, %v6460_v23, 0  ;;  %v8398_v44 = vpack.c.bf16 %v8382_v40, %v8380_v22  ;;  %v8416_v18 = vld [vmem:[#allocation2 + $0x1a2] sm:$0xff] }
  0x93   : > { %7081 = vmatprep.mubr.msk.bf16.mxu0 %vm516_vm1, %v7950_v39  ;;  %7099 = vmatprep.mubr.msk.bf16.mxu1 %vm516_vm1, %v7944_v38  ;;  %v1628_v38 = vld [vmem:[#allocation2 + $0x130] sm:$0xff] }
  0x94   : > { %7130 = vmatpush3.bf16.msra.mxu1 %v2163_v17  ;;  %7529 = vmatprep.subr.msk.bf16.mxu0 %vm722_vm0, %v6451_v56  ;;  %v8252_v39 = vld [vmem:[#allocation2 + $0x131] sm:$0xff]  ;;  %v8255_v25 = vpack.c.bf16 %v1628_v38, %v8127_v60  ;;  %v8322_v60 = vld [vmem:[#allocation2 + $0x1a0] sm:$0xff] }
  0x95   : > { %7530 = vmatprep.subr.msk.bf16.mxu1 %vm722_vm0, %v6460_v23  ;;  %v1802_v26 = vpack.c.bf16 %v8252_v39, %v1295_v59  ;;  %v8330_v8 = vpack.c.bf16 %v8324_v21, %v8322_v60  ;;  %v8408_v56 = vld [vmem:[#allocation2 + $0x1a1] sm:$0xff]  ;;  %v8412_v23 = vld [vmem:[#allocation2 + $0x1b1] sm:$0xff] }
  0x99   : > { %7082 = vmatmul.mubr.msk.bf16.gmra.mxu0 %vm516_vm1, %v1632_v28  ;;  %v8422_v28 = vpack.c.bf16 %v8412_v23, %v8408_v56 }
  0x9a   : > { %7100 = vmatmul.mubr.msk.bf16.gmra.mxu1 %vm516_vm1, %v1798_v29  ;;  %7085 = vmatprep.mubr.msk.bf16.mxu0 %vm516_vm1, %v7998_v3  ;;  %v8426_v29 = vpack.c.bf16 %v8418_v20, %v8416_v18 }
  0x9b   : > { %7103 = vmatprep.mubr.msk.bf16.mxu1 %vm516_vm1, %v7994_v2 }
  0xa1   : > { %7086 = vmatmul.mubr.msk.bf16.gmra.mxu0 %vm516_vm1, %v8012_v11 }
  0xa2   : > { %7104 = vmatmul.mubr.msk.bf16.gmra.mxu1 %vm516_vm1, %v8008_v10  ;;  %7089 = vmatprep.mubr.msk.bf16.mxu0 %vm516_vm1, %v8044_v47 }
  0xa3   : > { %7107 = vmatprep.mubr.msk.bf16.mxu1 %vm516_vm1, %v8041_v46 }
  0xa9   : > { %7090 = vmatmul.mubr.msk.bf16.gmra.mxu0 %vm516_vm1, %v8255_v25 }
  0xaa   : > { %7108 = vmatmul.mubr.msk.bf16.gmra.mxu1 %vm516_vm1, %v1802_v26  ;;  %7113 = vmatprep.mubr.msk.bf16.mxu0 %vm516_vm1, %v8062_v14  ;;  %v6478_v14 = vld [vmem:[%s10055_s2 + $0x1a] sm:$0x3] }
  0xab   : > { %7131 = vmatprep.mubr.msk.bf16.mxu1 %vm516_vm1, %v7963_v45  ;;  %v1952_v45 = vld [vmem:[#allocation2 + $0x92] sm:$0xff]  ;;  %v2827_v9 = vsel %vm722_vm0, %v6478_v14, 0 }
  0xb1   : > { %7114 = vmatmul.mubr.msk.bf16.vlgmr.msra.gmra.mxu0 %vm516_vm1, %v8067_v57  ;;  %v2120_v57 = vld [vmem:[#allocation2 + $0x140] sm:$0xff] }
  0xb2   : > { %7132 = vmatmul.mubr.msk.bf16.vlgmr.msra.gmra.mxu1 %vm516_vm1, %v7998_v3  ;;  %7148 = vmatpush3.bf16.msra.mxu0 %v2329_v31  ;;  %v1964_v3 = vpack.c.bf16 %v1952_v45, %v8162_v51  ;;  %v8287_v49 = vpack.c.bf16 %v8281_v48, %v2120_v57  ;;  %v8376_v51 = vld [vmem:[#allocation2 + $0x162] sm:$0xff] }
  0xb3   : > { %7117 = vmatprep.mubr.msk.bf16.mxu0 %vm516_vm1, %v8091_v1  ;;  %7135 = vmatprep.mubr.msk.bf16.mxu1 %vm516_vm1, %v8012_v11  ;;  %v8296_v11 = vld [vmem:[#allocation2 + $0x160] sm:$0xff]  ;;  %v8298_v1 = vld [vmem:[#allocation2 + $0x170] sm:$0xff]  ;;  %v8394_v61 = vpack.c.bf16 %v8378_v16, %v8376_v51 }
  0xb4   : > { %7166 = vmatpush3.bf16.msra.mxu1 %v2495_v34  ;;  %7531 = vmatprep.subr.msk.bf16.mxu0 %vm722_vm0, %v6469_v0  ;;  %v8306_v62 = vpack.c.bf16 %v8298_v1, %v8296_v11  ;;  %v2993_v34 = vsel %vm722_vm0, %v6487_v15, 0 }
  0xb5   : > { %7532 = vmatprep.subr.msk.bf16.mxu1 %vm722_vm0, %v6478_v14 }
  0xb9   : > { %7118 = vmatmul.mubr.msk.bf16.gmra.mxu0 %vm516_vm1, %v1964_v3  ;;  %v8454_v3 = vld [vmem:[%s10055_s2 + $0x22] sm:$0x3] }
  0xba   : > { %7136 = vmatmul.mubr.msk.bf16.gmra.mxu1 %vm516_vm1, %v8044_v47  ;;  %7121 = vmatprep.mubr.msk.bf16.mxu0 %vm516_vm1, %v8108_v19  ;;  %v8310_v47 = vpack.c.bf16 %v8302_v50, %v8300_v36 }
  0xbb   : > { %7139 = vmatprep.mubr.msk.bf16.mxu1 %vm516_vm1, %v8287_v49 }
  0xc1   : > { %7122 = vmatmul.mubr.msk.bf16.gmra.mxu0 %vm516_vm1, %v8114_v55 }
  0xc2   : > { %7140 = vmatmul.mubr.msk.bf16.gmra.mxu1 %vm516_vm1, %v8306_v62  ;;  %7125 = vmatprep.mubr.msk.bf16.mxu0 %vm516_vm1, %v8129_v6 }
  0xc3   : > { %7143 = vmatprep.mubr.msk.bf16.mxu1 %vm516_vm1, %v8310_v47 }
  0xc9   : > { %7126 = vmatmul.mubr.msk.bf16.gmra.mxu0 %vm516_vm1, %v1968_v35 }
  0xca   : > { %7144 = vmatmul.mubr.msk.bf16.gmra.mxu1 %vm516_vm1, %v8330_v8  ;;  %7149 = vmatprep.mubr.msk.bf16.mxu0 %vm516_vm1, %v7955_v41  ;;  %v6496_v41 = vld [vmem:[%s10055_s2 + $0x1e] sm:$0x3] }
  0xcb   : > { %7167 = vmatprep.mubr.msk.bf16.mxu1 %vm516_vm1, %v8095_v12  ;;  %v2286_v12 = vld [vmem:[#allocation2 + $0x141] sm:$0xff]  ;;  %v3160_v45 = vsel %vm722_vm0, %v6496_v41, 0 }
  0xd1   : > { %7150 = vmatmul.mubr.msk.bf16.vlgmr.msra.gmra.mxu0 %vm516_vm1, %v7994_v2  ;;  %v8355_v2 = vld [vmem:[#allocation2 + $0x151] sm:$0xff] }
  0xd2   : > { %7168 = vmatmul.mubr.msk.bf16.vlgmr.msra.gmra.mxu1 %vm516_vm1, %v8108_v19  ;;  %7184 = vmatpush3.bf16.msra.mxu0 %v2661_v30  ;;  %v8357_v19 = vld [vmem:[#allocation2 + $0x152] sm:$0xff]  ;;  %v8362_v24 = vpack.c.bf16 %v8355_v2, %v2286_v12 }
  0xd3   : > { %7153 = vmatprep.mubr.msk.bf16.mxu0 %vm516_vm1, %v8008_v10  ;;  %7171 = vmatprep.mubr.msk.bf16.mxu1 %vm516_vm1, %v8114_v55  ;;  %v2464_v32 = vpack.c.bf16 %v8357_v19, %v2452_v42  ;;  %v8369_v10 = vld [vmem:[#allocation2 + $0x161] sm:$0xff]  ;;  %v8371_v55 = vld [vmem:[#allocation2 + $0x171] sm:$0xff] }
  0xd4   : > { %7202 = vmatpush3.bf16.msra.mxu1 %v2827_v9  ;;  %7533 = vmatprep.subr.msk.bf16.mxu0 %vm722_vm0, %v6487_v15  ;;  %v8390_v59 = vpack.c.bf16 %v8371_v55, %v8369_v10  ;;  %v2796_v12 = vpack.c.bf16 %v8369_v10, %v8355_v2 }
  0xd5   : > { %7534 = vmatprep.subr.msk.bf16.mxu1 %vm722_vm0, %v6496_v41 }
  0xd9   : > { %7154 = vmatmul.mubr.msk.bf16.gmra.mxu0 %vm516_vm1, %v8041_v46  ;;  %v8384_v46 = vld [vmem:[#allocation2 + $0x182] sm:$0xff]  ;;  %v6989_v26 = vpop.f32.mrf.mxu1 }
  0xda   : > { %7172 = vmatmul.mubr.msk.bf16.gmra.mxu1 %vm516_vm1, %v8129_v6  ;;  %7157 = vmatprep.mubr.msk.bf16.mxu0 %vm516_vm1, %v8362_v24  ;;  %v8386_v6 = vld [vmem:[#allocation2 + $0x192] sm:$0xff]  ;;  %v6971_v38 = vpop.f32.mrf.mxu0 }
  0xdb   : > { %7175 = vmatprep.mubr.msk.bf16.mxu1 %vm516_vm1, %v2464_v32  ;;  %v8402_v17 = vpack.c.bf16 %v8386_v6, %v8384_v46  ;;  %v8436_v31 = vadd.f32 %v6989_v26, %v6971_v38  ;;  %v884_v14 = vpop.f32.mrf.mxu1 }
  0xdc   : > { %v760_v0 = vpop.f32.mrf.mxu0 }
  0xdd   : > { %v8442_v57 = vadd.f32 %v884_v14, %v760_v0  ;;  %v6990_v35 = vpop.f32.mrf.mxu1  ;;  %v2797_v0 = vpack.c.bf16 %v8380_v22, %v8371_v55  ;;  %v2798_v14 = vpack.c.bf16 %v8408_v56, %v8382_v40  ;;  %v3109_v55 = vld [vmem:[#allocation2 + $0xc0] sm:$0xff]  ;;  %v3110_v22 = vld [vmem:[#allocation2 + $0xd0] sm:$0xff] }
  0xe1   : > { %7158 = vmatmul.mubr.msk.bf16.gmra.mxu0 %vm516_vm1, %v8390_v59 }
  0xe2   : > { %7176 = vmatmul.mubr.msk.bf16.gmra.mxu1 %vm516_vm1, %v8394_v61  ;;  %7161 = vmatprep.mubr.msk.bf16.mxu0 %vm516_vm1, %v8398_v44 }
  0xe3   : > { %7179 = vmatprep.mubr.msk.bf16.mxu1 %vm516_vm1, %v8402_v17 }
  0xe9   : > { %7162 = vmatmul.mubr.msk.bf16.gmra.mxu0 %vm516_vm1, %v8422_v28 }
  0xea   : > { %7180 = vmatmul.mubr.msk.bf16.gmra.mxu1 %vm516_vm1, %v8426_v29  ;;  %7185 = vmatprep.mubr.msk.bf16.mxu0 %vm516_vm1, %v8099_v37  ;;  %v6972_v37 = vpop.f32.mrf.mxu0 }
  0xeb   : > { %7203 = vmatprep.mubr.msk.bf16.mxu1 %vm516_vm1, %v8171_v27  ;;  %v8449_v27 = vld [vmem:[%s10055_s2 + $0x20] sm:$0x3] }
  0xec   : > { %v763_v30 = vpop.f32.mrf.mxu0 }
  0xee   : > { %v6975_v15 = vpop.f32.mrf.mxu0 }
  0xf1   : > { %7186 = vmatmul.mubr.msk.bf16.vlgmr.msra.gmra.mxu0 %vm516_vm1, %v8112_v43  ;;  %v8458_v43 = vadd.f32 %v6990_v35, %v6972_v37 }
  0xf2   : > { %7204 = vmatmul.mubr.msk.bf16.vlgmr.msra.gmra.mxu1 %vm516_vm1, %v8183_v33  ;;  %7220 = vmatpush3.bf16.msra.mxu0 %v2993_v34  ;;  %v887_v33 = vpop.f32.mrf.mxu1 }
  0xf3   : > { %7189 = vmatprep.mubr.msk.bf16.mxu0 %vm516_vm1, %v8117_v58  ;;  %7207 = vmatprep.mubr.msk.bf16.mxu1 %vm516_vm1, %v8190_v54  ;;  %v8466_v9 = vadd.f32 %v887_v33, %v763_v30  ;;  %v2630_v58 = vpack.c.bf16 %v8296_v11, %v8281_v48  ;;  %v776_v54 = vpop.f32.mrf.mxu0 }
  0xf4   : > { %7238 = vmatpush3.bf16.msra.mxu1 %v3160_v45  ;;  %7535 = vmatprep.subr.msk.bf16.mxu0 %vm722_vm0, %v8449_v27  ;;  %v6993_v41 = vpop.f32.mrf.mxu1 }
  0xf5   : > { %7536 = vmatprep.subr.msk.bf16.mxu1 %vm722_vm0, %v8454_v3  ;;  %v8472_v42 = vadd.f32 %v6993_v41, %v6975_v15  ;;  %v6976_v26 = vpop.f32.mrf.mxu0 }
  0xf6   : > { %v900_v32 = vpop.f32.mrf.mxu1 }
  0xf7   : > { %v8476_v38 = vadd.f32 %v900_v32, %v776_v54  ;;  %v779_v11 = vpop.f32.mrf.mxu0 }
  0xf8   : > { %v6994_v34 = vpop.f32.mrf.mxu1 }
  0xf9   : > { %7190 = vmatmul.mubr.msk.bf16.gmra.mxu0 %vm516_vm1, %v8133_v7  ;;  %v8482_v48 = vadd.f32 %v6994_v34, %v6976_v26  ;;  %v2631_v7 = vpack.c.bf16 %v8300_v36, %v8298_v1  ;;  %v8499_v1 = vld [vmem:[#allocation2 + $0x1c0] sm:$0xff] }
  0xfa   : > { %7208 = vmatmul.mubr.msk.bf16.gmra.mxu1 %vm516_vm1, %v8206_v4  ;;  %7193 = vmatprep.mubr.msk.bf16.mxu0 %vm516_vm1, %v2630_v58  ;;  %v903_v2 = vpop.f32.mrf.mxu1  ;;  %v2632_v4 = vpack.c.bf16 %v8322_v60, %v8302_v50  ;;  %v8502_v36 = vld [vmem:[#allocation2 + $0x1c1] sm:$0xff]  ;;  %v2633_v33 = vpack.c.bf16 %v8499_v1, %v8324_v21  ;;  %v3125_v58 = vpack.c.bf16 %v3110_v22, %v3109_v55 }
  0xfb   : > { %7211 = vmatprep.mubr.msk.bf16.mxu1 %vm516_vm1, %v2796_v12  ;;  %v8484_v10 = vadd.f32 %v903_v2, %v779_v11  ;;  %v2799_v15 = vpack.c.bf16 %v8502_v36, %v8412_v23  ;;  %v3111_v21 = vld [vmem:[#allocation2 + $0xe0] sm:$0xff]  ;;  %v3112_v23 = vld [vmem:[#allocation2 + $0xf0] sm:$0xff] }
 0x101   : > { %v6979_v45 = vpop.f32.mrf.mxu0  ;;  %7194 = vmatmul.mubr.msk.bf16.gmra.mxu0 %vm516_vm1, %v2631_v7 }
 0x102   : > { %v6997_v37 = vpop.f32.mrf.mxu1  ;;  %7212 = vmatmul.mubr.msk.bf16.gmra.mxu1 %vm516_vm1, %v2797_v0  ;;  %7197 = vmatprep.mubr.msk.bf16.mxu0 %vm516_vm1, %v2632_v4  ;;  %v3113_v4 = vld [vmem:[#allocation2 + $0x100] sm:$0xff] }
 0x103   : > { %v8496_v35 = vadd.f32 %v6997_v37, %v6979_v45  ;;  %7215 = vmatprep.mubr.msk.bf16.mxu1 %vm516_vm1, %v2798_v14  ;;  %v792_v50 = vpop.f32.mrf.mxu0  ;;  %v3114_v14 = vld [vmem:[#allocation2 + $0x110] sm:$0xff] }
 0x104   : > { %v916_v60 = vpop.f32.mrf.mxu1 }
 0x105   : > { %v8504_v40 = vadd.f32 %v916_v60, %v792_v50  ;;  %v6980_v56 = vpop.f32.mrf.mxu0  ;;  %v3126_v50 = vpack.c.bf16 %v3112_v23, %v3111_v21 }
 0x106   : > { %v6998_v30 = vpop.f32.mrf.mxu1 }
 0x107   : > { %v8510_v41 = vadd.f32 %v6998_v30, %v6980_v56  ;;  %v795_v12 = vpop.f32.mrf.mxu0  ;;  %v3127_v56 = vpack.c.bf16 %v3114_v14, %v3113_v4 }
 0x108   : > { %v919_v54 = vpop.f32.mrf.mxu1 }
 0x109   : > { %v8512_v32 = vadd.f32 %v919_v54, %v795_v12  ;;  %v6983_v26 = vpop.f32.mrf.mxu0  ;;  %7198 = vmatmul.mubr.msk.bf16.gmra.mxu0 %vm516_vm1, %v2633_v33  ;;  %v3492_v33 = vsel %vm722_vm0, %v8454_v3, 0  ;;  %v8537_v12 = vld [vmem:[%s10055_s2 + $0x24] sm:$0x3] }
 0x10a   : > { %v7001_v34 = vpop.f32.mrf.mxu1  ;;  %7216 = vmatmul.mubr.msk.bf16.gmra.mxu1 %vm516_vm1, %v2799_v15  ;;  %7221 = vmatprep.mubr.msk.bf16.mxu0 %vm516_vm1, %v8173_v5  ;;  %v3326_v5 = vsel %vm722_vm0, %v8449_v27, 0  ;;  %v8542_v27 = vld [vmem:[%s10055_s2 + $0x26] sm:$0x3] }
 0x10b   : > { %v8516_v11 = vadd.f32 %v7001_v34, %v6983_v26  ;;  %7239 = vmatprep.mubr.msk.bf16.mxu1 %vm516_vm1, %v3125_v58  ;;  %v808_v2 = vpop.f32.mrf.mxu0 }
 0x10c   : > { %v932_v7 = vpop.f32.mrf.mxu1 }
 0x10d   : > { %v8521_v0 = vadd.f32 %v932_v7, %v808_v2  ;;  %v6984_v45 = vpop.f32.mrf.mxu0  ;;  %v2962_v2 = vpack.c.bf16 %v8376_v51, %v8357_v19 }
 0x10e   : > { %v7002_v37 = vpop.f32.mrf.mxu1 }
 0x10f   : > { %v8523_v60 = vadd.f32 %v7002_v37, %v6984_v45  ;;  %v811_v55 = vpop.f32.mrf.mxu0 }
 0x110   : > { %v935_v22 = vpop.f32.mrf.mxu1 }
 0x111   : > { %v8527_v30 = vadd.f32 %v935_v22, %v811_v55  ;;  %v7007_v15 = vpop.f32.mrf.mxu0  ;;  %7222 = vmatmul.mubr.msk.bf16.vlgmr.msra.gmra.mxu0 %vm516_vm1, %v8185_v52 }
 0x112   : > { %v7025_v58 = vpop.f32.mrf.mxu1  ;;  %7240 = vmatmul.mubr.msk.bf16.vlgmr.msra.gmra.mxu1 %vm516_vm1, %v3126_v50  ;;  %v1099_v54 = vadd.f32 %v7007_v15, %v8436_v31  ;;  %7256 = vmatpush3.bf16.msra.mxu0 %v3326_v5 }
 0x113   : > { %7225 = vmatprep.mubr.msk.bf16.mxu0 %vm516_vm1, %v8192_v53  ;;  %v1034_v52 = vpop.f32.mrf.mxu0  ;;  %7243 = vmatprep.mubr.msk.bf16.mxu1 %vm516_vm1, %v3127_v56  ;;  %v2964_v56 = vpack.c.bf16 %v8416_v18, %v8386_v6  ;;  %v8593_v6 = vld [vmem:[#allocation2 + $0x1c2] sm:$0xff]  ;;  %v3124_v18 = vld [vmem:[#allocation2 + $0x1d0] sm:$0xff] }
 0x114   : > { %v1201_v3 = vpop.f32.mrf.mxu1  ;;  %7274 = vmatpush3.bf16.msra.mxu1 %v3492_v33  ;;  %v1097_v26 = vadd.f32 %v1034_v52, %v8442_v57  ;;  %v8549_v34 = vadd.f32 %v7025_v58, %v1099_v54  ;;  %7537 = vmatprep.subr.msk.bf16.mxu0 %vm722_vm0, %v8537_v12 }
 0x115   : > { %7538 = vmatprep.subr.msk.bf16.mxu1 %vm722_vm0, %v8542_v27  ;;  %v7008_v31 = vpop.f32.mrf.mxu0 }
 0x116   : > { %v7026_v21 = vpop.f32.mrf.mxu1  ;;  %v1100_v23 = vadd.f32 %v7008_v31, %v8458_v43  ;;  %v8556_v53 = vadd.f32 %v1201_v3, %v1097_v26  ;;  %v3276_v26 = vld [vmem:[#allocation2 + $0xd1] sm:$0xff]  ;;  %v3441_v31 = vld [vmem:[#allocation2 + $0xc2] sm:$0xff] }
 0x117   : > { %v1037_v7 = vpop.f32.mrf.mxu0 }
 0x118   : > { %v1204_v4 = vpop.f32.mrf.mxu1  ;;  %v1098_v57 = vadd.f32 %v1037_v7, %v8466_v9  ;;  %v8561_v14 = vadd.f32 %v7026_v21, %v1100_v23  ;;  %v3442_v21 = vld [vmem:[#allocation2 + $0xd2] sm:$0xff]  ;;  %v2965_v7 = vpack.c.bf16 %v8593_v6, %v8418_v20  ;;  %v3277_v20 = vld [vmem:[#allocation2 + $0xe1] sm:$0xff] }
 0x119   : > { %v7011_v45 = vpop.f32.mrf.mxu0  ;;  %7226 = vmatmul.mubr.msk.bf16.gmra.mxu0 %vm516_vm1, %v8209_v13 }
 0x11a   : > { %v7029_v37 = vpop.f32.mrf.mxu1  ;;  %7244 = vmatmul.mubr.msk.bf16.gmra.mxu1 %vm516_vm1, %v8255_v25  ;;  %v1103_v43 = vadd.f32 %v7011_v45, %v8472_v42  ;;  %v8568_v50 = vadd.f32 %v1204_v4, %v1098_v57  ;;  %7229 = vmatprep.mubr.msk.bf16.mxu0 %vm516_vm1, %v2962_v2  ;;  %v2963_v25 = vpack.c.bf16 %v8384_v46, %v8378_v16 }
 0x11b   : > { %7247 = vmatprep.mubr.msk.bf16.mxu1 %vm516_vm1, %v8306_v62  ;;  %v1050_v19 = vpop.f32.mrf.mxu0  ;;  %v3132_v4 = vpack.c.bf16 %v3124_v18, %v8499_v1  ;;  %v3446_v18 = vld [vmem:[#allocation2 + $0x112] sm:$0xff] }
 0x11c   : > { %v1217_v51 = vpop.f32.mrf.mxu1  ;;  %v1101_v9 = vadd.f32 %v1050_v19, %v8476_v38  ;;  %v8574_v55 = vadd.f32 %v7029_v37, %v1103_v43  ;;  %v3457_v37 = vpack.c.bf16 %v3442_v21, %v3441_v31 }
 0x11d   : > { %v7012_v13 = vpop.f32.mrf.mxu0 }
 0x11e   : > { %v7030_v22 = vpop.f32.mrf.mxu1  ;;  %v1104_v42 = vadd.f32 %v7012_v13, %v8482_v48  ;;  %v8579_v5 = vadd.f32 %v1217_v51, %v1101_v9  ;;  %v3275_v48 = vld [vmem:[#allocation2 + $0xc1] sm:$0xff] }
 0x11f   : > { %v1053_v33 = vpop.f32.mrf.mxu0  ;;  %v3291_v45 = vpack.c.bf16 %v3276_v26, %v3275_v48 }
 0x120   : > { %v1220_v15 = vpop.f32.mrf.mxu1  ;;  %v1102_v58 = vadd.f32 %v1053_v33, %v8484_v10  ;;  %v8584_v54 = vadd.f32 %v7030_v22, %v1104_v42  ;;  %v3443_v42 = vld [vmem:[#allocation2 + $0xe2] sm:$0xff] }
 0x121   : > { %v7015_v38 = vpop.f32.mrf.mxu0  ;;  %7230 = vmatmul.mubr.msk.bf16.gmra.mxu0 %vm516_vm1, %v2963_v25  ;;  %v3278_v25 = vld [vmem:[#allocation2 + $0xf1] sm:$0xff] }
 0x122   : > { %v7033_v52 = vpop.f32.mrf.mxu1  ;;  %7248 = vmatmul.mubr.msk.bf16.gmra.mxu1 %vm516_vm1, %v8310_v47  ;;  %v1107_v16 = vadd.f32 %v7015_v38, %v8496_v35  ;;  %v8590_v46 = vadd.f32 %v1220_v15, %v1102_v58  ;;  %7233 = vmatprep.mubr.msk.bf16.mxu0 %vm516_vm1, %v2964_v56  ;;  %v3279_v15 = vld [vmem:[#allocation2 + $0x101] sm:$0xff]  ;;  %v3280_v58 = vld [vmem:[#allocation2 + $0x111] sm:$0xff] }
 0x123   : > { %7251 = vmatprep.mubr.msk.bf16.mxu1 %vm516_vm1, %v8330_v8  ;;  %v1066_v10 = vpop.f32.mrf.mxu0  ;;  %v3293_v21 = vpack.c.bf16 %v3280_v58, %v3279_v15 }
 0x124   : > { %v1233_v3 = vpop.f32.mrf.mxu1  ;;  %v1105_v47 = vadd.f32 %v1066_v10, %v8504_v40  ;;  %v8598_v23 = vadd.f32 %v7033_v52, %v1107_v16  ;;  %v3445_v16 = vld [vmem:[#allocation2 + $0x102] sm:$0xff]  ;;  %v3292_v10 = vpack.c.bf16 %v3278_v25, %v3277_v20 }
 0x125   : > { %v7016_v35 = vpop.f32.mrf.mxu0 }
 0x126   : > { %v7034_v2 = vpop.f32.mrf.mxu1  ;;  %v1108_v8 = vadd.f32 %v7016_v35, %v8510_v41  ;;  %v8604_v57 = vadd.f32 %v1233_v3, %v1105_v47 }
 0x127   : > { %v1069_v43 = vpop.f32.mrf.mxu0 }
 0x128   : > { %v1236_v19 = vpop.f32.mrf.mxu1  ;;  %v1106_v51 = vadd.f32 %v1069_v43, %v8512_v32  ;;  %v8607_v40 = vadd.f32 %v7034_v2, %v1108_v8  ;;  %v3444_v32 = vld [vmem:[#allocation2 + $0xf2] sm:$0xff]  ;;  %v3659_v2 = vsel %vm722_vm0, %v8537_v12, 0  ;;  %v3825_v8 = vsel %vm722_vm0, %v8542_v27, 0  ;;  %v3281_v43 = vld [vmem:[#allocation2 + $0x121] sm:$0xff] }
 0x129   : > { %v7019_v9 = vpop.f32.mrf.mxu0  ;;  %7234 = vmatmul.mubr.msk.bf16.gmra.mxu0 %vm516_vm1, %v2965_v7  ;;  %v3458_v3 = vpack.c.bf16 %v3444_v32, %v3443_v42  ;;  %v3459_v7 = vpack.c.bf16 %v3446_v18, %v3445_v16  ;;  %v3294_v25 = vpack.c.bf16 %v8252_v39, %v3281_v43 }
 0x12a   : > { %v7037_v13 = vpop.f32.mrf.mxu1  ;;  %7252 = vmatmul.mubr.msk.bf16.gmra.mxu1 %vm516_vm1, %v3132_v4  ;;  %v1111_v22 = vadd.f32 %v7019_v9, %v8516_v11  ;;  %v8612_v41 = vadd.f32 %v1236_v19, %v1106_v51  ;;  %7257 = vmatprep.mubr.msk.bf16.mxu0 %vm516_vm1, %v3291_v45  ;;  %v3447_v19 = vld [vmem:[#allocation2 + $0x122] sm:$0xff] }
 0x12b   : > { %7275 = vmatprep.mubr.msk.bf16.mxu1 %vm516_vm1, %v3457_v37  ;;  %v1082_v56 = vpop.f32.mrf.mxu0  ;;  %v8634_v37 = vld [vmem:[%s10055_s2 + $0x28] sm:$0x3]  ;;  %v3460_v42 = vpack.c.bf16 %v8318_v63, %v3447_v19 }
 0x12c   : > { %v1249_v33 = vpop.f32.mrf.mxu1  ;;  %v1109_v38 = vadd.f32 %v1082_v56, %v8521_v0  ;;  %v8617_v52 = vadd.f32 %v7037_v13, %v1111_v22 }
 0x12d   : > { %v7020_v11 = vpop.f32.mrf.mxu0 }
 0x12e   : > { %v7038_v48 = vpop.f32.mrf.mxu1  ;;  %v1112_v26 = vadd.f32 %v7020_v11, %v8523_v60  ;;  %v8620_v31 = vadd.f32 %v1249_v33, %v1109_v38 }
 0x12f   : > { %v1085_v47 = vpop.f32.mrf.mxu0 }
 0x130   : > { %v1252_v35 = vpop.f32.mrf.mxu1  ;;  %v1110_v0 = vadd.f32 %v1085_v47, %v8527_v30  ;;  %v8625_v4 = vadd.f32 %v7038_v48, %v1112_v26  ;;  %v8639_v30 = vld [vmem:[%s10055_s2 + $0x2a] sm:$0x3] }
 0x131   : > { %v7043_v45 = vpop.f32.mrf.mxu0  ;;  %7258 = vmatmul.mubr.msk.bf16.vlgmr.msra.gmra.mxu0 %vm516_vm1, %v3292_v10 }
 0x132   : > { %v7061_v60 = vpop.f32.mrf.mxu1  ;;  %7276 = vmatmul.mubr.msk.bf16.vlgmr.msra.gmra.mxu1 %vm516_vm1, %v3458_v3  ;;  %v8641_v12 = vadd.f32 %v1252_v35, %v1110_v0  ;;  %v1432_v27 = vadd.f32 %v7043_v45, %v8549_v34  ;;  %7292 = vmatpush3.bf16.msra.mxu0 %v3659_v2 }
 0x133   : > { %7261 = vmatprep.mubr.msk.bf16.mxu0 %vm516_vm1, %v3293_v21  ;;  %v1367_v51 = vpop.f32.mrf.mxu0  ;;  %7279 = vmatprep.mubr.msk.bf16.mxu1 %vm516_vm1, %v3459_v7 }
 0x134   : > { %v1533_v9 = vpop.f32.mrf.mxu1  ;;  %7310 = vmatpush3.bf16.msra.mxu1 %v3825_v8  ;;  %v1430_v13 = vadd.f32 %v1367_v51, %v8556_v53  ;;  %v8647_v20 = vadd.f32 %v7061_v60, %v1432_v27  ;;  %7539 = vmatprep.subr.msk.bf16.mxu0 %vm722_vm0, %v8634_v37 }
 0x135   : > { %7540 = vmatprep.subr.msk.bf16.mxu1 %vm722_vm0, %v8639_v30  ;;  %v7044_v34 = vpop.f32.mrf.mxu0 }
 0x136   : > { %v7062_v22 = vpop.f32.mrf.mxu1  ;;  %v1433_v32 = vadd.f32 %v7044_v34, %v8561_v14  ;;  %v8656_v56 = vadd.f32 %v1533_v9, %v1430_v13 }
 0x137   : > { %v1370_v33 = vpop.f32.mrf.mxu0 }
 0x138   : > { %v1536_v53 = vpop.f32.mrf.mxu1  ;;  %v1431_v15 = vadd.f32 %v1370_v33, %v8568_v50  ;;  %v8659_v58 = vadd.f32 %v7062_v22, %v1433_v32  ;;  %v8715_v32 = vld [vmem:[#allocation2 + $0x190] sm:$0xff] }
 0x139   : > { %v7047_v38 = vpop.f32.mrf.mxu0  ;;  %7262 = vmatmul.mubr.msk.bf16.gmra.mxu0 %vm516_vm1, %v3294_v25 }
 0x13a   : > { %v7065_v16 = vpop.f32.mrf.mxu1  ;;  %7280 = vmatmul.mubr.msk.bf16.gmra.mxu1 %vm516_vm1, %v3460_v42  ;;  %v1436_v39 = vadd.f32 %v7047_v38, %v8574_v55  ;;  %v8664_v18 = vadd.f32 %v1536_v53, %v1431_v15  ;;  %7265 = vmatprep.mubr.msk.bf16.mxu0 %vm516_vm1, %v8390_v59  ;;  %v8713_v42 = vld [vmem:[#allocation2 + $0x180] sm:$0xff] }
 0x13b   : > { %7283 = vmatprep.mubr.msk.bf16.mxu1 %vm516_vm1, %v8394_v61  ;;  %v1383_v63 = vpop.f32.mrf.mxu0 }
 0x13c   : > { %v1549_v14 = vpop.f32.mrf.mxu1  ;;  %v1434_v50 = vadd.f32 %v1383_v63, %v8579_v5  ;;  %v8671_v11 = vadd.f32 %v7065_v16, %v1436_v39  ;;  %v3991_v63 = vsel %vm722_vm0, %v8634_v37, 0  ;;  %v8746_v37 = vld [vmem:[%s10055_s2 + $0x2e] sm:$0x3] }
 0x13d   : > { %v7048_v48 = vpop.f32.mrf.mxu0 }
 0x13e   : > { %v7066_v10 = vpop.f32.mrf.mxu1  ;;  %v1437_v3 = vadd.f32 %v7048_v48, %v8584_v54  ;;  %v8674_v26 = vadd.f32 %v1549_v14, %v1434_v50  ;;  %v8688_v54 = vld [vmem:[#allocation2 + $0x1d1] sm:$0xff]  ;;  %v4158_v50 = vsel %vm722_vm0, %v8639_v30, 0 }
 0x13f   : > { %v1386_v55 = vpop.f32.mrf.mxu0 }
 0x140   : > { %v1552_v21 = vpop.f32.mrf.mxu1  ;;  %v1435_v47 = vadd.f32 %v1386_v55, %v8590_v46  ;;  %v8677_v35 = vadd.f32 %v7066_v10, %v1437_v3  ;;  %v3456_v46 = vld [vmem:[#allocation2 + $0x1d2] sm:$0xff]  ;;  %v8741_v10 = vld [vmem:[%s10055_s2 + $0x2c] sm:$0x3]  ;;  %v3616_v3 = vld [vmem:[#allocation2 + $0x1e0] sm:$0xff] }
 0x141   : > { %v7051_v2 = vpop.f32.mrf.mxu0  ;;  %7266 = vmatmul.mubr.msk.bf16.gmra.mxu0 %vm516_vm1, %v8398_v44  ;;  %v3464_v43 = vpack.c.bf16 %v3456_v46, %v8593_v6 }
 0x142   : > { %v7069_v61 = vpop.f32.mrf.mxu1  ;;  %7284 = vmatmul.mubr.msk.bf16.gmra.mxu1 %vm516_vm1, %v8402_v17  ;;  %v1440_v5 = vadd.f32 %v7051_v2, %v8598_v23  ;;  %v8684_v7 = vadd.f32 %v1552_v21, %v1435_v47  ;;  %7269 = vmatprep.mubr.msk.bf16.mxu0 %vm516_vm1, %v8422_v28  ;;  %v3298_v23 = vpack.c.bf16 %v8688_v54, %v8502_v36  ;;  %v8759_v47 = vld [vmem:[#allocation2 + $0x1f0] sm:$0xff]  ;;  %v3782_v2 = vld [vmem:[#allocation2 + $0x1e1] sm:$0xff] }
 0x143   : > { %7287 = vmatprep.mubr.msk.bf16.mxu1 %vm516_vm1, %v8426_v29  ;;  %v1399_v0 = vpop.f32.mrf.mxu0 }
 0x144   : > { %v1565_v8 = vpop.f32.mrf.mxu1  ;;  %v1438_v45 = vadd.f32 %v1399_v0, %v8604_v57  ;;  %v8693_v60 = vadd.f32 %v7069_v61, %v1440_v5  ;;  %v8761_v61 = vld [vmem:[#allocation2 + $0x1f1] sm:$0xff] }
 0x145   : > { %v7052_v17 = vpop.f32.mrf.mxu0 }
 0x146   : > { %v7070_v27 = vpop.f32.mrf.mxu1  ;;  %v1441_v19 = vadd.f32 %v7052_v17, %v8607_v40  ;;  %v8699_v51 = vadd.f32 %v1565_v8, %v1438_v45  ;;  %v3794_v17 = vpack.c.bf16 %v8761_v61, %v3782_v2 }
 0x147   : > { %v1402_v9 = vpop.f32.mrf.mxu0 }
 0x148   : > { %v1568_v29 = vpop.f32.mrf.mxu1  ;;  %v1439_v13 = vadd.f32 %v1402_v9, %v8612_v41  ;;  %v8702_v34 = vadd.f32 %v7070_v27, %v1441_v19 }
 0x149   : > { %v7055_v57 = vpop.f32.mrf.mxu0  ;;  %7270 = vmatmul.mubr.msk.bf16.gmra.mxu0 %vm516_vm1, %v3298_v23 }
 0x14a   : > { %v7073_v22 = vpop.f32.mrf.mxu1  ;;  %7288 = vmatmul.mubr.msk.bf16.gmra.mxu1 %vm516_vm1, %v3464_v43  ;;  %v1444_v36 = vadd.f32 %v7055_v57, %v8617_v52  ;;  %v8707_v25 = vadd.f32 %v1568_v29, %v1439_v13  ;;  %7293 = vmatprep.mubr.msk.bf16.mxu0 %vm516_vm1, %v8287_v49  ;;  %v8725_v49 = vpack.c.bf16 %v8715_v32, %v8713_v42  ;;  %v8788_v13 = vld [vmem:[#allocation2 + $0x210] sm:$0xff] }
 0x14b   : > { %7311 = vmatprep.mubr.msk.bf16.mxu1 %vm516_vm1, %v8362_v24  ;;  %v1415_v40 = vpop.f32.mrf.mxu0 }
 0x14c   : > { %v1581_v41 = vpop.f32.mrf.mxu1  ;;  %v1442_v33 = vadd.f32 %v1415_v40, %v8620_v31  ;;  %v8718_v53 = vadd.f32 %v7073_v22, %v1444_v36  ;;  %v8797_v36 = vld [vmem:[#allocation2 + $0x211] sm:$0xff]  ;;  %v8799_v40 = vld [vmem:[#allocation2 + $0x220] sm:$0xff] }
 0x14d   : > { %v7056_v15 = vpop.f32.mrf.mxu0 }
 0x14e   : > { %v7074_v52 = vpop.f32.mrf.mxu1  ;;  %v1445_v38 = vadd.f32 %v7056_v15, %v8625_v4  ;;  %v8721_v16 = vadd.f32 %v1581_v41, %v1442_v33  ;;  %v8801_v33 = vld [vmem:[#allocation2 + $0x230] sm:$0xff]  ;;  %v8803_v15 = vld [vmem:[#allocation2 + $0x221] sm:$0xff] }
 0x14f   : > { %v1418_v24 = vpop.f32.mrf.mxu0 }
 0x150   : > { %v1584_v39 = vpop.f32.mrf.mxu1  ;;  %v1443_v14 = vadd.f32 %v1418_v24, %v8641_v12  ;;  %v8730_v31 = vadd.f32 %v7074_v52, %v1445_v38  ;;  %v8805_v52 = vld [vmem:[#allocation2 + $0x231] sm:$0xff] }
 0x151   : > { %v7079_v48 = vpop.f32.mrf.mxu0  ;;  %7294 = vmatmul.mubr.msk.bf16.vlgmr.msra.gmra.mxu0 %vm516_vm1, %v8306_v62  ;;  %v8753_v62 = vld [vmem:[#allocation2 + $0x1a0] sm:$0xff] }
 0x152   : > { %v7097_v4 = vpop.f32.mrf.mxu1  ;;  %7312 = vmatmul.mubr.msk.bf16.vlgmr.msra.gmra.mxu1 %vm516_vm1, %v8390_v59  ;;  %v8748_v12 = vadd.f32 %v1584_v39, %v1443_v14  ;;  %v1765_v30 = vadd.f32 %v7079_v48, %v8647_v20  ;;  %7328 = vmatpush3.bf16.msra.mxu0 %v3991_v63  ;;  %v8755_v59 = vld [vmem:[#allocation2 + $0x1b0] sm:$0xff] }
 0x153   : > { %7297 = vmatprep.mubr.msk.bf16.mxu0 %vm516_vm1, %v8725_v49  ;;  %v1700_v55 = vpop.f32.mrf.mxu0  ;;  %7315 = vmatprep.mubr.msk.bf16.mxu1 %vm516_vm1, %v8398_v44  ;;  %v8772_v44 = vpack.c.bf16 %v8755_v59, %v8753_v62 }
 0x154   : > { %v1866_v21 = vpop.f32.mrf.mxu1  ;;  %7346 = vmatpush3.bf16.msra.mxu1 %v4158_v50  ;;  %v1763_v20 = vadd.f32 %v1700_v55, %v8656_v56  ;;  %v8764_v5 = vadd.f32 %v7097_v4, %v1765_v30  ;;  %7541 = vmatprep.subr.msk.bf16.mxu0 %vm722_vm0, %v8741_v10  ;;  %v3628_v56 = vpack.c.bf16 %v8759_v47, %v3616_v3 }
 0x155   : > { %7542 = vmatprep.subr.msk.bf16.mxu1 %vm722_vm0, %v8746_v37  ;;  %v7080_v46 = vpop.f32.mrf.mxu0  ;;  %v8823_v4 = vpack.c.bf16 %v8801_v33, %v8799_v40 }
 0x156   : > { %v7098_v0 = vpop.f32.mrf.mxu1  ;;  %v1766_v8 = vadd.f32 %v7080_v46, %v8659_v58  ;;  %v8775_v45 = vadd.f32 %v1866_v21, %v1763_v20  ;;  %v8786_v58 = vld [vmem:[#allocation2 + $0x200] sm:$0xff]  ;;  %v8838_v46 = vld [vmem:[#allocation2 + $0x250] sm:$0xff] }
 0x157   : > { %v1703_v27 = vpop.f32.mrf.mxu0  ;;  %v8812_v63 = vpack.c.bf16 %v8788_v13, %v8786_v58  ;;  %10088 = vst [vmem:[#allocation4_spill] sm:$0xff] %v8823_v4  ;;  %v8836_v20 = vld [vmem:[#allocation2 + $0x240] sm:$0xff] }
 0x158   : > { %v1869_v23 = vpop.f32.mrf.mxu1  ;;  %v1764_v43 = vadd.f32 %v1703_v27, %v8664_v18  ;;  %v8780_v19 = vadd.f32 %v7098_v0, %v1766_v8  ;;  %v8795_v18 = vld [vmem:[#allocation2 + $0x201] sm:$0xff] }
 0x159   : > { %v7083_v9 = vpop.f32.mrf.mxu0  ;;  %7298 = vmatmul.mubr.msk.bf16.gmra.mxu0 %vm516_vm1, %v8772_v44  ;;  %v8816_v14 = vpack.c.bf16 %v8797_v36, %v8795_v18 }
 0x15a   : > { %v7101_v29 = vpop.f32.mrf.mxu1  ;;  %7316 = vmatmul.mubr.msk.bf16.gmra.mxu1 %vm516_vm1, %v8422_v28  ;;  %v1769_v57 = vadd.f32 %v7083_v9, %v8671_v11  ;;  %v8791_v22 = vadd.f32 %v1869_v23, %v1764_v43  ;;  %7301 = vmatprep.mubr.msk.bf16.mxu0 %vm516_vm1, %v3628_v56  ;;  %v8849_v56 = vld [vmem:[#allocation2 + $0x251] sm:$0xff] }
 0x15b   : > { %7319 = vmatprep.mubr.msk.bf16.mxu1 %vm516_vm1, %v3794_v17  ;;  %v1716_v41 = vpop.f32.mrf.mxu0  ;;  %10087 = vst [vmem:[#allocation3_spill] sm:$0xff] %v8816_v14  ;;  %v3940_v17 = vld [vmem:[#allocation2 + $0x142] sm:$0xff]  ;;  %v8851_v43 = vld [vmem:[#allocation2 + $0x152] sm:$0xff] }
 0x15c   : > { %v1882_v28 = vpop.f32.mrf.mxu1  ;;  %v1767_v11 = vadd.f32 %v1716_v41, %v8674_v26  ;;  %v8808_v38 = vadd.f32 %v7101_v29, %v1769_v57  ;;  %v8827_v26 = vpack.c.bf16 %v8805_v52, %v8803_v15  ;;  %v4107_v9 = vld [vmem:[#allocation2 + $0x150] sm:$0xff]  ;;  %v8853_v29 = vld [vmem:[#allocation2 + $0x160] sm:$0xff] }
 0x15d   : > { %v7084_v24 = vpop.f32.mrf.mxu0 }
 0x15e   : > { %v7102_v39 = vpop.f32.mrf.mxu1  ;;  %v1770_v50 = vadd.f32 %v7084_v24, %v8677_v35  ;;  %v8819_v48 = vadd.f32 %v1882_v28, %v1767_v11  ;;  %10089 = vst [vmem:[#allocation5_spill] sm:$0xff] %v8827_v26  ;;  %v8860_v11 = vpack.c.bf16 %v8838_v46, %v8836_v20 }
 0x15f   : > { %v1719_v30 = vpop.f32.mrf.mxu0 }
 0x160   : > { %v1885_v3 = vpop.f32.mrf.mxu1  ;;  %v1768_v55 = vadd.f32 %v1719_v30, %v8684_v7  ;;  %v8830_v21 = vadd.f32 %v7102_v39, %v1770_v50  ;;  %v8847_v7 = vld [vmem:[#allocation2 + $0x241] sm:$0xff]  ;;  %10090 = vst [vmem:[#allocation6_spill] sm:$0xff] %v8860_v11  ;;  %v3956_v30 = vpack.c.bf16 %v8851_v43, %v3940_v17 }
 0x161   : > { %v7087_v2 = vpop.f32.mrf.mxu0  ;;  %7302 = vmatmul.mubr.msk.bf16.gmra.mxu0 %vm516_vm1, %v8812_v63  ;;  %v8864_v24 = vpack.c.bf16 %v8849_v56, %v8847_v7  ;;  %v8882_v17 = vld [vmem:[#allocation2 + $0x162] sm:$0xff] }
 0x162   : > { %v7105_v35 = vpop.f32.mrf.mxu1  ;;  %7320 = vmatmul.mubr.msk.bf16.gmra.mxu1 %vm516_vm1, %v8816_v14  ;;  %v1773_v0 = vadd.f32 %v7087_v2, %v8693_v60  ;;  %v8841_v8 = vadd.f32 %v1885_v3, %v1768_v55  ;;  %7305 = vmatprep.mubr.msk.bf16.mxu0 %vm516_vm1, %v8823_v4 }
 0x163   : > { %7323 = vmatprep.mubr.msk.bf16.mxu1 %vm516_vm1, %v8827_v26  ;;  %v1732_v27 = vpop.f32.mrf.mxu0  ;;  %10091 = vst [vmem:[#allocation7_spill] sm:$0xff] %v8864_v24 }
 0x164   : > { %v1898_v23 = vpop.f32.mrf.mxu1  ;;  %v1771_v60 = vadd.f32 %v1732_v27, %v8699_v51  ;;  %v8856_v57 = vadd.f32 %v7105_v35, %v1773_v0  ;;  %v4123_v51 = vpack.c.bf16 %v8853_v29, %v4107_v9  ;;  %v8884_v9 = vld [vmem:[#allocation2 + $0x172] sm:$0xff] }
 0x165   : > { %v7088_v41 = vpop.f32.mrf.mxu0 }
 0x166   : > { %v7106_v28 = vpop.f32.mrf.mxu1  ;;  %v1774_v39 = vadd.f32 %v7088_v41, %v8702_v34  ;;  %v8867_v50 = vadd.f32 %v1898_v23, %v1771_v60 }
 0x167   : > { %v1735_v3 = vpop.f32.mrf.mxu0 }
 0x168   : > { %v1901_v55 = vpop.f32.mrf.mxu1  ;;  %v1772_v2 = vadd.f32 %v1735_v3, %v8707_v25  ;;  %v8872_v35 = vadd.f32 %v7106_v28, %v1774_v39  ;;  %v8887_v25 = vld [vmem:[#allocation2 + $0x170] sm:$0xff]  ;;  %v8889_v28 = vld [vmem:[#allocation2 + $0x182] sm:$0xff] }
 0x169   : > { %v7091_v0 = vpop.f32.mrf.mxu0  ;;  %7306 = vmatmul.mubr.msk.bf16.gmra.mxu0 %vm516_vm1, %v8860_v11  ;;  %v8891_v39 = vld [vmem:[#allocation2 + $0x192] sm:$0xff] }
 0x16a   : > { %v7109_v27 = vpop.f32.mrf.mxu1  ;;  %7324 = vmatmul.mubr.msk.bf16.gmra.mxu1 %vm516_vm1, %v8864_v24  ;;  %v1777_v34 = vadd.f32 %v7091_v0, %v8718_v53  ;;  %v8879_v23 = vadd.f32 %v1901_v55, %v1772_v2  ;;  %7329 = vmatprep.mubr.msk.bf16.mxu0 %vm516_vm1, %v3956_v30  ;;  %v8898_v2 = vpack.c.bf16 %v8884_v9, %v8882_v17 }
 0x16b   : > { %7347 = vmatprep.mubr.msk.bf16.mxu1 %vm516_vm1, %v4123_v51  ;;  %v1748_v60 = vpop.f32.mrf.mxu0  ;;  %v4124_v51 = vpack.c.bf16 %v8713_v42, %v8887_v25  ;;  %v8907_v11 = vpack.c.bf16 %v8891_v39, %v8889_v28  ;;  %v4490_v42 = vsel %vm722_vm0, %v8746_v37, 0 }
 0x16c   : > { %v1914_v41 = vpop.f32.mrf.mxu1  ;;  %v1775_v53 = vadd.f32 %v1748_v60, %v8721_v16  ;;  %v8894_v3 = vadd.f32 %v7109_v27, %v1777_v34  ;;  %10092 = vst [vmem:[#allocation8_spill] sm:$0xff] %v8898_v2  ;;  %v4324_v34 = vsel %vm722_vm0, %v8741_v10, 0  ;;  %v4125_v60 = vpack.c.bf16 %v8753_v62, %v8715_v32  ;;  %v8924_v10 = vld [vmem:[%s10055_s2 + $0x30] sm:$0x3]  ;;  %v8929_v32 = vld [vmem:[%s10055_s2 + $0x32] sm:$0x3] }
 0x16d   : > { %v7092_v55 = vpop.f32.mrf.mxu0  ;;  %10093 = vst [vmem:[#allocation9_spill] sm:$0xff] %v8907_v11  ;;  %v8936_v62 = vld [vmem:[#allocation2 + $0x1a2] sm:$0xff] }
 0x16e   : > { %v7110_v30 = vpop.f32.mrf.mxu1  ;;  %v1778_v0 = vadd.f32 %v7092_v55, %v8730_v31  ;;  %v8903_v24 = vadd.f32 %v1914_v41, %v1775_v53  ;;  %v8938_v53 = vld [vmem:[#allocation2 + $0x1b2] sm:$0xff] }
 0x16f   : > { %v1751_v16 = vpop.f32.mrf.mxu0 }
 0x170   : > { %v1917_v27 = vpop.f32.mrf.mxu1  ;;  %v1776_v26 = vadd.f32 %v1751_v16, %v8748_v12  ;;  %v8914_v4 = vadd.f32 %v7110_v30, %v1778_v0  ;;  %v8941_v0 = vld [vmem:[#allocation2 + $0x1f2] sm:$0xff] }
 0x171   : > { %v7115_v31 = vpop.f32.mrf.mxu0  ;;  %7330 = vmatmul.mubr.msk.bf16.vlgmr.msra.gmra.mxu0 %vm516_vm1, %v8898_v2 }
 0x172   : > { %v7133_v41 = vpop.f32.mrf.mxu1  ;;  %7348 = vmatmul.mubr.msk.bf16.vlgmr.msra.gmra.mxu1 %vm516_vm1, %v4124_v51  ;;  %v8931_v12 = vadd.f32 %v1917_v27, %v1776_v26  ;;  %v2097_v37 = vadd.f32 %v7115_v31, %v8764_v5  ;;  %7364 = vmatpush3.bf16.msra.mxu0 %v4324_v34  ;;  %v3948_v51 = vld [vmem:[#allocation2 + $0x1e2] sm:$0xff]  ;;  %v8952_v34 = vpack.c.bf16 %v8938_v53, %v8936_v62 }
 0x173   : > { %7333 = vmatprep.mubr.msk.bf16.mxu0 %vm516_vm1, %v8907_v11  ;;  %v2032_v55 = vpop.f32.mrf.mxu0  ;;  %7351 = vmatprep.mubr.msk.bf16.mxu1 %vm516_vm1, %v4125_v60  ;;  %v4126_v60 = vpack.c.bf16 %v8499_v1, %v8755_v59  ;;  %v3960_v31 = vpack.c.bf16 %v8941_v0, %v3948_v51  ;;  %v8977_v51 = vld [vmem:[#allocation2 + $0x222] sm:$0xff] }
 0x174   : > { %v2199_v30 = vpop.f32.mrf.mxu1  ;;  %7382 = vmatpush3.bf16.msra.mxu1 %v4490_v42  ;;  %v2095_v26 = vadd.f32 %v2032_v55, %v8775_v45  ;;  %v8944_v16 = vadd.f32 %v7133_v41, %v2097_v37  ;;  %7543 = vmatprep.subr.msk.bf16.mxu0 %vm722_vm0, %v8924_v10  ;;  %10094 = vst [vmem:[#allocation10_spill] sm:$0xff] %v8952_v34 }
 0x175   : > { %7544 = vmatprep.subr.msk.bf16.mxu1 %vm722_vm0, %v8929_v32  ;;  %v7116_v5 = vpop.f32.mrf.mxu0  ;;  %v4127_v41 = vpack.c.bf16 %v8786_v58, %v8759_v47  ;;  %v8972_v47 = vld [vmem:[#allocation2 + $0x202] sm:$0xff]  ;;  %v8974_v58 = vld [vmem:[#allocation2 + $0x212] sm:$0xff] }
 0x176   : > { %v7134_v27 = vpop.f32.mrf.mxu1  ;;  %v2098_v42 = vadd.f32 %v7116_v5, %v8780_v19  ;;  %v8957_v45 = vadd.f32 %v2199_v30, %v2095_v26  ;;  %v8979_v26 = vld [vmem:[#allocation2 + $0x232] sm:$0xff] }
 0x177   : > { %v2035_v37 = vpop.f32.mrf.mxu0 }
 0x178   : > { %v2202_v55 = vpop.f32.mrf.mxu1  ;;  %v2096_v11 = vadd.f32 %v2035_v37, %v8791_v22  ;;  %v8963_v2 = vadd.f32 %v7134_v27, %v2098_v42 }
 0x179   : > { %v7119_v14 = vpop.f32.mrf.mxu0  ;;  %7334 = vmatmul.mubr.msk.bf16.gmra.mxu0 %vm516_vm1, %v8952_v34 }
 0x17a   : > { %v7137_v1 = vpop.f32.mrf.mxu1  ;;  %7352 = vmatmul.mubr.msk.bf16.gmra.mxu1 %vm516_vm1, %v4126_v60  ;;  %v2101_v59 = vadd.f32 %v7119_v14, %v8808_v38  ;;  %v8969_v19 = vadd.f32 %v2202_v55, %v2096_v11  ;;  %7337 = vmatprep.mubr.msk.bf16.mxu0 %vm516_vm1, %v3960_v31  ;;  %v8986_v11 = vpack.c.bf16 %v8974_v58, %v8972_v47 }
 0x17b   : > { %7355 = vmatprep.mubr.msk.bf16.mxu1 %vm516_vm1, %v4127_v41  ;;  %v2048_v22 = vpop.f32.mrf.mxu0  ;;  %v4128_v60 = vpack.c.bf16 %v8799_v40, %v8788_v13  ;;  %v8995_v41 = vpack.c.bf16 %v8979_v26, %v8977_v51 }
 0x17c   : > { %v2215_v30 = vpop.f32.mrf.mxu1  ;;  %v2099_v5 = vadd.f32 %v2048_v22, %v8819_v48  ;;  %v8982_v27 = vadd.f32 %v7137_v1, %v2101_v59  ;;  %10095 = vst [vmem:[#allocation11_spill] sm:$0xff] %v8986_v11  ;;  %v4129_v48 = vpack.c.bf16 %v8836_v20, %v8801_v33  ;;  %v9010_v33 = vld [vmem:[#allocation2 + $0x242] sm:$0xff]  ;;  %v9012_v20 = vld [vmem:[#allocation2 + $0x252] sm:$0xff] }
 0x17d   : > { %v7120_v38 = vpop.f32.mrf.mxu0  ;;  %10096 = vst [vmem:[#allocation12_spill] sm:$0xff] %v8995_v41 }
 0x17e   : > { %v7138_v14 = vpop.f32.mrf.mxu1  ;;  %v2102_v42 = vadd.f32 %v7120_v38, %v8830_v21  ;;  %v8991_v31 = vadd.f32 %v2215_v30, %v2099_v5  ;;  %v4273_v38 = vld [vmem:[#allocation2 + $0x151] sm:$0xff] }
 0x17f   : > { %v2051_v37 = vpop.f32.mrf.mxu0 }
 0x180   : > { %v2218_v55 = vpop.f32.mrf.mxu1  ;;  %v2100_v1 = vadd.f32 %v2051_v37, %v8841_v8  ;;  %v9000_v59 = vadd.f32 %v7138_v14, %v2102_v42  ;;  %v9015_v8 = vld [vmem:[#allocation2 + $0x260] sm:$0xff] }
 0x181   : > { %v7123_v22 = vpop.f32.mrf.mxu0  ;;  %7338 = vmatmul.mubr.msk.bf16.gmra.mxu0 %vm516_vm1, %v8986_v11  ;;  %v9017_v14 = vld [vmem:[#allocation2 + $0x161] sm:$0xff] }
 0x182   : > { %v7141_v13 = vpop.f32.mrf.mxu1  ;;  %7356 = vmatmul.mubr.msk.bf16.gmra.mxu1 %vm516_vm1, %v4128_v60  ;;  %v2105_v40 = vadd.f32 %v7123_v22, %v8856_v57  ;;  %v9006_v21 = vadd.f32 %v2218_v55, %v2100_v1  ;;  %7341 = vmatprep.mubr.msk.bf16.mxu0 %vm516_vm1, %v8995_v41  ;;  %v9024_v55 = vpack.c.bf16 %v9012_v20, %v9010_v33 }
 0x183   : > { %7359 = vmatprep.mubr.msk.bf16.mxu1 %vm516_vm1, %v4129_v48  ;;  %v2064_v30 = vpop.f32.mrf.mxu0  ;;  %v4130_v48 = vpack.c.bf16 %v9015_v8, %v8838_v46  ;;  %v4289_v41 = vpack.c.bf16 %v9017_v14, %v4273_v38 }
 0x184   : > { %v2231_v5 = vpop.f32.mrf.mxu1  ;;  %v2103_v57 = vadd.f32 %v2064_v30, %v8867_v50  ;;  %v9020_v60 = vadd.f32 %v7141_v13, %v2105_v40  ;;  %10097 = vst [vmem:[#allocation13_spill] sm:$0xff] %v9024_v55  ;;  %v4455_v50 = vpack.c.bf16 %v8882_v17, %v8851_v43  ;;  %v9044_v43 = vld [vmem:[#allocation2 + $0x171] sm:$0xff]  ;;  %v9046_v17 = vld [vmem:[#allocation2 + $0x181] sm:$0xff] }
 0x185   : > { %v7124_v42 = vpop.f32.mrf.mxu0 }
 0x186   : > { %v7142_v37 = vpop.f32.mrf.mxu1  ;;  %v2106_v1 = vadd.f32 %v7124_v42, %v8872_v35  ;;  %v9029_v22 = vadd.f32 %v2231_v5, %v2103_v57  ;;  %v9049_v57 = vld [vmem:[#allocation2 + $0x191] sm:$0xff]  ;;  %v9051_v42 = vld [vmem:[#allocation2 + $0x1a1] sm:$0xff] }
 0x187   : > { %v2067_v13 = vpop.f32.mrf.mxu0 }
 0x188   : > { %v2234_v40 = vpop.f32.mrf.mxu1  ;;  %v2104_v30 = vadd.f32 %v2067_v13, %v8879_v23  ;;  %v9035_v11 = vadd.f32 %v7142_v37, %v2106_v1  ;;  %v4456_v1 = vpack.c.bf16 %v8889_v28, %v8884_v9 }
 0x189   : > { %v7127_v34 = vpop.f32.mrf.mxu0  ;;  %7342 = vmatmul.mubr.msk.bf16.gmra.mxu0 %vm516_vm1, %v9024_v55 }
 0x18a   : > { %v7145_v46 = vpop.f32.mrf.mxu1  ;;  %7360 = vmatmul.mubr.msk.bf16.gmra.mxu1 %vm516_vm1, %v4130_v48  ;;  %v2109_v35 = vadd.f32 %v7127_v34, %v8894_v3  ;;  %v9041_v5 = vadd.f32 %v2234_v40, %v2104_v30  ;;  %7365 = vmatprep.mubr.msk.bf16.mxu0 %vm516_vm1, %v4289_v41  ;;  %v4290_v41 = vpack.c.bf16 %v9046_v17, %v9044_v43 }
 0x18b   : > { %7383 = vmatprep.mubr.msk.bf16.mxu1 %vm516_vm1, %v4455_v50  ;;  %v2080_v23 = vpop.f32.mrf.mxu0  ;;  %v4291_v40 = vpack.c.bf16 %v9051_v42, %v9049_v57 }
 0x18c   : > { %v2247_v38 = vpop.f32.mrf.mxu1  ;;  %v2107_v37 = vadd.f32 %v2080_v23, %v8903_v24  ;;  %v9054_v48 = vadd.f32 %v7145_v46, %v2109_v35  ;;  %v4657_v24 = vsel %vm722_vm0, %v8924_v10, 0  ;;  %v4457_v46 = vpack.c.bf16 %v8936_v62, %v8891_v39  ;;  %v9079_v10 = vld [vmem:[%s10055_s2 + $0x34] sm:$0x3] }
 0x18d   : > { %v7128_v3 = vpop.f32.mrf.mxu0 }
 0x18e   : > { %v7146_v34 = vpop.f32.mrf.mxu1  ;;  %v2110_v50 = vadd.f32 %v7128_v3, %v8914_v4  ;;  %v9061_v13 = vadd.f32 %v2247_v38, %v2107_v37  ;;  %v4823_v4 = vsel %vm722_vm0, %v8929_v32, 0  ;;  %v9087_v32 = vld [vmem:[#allocation2 + $0x1c1] sm:$0xff] }
 0x18f   : > { %v2083_v30 = vpop.f32.mrf.mxu0 }
 0x190   : > { %v2250_v55 = vpop.f32.mrf.mxu1  ;;  %v2108_v35 = vadd.f32 %v2083_v30, %v8931_v12  ;;  %v9070_v23 = vadd.f32 %v7146_v34, %v2110_v50  ;;  %v9085_v12 = vld [vmem:[#allocation2 + $0x1b1] sm:$0xff]  ;;  %v4459_v30 = vpack.c.bf16 %v8972_v47, %v8941_v0 }
 0x191   : > { %v7151_v9 = vpop.f32.mrf.mxu0  ;;  %7366 = vmatmul.mubr.msk.bf16.vlgmr.msra.gmra.mxu0 %vm516_vm1, %v4290_v41  ;;  %v4292_v41 = vpack.c.bf16 %v9087_v32, %v9085_v12 }
 0x192   : > { %v7169_v28 = vpop.f32.mrf.mxu1  ;;  %7384 = vmatmul.mubr.msk.bf16.vlgmr.msra.gmra.mxu1 %vm516_vm1, %v4456_v1  ;;  %v9081_v38 = vadd.f32 %v2250_v55, %v2108_v35  ;;  %v2430_v39 = vadd.f32 %v7151_v9, %v8944_v16  ;;  %7400 = vmatpush3.bf16.msra.mxu0 %v4657_v24  ;;  %v4458_v1 = vpack.c.bf16 %v8593_v6, %v8938_v53 }
 0x193   : > { %7369 = vmatprep.mubr.msk.bf16.mxu0 %vm516_vm1, %v4291_v40  ;;  %v2365_v62 = vpop.f32.mrf.mxu0  ;;  %7387 = vmatprep.mubr.msk.bf16.mxu1 %vm516_vm1, %v4457_v46 }
 0x194   : > { %v2531_v37 = vpop.f32.mrf.mxu1  ;;  %7418 = vmatpush3.bf16.msra.mxu1 %v4823_v4  ;;  %v2428_v3 = vadd.f32 %v2365_v62, %v8957_v45  ;;  %v9091_v34 = vadd.f32 %v7169_v28, %v2430_v39  ;;  %7545 = vmatprep.subr.msk.bf16.mxu0 %vm722_vm0, %v9079_v10  ;;  %v4293_v45 = vpack.c.bf16 %v8795_v18, %v8761_v61 }
 0x195   : > { %v7152_v16 = vpop.f32.mrf.mxu0  ;;  %v4294_v39 = vpack.c.bf16 %v8803_v15, %v8797_v36 }
 0x196   : > { %v7170_v55 = vpop.f32.mrf.mxu1  ;;  %v2431_v50 = vadd.f32 %v7152_v16, %v8963_v2  ;;  %v9100_v40 = vadd.f32 %v2531_v37, %v2428_v3  ;;  %v4295_v3 = vpack.c.bf16 %v8847_v7, %v8805_v52  ;;  %v9139_v52 = vld [vmem:[#allocation2 + $0x261] sm:$0xff] }
 0x197   : > { %v2368_v24 = vpop.f32.mrf.mxu0  ;;  %v9142_v7 = vld [vmem:[#allocation2 + $0x262] sm:$0xff] }
 0x198   : > { %v2534_v46 = vpop.f32.mrf.mxu1  ;;  %v2429_v35 = vadd.f32 %v2368_v24, %v8969_v19  ;;  %v9107_v4 = vadd.f32 %v7170_v55, %v2431_v50 }
 0x199   : > { %v7155_v9 = vpop.f32.mrf.mxu0  ;;  %7370 = vmatmul.mubr.msk.bf16.gmra.mxu0 %vm516_vm1, %v4292_v41 }
 0x19a   : > { %v7173_v6 = vpop.f32.mrf.mxu1  ;;  %7388 = vmatmul.mubr.msk.bf16.gmra.mxu1 %vm516_vm1, %v4458_v1  ;;  %v2434_v2 = vadd.f32 %v7155_v9, %v8982_v27  ;;  %v9112_v53 = vadd.f32 %v2534_v46, %v2429_v35  ;;  %7373 = vmatprep.mubr.msk.bf16.mxu0 %vm516_vm1, %v4293_v45  ;;  %v4460_v27 = vpack.c.bf16 %v8977_v51, %v8974_v58 }
 0x19b   : > { %7391 = vmatprep.mubr.msk.bf16.mxu1 %vm516_vm1, %v4459_v30  ;;  %v2381_v61 = vpop.f32.mrf.mxu0  ;;  %v4462_v30 = vpack.c.bf16 %v9142_v7, %v9012_v20  ;;  %v4622_v35 = vpack.c.bf16 %v8887_v25, %v8853_v29 }
 0x19c   : > { %v2547_v18 = vpop.f32.mrf.mxu1  ;;  %v2432_v0 = vadd.f32 %v2381_v61, %v8991_v31  ;;  %v9117_v19 = vadd.f32 %v7173_v6, %v2434_v2  ;;  %v4461_v31 = vpack.c.bf16 %v9010_v33, %v8979_v26 }
 0x19d   : > { %v7156_v47 = vpop.f32.mrf.mxu0 }
 0x19e   : > { %v7174_v28 = vpop.f32.mrf.mxu1  ;;  %v2435_v62 = vadd.f32 %v7156_v47, %v9000_v59  ;;  %v9124_v37 = vadd.f32 %v2547_v18, %v2432_v0  ;;  %v4789_v47 = vpack.c.bf16 %v9049_v57, %v9046_v17 }
 0x19f   : > { %v2384_v16 = vpop.f32.mrf.mxu0 }
 0x1a0   : > { %v2550_v55 = vpop.f32.mrf.mxu1  ;;  %v2433_v41 = vadd.f32 %v2384_v16, %v9006_v21  ;;  %v9131_v1 = vadd.f32 %v7174_v28, %v2435_v62  ;;  %v4989_v62 = vsel %vm722_vm0, %v9079_v10, 0  ;;  %v4613_v10 = vld [vmem:[#allocation2 + $0x1d0] sm:$0xff] }
 0x1a1   : > { %v7159_v36 = vpop.f32.mrf.mxu0  ;;  %7374 = vmatmul.mubr.msk.bf16.gmra.mxu0 %vm516_vm1, %v4294_v39 }
 0x1a2   : > { %v7177_v15 = vpop.f32.mrf.mxu1  ;;  %7392 = vmatmul.mubr.msk.bf16.gmra.mxu1 %vm516_vm1, %v4460_v27  ;;  %v2438_v58 = vadd.f32 %v7159_v36, %v9020_v60  ;;  %v9136_v51 = vadd.f32 %v2550_v55, %v2433_v41  ;;  %7377 = vmatprep.mubr.msk.bf16.mxu0 %vm516_vm1, %v4295_v3  ;;  %v4296_v60 = vpack.c.bf16 %v9139_v52, %v8849_v56  ;;  %v10098_v55 = vmov 0.0  }
 0x1a3   : > { %7395 = vmatprep.mubr.msk.bf16.mxu1 %vm516_vm1, %v4461_v31  ;;  %v2397_v26 = vpop.f32.mrf.mxu0  ;;  %v4790_v3 = vpack.c.bf16 %v9085_v12, %v9051_v42  ;;  %v4612_v42 = vld [vmem:[#allocation2 + $0x1c0] sm:$0xff] }
 0x1a4   : > { %v2563_v59 = vpop.f32.mrf.mxu1  ;;  %v2436_v21 = vadd.f32 %v2397_v26, %v9029_v22  ;;  %v9145_v33 = vadd.f32 %v7177_v15, %v2438_v58  ;;  %v4788_v22 = vpack.c.bf16 %v9044_v43, %v9017_v14  ;;  %v4625_v58 = vpack.c.bf16 %v4613_v10, %v4612_v42 }
 0x1a5   : > { %v7160_v50 = vpop.f32.mrf.mxu0 }
 0x1a6   : > { %v7178_v45 = vpop.f32.mrf.mxu1  ;;  %v2439_v24 = vadd.f32 %v7160_v50, %v9035_v11  ;;  %v9152_v46 = vadd.f32 %v2563_v59, %v2436_v21 }
 0x1a7   : > { %v2400_v9 = vpop.f32.mrf.mxu0 }
 0x1a8   : > { %v2566_v6 = vpop.f32.mrf.mxu1  ;;  %v2437_v2 = vadd.f32 %v2400_v9, %v9041_v5  ;;  %v9159_v61 = vadd.f32 %v7178_v45, %v2439_v24 }
 0x1a9   : > { %v7163_v56 = vpop.f32.mrf.mxu0  ;;  %7378 = vmatmul.mubr.msk.bf16.gmra.mxu0 %vm516_vm1, %v4296_v60 }
 0x1aa   : > { %v7181_v20 = vpop.f32.mrf.mxu1  ;;  %7396 = vmatmul.mubr.msk.bf16.gmra.mxu1 %vm516_vm1, %v4462_v30  ;;  %v2442_v11 = vadd.f32 %v7163_v56, %v9054_v48  ;;  %v9164_v18 = vadd.f32 %v2566_v6, %v2437_v2  ;;  %7401 = vmatprep.mubr.msk.bf16.mxu0 %vm516_vm1, %v4622_v35 }
 0x1ab   : > { %7419 = vmatprep.mubr.msk.bf16.mxu1 %vm516_vm1, %v4788_v22  ;;  %v2413_v29 = vpop.f32.mrf.mxu0 }
 0x1ac   : > { %v2579_v25 = vpop.f32.mrf.mxu1  ;;  %v2440_v14 = vadd.f32 %v2413_v29, %v9061_v13  ;;  %v9169_v5 = vadd.f32 %v7181_v20, %v2442_v11  ;;  %v10100_v11 = vld [vmem:[#allocation4_spill] sm:$0xff]  ;;  %v10101_v29 = vld [vmem:[#allocation5_spill] sm:$0xff] }
 0x1ad   : > { %v7164_v43 = vpop.f32.mrf.mxu0 }
 0x1ae   : > { %v7182_v0 = vpop.f32.mrf.mxu1  ;;  %v2443_v28 = vadd.f32 %v7164_v43, %v9070_v23  ;;  %v9174_v48 = vadd.f32 %v2579_v25, %v2440_v14  ;;  %v10102_v25 = vld [vmem:[#allocation6_spill] sm:$0xff]  ;;  %v4621_v14 = vld [vmem:[#allocation2 + $0x270] sm:$0xff]  ;;  %v10103_v43 = vld [vmem:[#allocation7_spill] sm:$0xff] }
 0x1af   : > { %v2416_v39 = vpop.f32.mrf.mxu0 }
 0x1b0   : > { %v2582_v27 = vpop.f32.mrf.mxu1  ;;  %v2441_v13 = vadd.f32 %v2416_v39, %v9081_v38  ;;  %v9181_v31 = vadd.f32 %v7182_v0, %v2443_v28 }
 0x1b1   : > { %v7187_v16 = vpop.f32.mrf.mxu0  ;;  %7402 = vmatmul.mubr.msk.bf16.vlgmr.msra.gmra.mxu0 %vm516_vm1, %v8725_v49 }
 0x1b2   : > { %v7205_v17 = vpop.f32.mrf.mxu1  ;;  %7420 = vmatmul.mubr.msk.bf16.vlgmr.msra.gmra.mxu1 %vm516_vm1, %v4789_v47  ;;  %v9186_v57 = vadd.f32 %v2582_v27, %v2441_v13  ;;  %v2762_v23 = vadd.f32 %v7187_v16, %v9091_v34  ;;  %7436 = vmatpush3.bf16.msra.mxu0 %v4989_v62  ;;  %v4791_v34 = vpack.c.bf16 %v8688_v54, %v9087_v32  ;;  %v10099_v32 = vld [vmem:[#allocation3_spill] sm:$0xff] }
 0x1b3   : > { %7405 = vmatprep.mubr.msk.bf16.mxu0 %vm516_vm1, %v8772_v44  ;;  %v2697_v38 = vpop.f32.mrf.mxu0  ;;  %7423 = vmatprep.mubr.msk.bf16.mxu1 %vm516_vm1, %v4790_v3  ;;  %v4629_v3 = vpack.c.bf16 %v4621_v14, %v9015_v8 }
 0x1b4   : > { %v2863_v12 = vpop.f32.mrf.mxu1  ;;  %7471 = vmatprep.subr.bf16.mxu0 %v10098_v55  ;;  %v2760_v49 = vadd.f32 %v2697_v38, %v9100_v40  ;;  %v9194_v41 = vadd.f32 %v7205_v17, %v2762_v23 }
 0x1b5   : > { %v7188_v36 = vpop.f32.mrf.mxu0 }
 0x1b6   : > { %v7206_v15 = vpop.f32.mrf.mxu1  ;;  %v2763_v44 = vadd.f32 %v7188_v36, %v9107_v4  ;;  %v9199_v26 = vadd.f32 %v2863_v12, %v2760_v49 }
 0x1b7   : > { %v2700_v59 = vpop.f32.mrf.mxu0 }
 0x1b8   : > { %v9201_v21 = vpop.f32.mrf.mxu1  ;;  %v9204_v50 = vadd.f32 %v2700_v59, %v9112_v53  ;;  %v9206_v45 = vadd.f32 %v7206_v15, %v2763_v44 }
 0x1b9   : > { %v7191_v40 = vpop.f32.mrf.mxu0  ;;  %7406 = vmatmul.mubr.msk.bf16.gmra.mxu0 %vm516_vm1, %v4625_v58 }
 0x1ba   : > { %v7209_v60 = vpop.f32.mrf.mxu1  ;;  %7424 = vmatmul.mubr.msk.bf16.gmra.mxu1 %vm516_vm1, %v4791_v34  ;;  %v2766_v54 = vadd.f32 %v7191_v40, %v9117_v19  ;;  %7409 = vmatprep.mubr.msk.bf16.mxu0 %vm516_vm1, %v8812_v63 }
 0x1bb   : > { %7427 = vmatprep.mubr.msk.bf16.mxu1 %vm516_vm1, %v10099_v32  ;;  %v2713_v4 = vpop.f32.mrf.mxu0 }
 0x1bc   : > { %v2879_v30 = vpop.f32.mrf.mxu1  ;;  %v2764_v53 = vadd.f32 %v2713_v4, %v9124_v37  ;;  %v9216_v24 = vadd.f32 %v7209_v60, %v2766_v54  ;;  %v10105_v54 = vld [vmem:[#allocation9_spill] sm:$0xff]  ;;  %v10106_v4 = vld [vmem:[#allocation10_spill] sm:$0xff] }
 0x1bd   : > { %v7192_v35 = vpop.f32.mrf.mxu0 }
 0x1be   : > { %v7210_v22 = vpop.f32.mrf.mxu1  ;;  %v2767_v9 = vadd.f32 %v7192_v35, %v9131_v1  ;;  %v9219_v6 = vadd.f32 %v2879_v30, %v2764_v53  ;;  %v4945_v30 = vld [vmem:[#allocation2 + $0x1d2] sm:$0xff] }
 0x1bf   : > { %v2716_v2 = vpop.f32.mrf.mxu0 }
 0x1c0   : > { %v9221_v19 = vpop.f32.mrf.mxu1  ;;  %v9224_v63 = vadd.f32 %v2716_v2, %v9136_v51  ;;  %v9226_v56 = vadd.f32 %v7210_v22, %v2767_v9  ;;  %v4787_v51 = vld [vmem:[#allocation2 + $0x271] sm:$0xff] }
 0x1c1   : > { %v7195_v20 = vpop.f32.mrf.mxu0  ;;  %7410 = vmatmul.mubr.msk.bf16.gmra.mxu0 %vm516_vm1, %v10100_v11 }
 0x1c2   : > { %v7213_v37 = vpop.f32.mrf.mxu1  ;;  %7428 = vmatmul.mubr.msk.bf16.gmra.mxu1 %vm516_vm1, %v10101_v29  ;;  %v2770_v1 = vadd.f32 %v7195_v20, %v9145_v33  ;;  %7413 = vmatprep.mubr.msk.bf16.mxu0 %vm516_vm1, %v10102_v25  ;;  %v4795_v33 = vpack.c.bf16 %v4787_v51, %v9139_v52  ;;  %v10104_v52 = vld [vmem:[#allocation8_spill] sm:$0xff]  ;;  %v10107_v51 = vld [vmem:[#allocation11_spill] sm:$0xff] }
 0x1c3   : > { %7431 = vmatprep.mubr.msk.bf16.mxu1 %vm516_vm1, %v10103_v43  ;;  %v2729_v0 = vpop.f32.mrf.mxu0 }
 0x1c4   : > { %v2895_v47 = vpop.f32.mrf.mxu1  ;;  %v2768_v28 = vadd.f32 %v2729_v0, %v9152_v46  ;;  %v9238_v39 = vadd.f32 %v7213_v37, %v2770_v1 }
 0x1c5   : > { %v7196_v27 = vpop.f32.mrf.mxu0 }
 0x1c6   : > { %v7214_v62 = vpop.f32.mrf.mxu1  ;;  %v2771_v13 = vadd.f32 %v7196_v27, %v9159_v61  ;;  %v9243_v16 = vadd.f32 %v2895_v47, %v2768_v28 }
 0x1c7   : > { %v2732_v17 = vpop.f32.mrf.mxu0 }
 0x1c8   : > { %v9245_v23 = vpop.f32.mrf.mxu1  ;;  %v9248_v42 = vadd.f32 %v2732_v17, %v9164_v18  ;;  %v9250_v10 = vadd.f32 %v7214_v62, %v2771_v13 }
 0x1c9   : > { %v7199_v46 = vpop.f32.mrf.mxu0  ;;  %7414 = vmatmul.mubr.msk.bf16.gmra.mxu0 %vm516_vm1, %v4629_v3 }
 0x1ca   : > { %v7217_v38 = vpop.f32.mrf.mxu1  ;;  %7432 = vmatmul.mubr.msk.bf16.gmra.mxu1 %vm516_vm1, %v4795_v33  ;;  %v2774_v8 = vadd.f32 %v7199_v46, %v9169_v5  ;;  %7437 = vmatprep.mubr.msk.bf16.mxu0 %vm516_vm1, %v10104_v52  ;;  %v10108_v46 = vld [vmem:[#allocation12_spill] sm:$0xff]  ;;  %v4953_v52 = vld [vmem:[#allocation2 + $0x272] sm:$0xff] }
 0x1cb   : > { %v2745_v61 = vpop.f32.mrf.mxu0 }
 0x1cc   : > { %v2911_v12 = vpop.f32.mrf.mxu1  ;;  %v2772_v49 = vadd.f32 %v2745_v61, %v9174_v48  ;;  %v9258_v36 = vadd.f32 %v7217_v38, %v2774_v8  ;;  %v10109_v8 = vld [vmem:[#allocation13_spill] sm:$0xff] }
 0x1cd   : > { %v7200_v18 = vpop.f32.mrf.mxu0 }
 0x1ce   : > { %v7218_v15 = vpop.f32.mrf.mxu1  ;;  %v2775_v58 = vadd.f32 %v7200_v18, %v9181_v31  ;;  %v9261_v34 = vadd.f32 %v2911_v12, %v2772_v49  ;;  %v4944_v31 = vld [vmem:[#allocation2 + $0x1c2] sm:$0xff] }
 0x1cf   : > { %v2748_v44 = vpop.f32.mrf.mxu0  ;;  %v4957_v20 = vpack.c.bf16 %v4945_v30, %v4944_v31 }
 0x1d0   : > { %v9263_v59 = vpop.f32.mrf.mxu1  ;;  %v9266_v5 = vadd.f32 %v2748_v44, %v9186_v57  ;;  %v9268_v40 = vadd.f32 %v7218_v15, %v2775_v58  ;;  %v4961_v58 = vpack.c.bf16 %v4953_v52, %v9142_v7 }
 0x1d1   : > { %v7223_v60 = vpop.f32.mrf.mxu0  ;;  %7438 = vmatmul.mubr.msk.bf16.vlgmr.msra.gmra.mxu0 %vm516_vm1, %v10105_v54 }
 0x1d2   : > { %v7241_v48 = vpop.f32.mrf.mxu1  ;;  %v3094_v32 = vadd.f32 %v7223_v60, %v9194_v41  ;;  %7441 = vmatprep.mubr.msk.bf16.mxu0 %vm516_vm1, %v10106_v4 }
 0x1d3   : > { %v3029_v53 = vpop.f32.mrf.mxu0 }
 0x1d4   : > { %v3196_v35 = vpop.f32.mrf.mxu1  ;;  %v3092_v22 = vadd.f32 %v3029_v53, %v9199_v26  ;;  %v3261_v57 = vadd.f32 %v7241_v48, %v3094_v32 }
 0x1d5   : > { %v7224_v9 = vpop.f32.mrf.mxu0 }
 0x1d6   : > { %v7242_v2 = vpop.f32.mrf.mxu1  ;;  %v3095_v11 = vadd.f32 %v7224_v9, %v9206_v45  ;;  %v3259_v37 = vadd.f32 %v3196_v35, %v3092_v22 }
 0x1d7   : > { %v3032_v29 = vpop.f32.mrf.mxu0 }
 0x1d8   : > { %v3199_v1 = vpop.f32.mrf.mxu1  ;;  %v3262_v25 = vadd.f32 %v7242_v2, %v3095_v11  ;;  %v2927_v11 = vadd.f32 %v9201_v21, %v9204_v50  ;;  %v2931_v21 = vadd.f32 %v9221_v19, %v9224_v63 }
 0x1d9   : > { %v7227_v41 = vpop.f32.mrf.mxu0  ;;  %7442 = vmatmul.mubr.msk.bf16.gmra.mxu0 %vm516_vm1, %v4957_v20 }
 0x1da   : > { %v7245_v14 = vpop.f32.mrf.mxu1  ;;  %v3098_v43 = vadd.f32 %v7227_v41, %v9216_v24  ;;  %7445 = vmatprep.mubr.msk.bf16.mxu0 %vm516_vm1, %v10107_v51 }
 0x1db   : > { %v3045_v26 = vpop.f32.mrf.mxu0 }
 0x1dc   : > { %v3212_v0 = vpop.f32.mrf.mxu1  ;;  %v3096_v47 = vadd.f32 %v3045_v26, %v9219_v6  ;;  %v9282_v28 = vadd.f32 %v7245_v14, %v3098_v43 }
 0x1dd   : > { %v7228_v45 = vpop.f32.mrf.mxu0 }
 0x1de   : > { %v7246_v27 = vpop.f32.mrf.mxu1  ;;  %v3099_v62 = vadd.f32 %v7228_v45, %v9226_v56  ;;  %v9285_v3 = vadd.f32 %v3212_v0, %v3096_v47 }
 0x1df   : > { %v3048_v33 = vpop.f32.mrf.mxu0 }
 0x1e0   : > { %v9287_v13 = vpop.f32.mrf.mxu1  ;;  %v9289_v17 = vadd.f32 %v7246_v27, %v3099_v62 }
 0x1e1   : > { %v7231_v24 = vpop.f32.mrf.mxu0  ;;  %7446 = vmatmul.mubr.msk.bf16.gmra.mxu0 %vm516_vm1, %v10108_v46 }
 0x1e2   : > { %v7249_v38 = vpop.f32.mrf.mxu1  ;;  %v3102_v6 = vadd.f32 %v7231_v24, %v9238_v39  ;;  %7449 = vmatprep.mubr.msk.bf16.mxu0 %vm516_vm1, %v10109_v8  ;;  %v3097_v8 = vadd.f32 %v3048_v33, %v2931_v21 }
 0x1e3   : > { %v3061_v61 = vpop.f32.mrf.mxu0 }
 0x1e4   : > { %v3228_v56 = vpop.f32.mrf.mxu1  ;;  %v3100_v12 = vadd.f32 %v3061_v61, %v9243_v16  ;;  %v9297_v49 = vadd.f32 %v7249_v38, %v3102_v6  ;;  %v3264_v19 = vadd.f32 %v9287_v13, %v3097_v8  ;;  %v5174_v13 = vld [vmem:[%s10058_s5] sm:$0x3] }
 0x1e5   : > { %v7232_v18 = vpop.f32.mrf.mxu0  ;;  %7546 = vmatprep.subr.msk.bf16.mxu1 %vm722_vm0, %v5174_v13 }
 0x1e6   : > { %v7250_v15 = vpop.f32.mrf.mxu1  ;;  %v3103_v44 = vadd.f32 %v7232_v18, %v9250_v10  ;;  %v9301_v60 = vadd.f32 %v3228_v56, %v3100_v12 }
 0x1e7   : > { %v3064_v54 = vpop.f32.mrf.mxu0 }
 0x1e8   : > { %v9303_v39 = vpop.f32.mrf.mxu1  ;;  %v9305_v48 = vadd.f32 %v7250_v15, %v3103_v44 }
 0x1e9   : > { %v7235_v32 = vpop.f32.mrf.mxu0  ;;  %7450 = vmatmul.mubr.msk.bf16.gmra.mxu0 %vm516_vm1, %v4961_v58 }
 0x1ea   : > { %v7253_v4 = vpop.f32.mrf.mxu1  ;;  %v3106_v16 = vadd.f32 %v7235_v32, %v9258_v36 }
 0x1eb   : > { %v3077_v31 = vpop.f32.mrf.mxu0 }
 0x1ec   : > { %v3244_v30 = vpop.f32.mrf.mxu1  ;;  %v3104_v53 = vadd.f32 %v3077_v31, %v9261_v34  ;;  %v9310_v7 = vadd.f32 %v7253_v4, %v3106_v16  ;;  %v3093_v34 = vadd.f32 %v3032_v29, %v2927_v11 }
 0x1ed   : > { %v7236_v10 = vpop.f32.mrf.mxu0 }
 0x1ee   : > { %v7254_v35 = vpop.f32.mrf.mxu1  ;;  %v3107_v22 = vadd.f32 %v7236_v10, %v9268_v40  ;;  %v9313_v9 = vadd.f32 %v3244_v30, %v3104_v53  ;;  %v3260_v27 = vadd.f32 %v3199_v1, %v3093_v34  ;;  %v5200_v10 = vsel %vm722_vm0, %v5174_v13, 0 }
 0x1ef   : > { %v9315_v2 = vpop.f32.mrf.mxu0  ;;  %7454 = vmatpush3.bf16.msra.mxu1 %v5200_v10 }
 0x1f0   : > { %v9317_v20 = vpop.f32.mrf.mxu1  ;;  %v9321_v36 = vadd.f32 %v7254_v35, %v3107_v22  ;;  %7477 = vmatprep.subr.bf16.mxu1 %v10098_v55 }
 0x1f1   : > { %v7259_v41 = vpop.f32.mrf.mxu0 }
 0x1f2   : > { %v7277_v14 = vpop.f32.mrf.mxu1  ;;  %v3427_v43 = vadd.f32 %v7259_v41, %v3261_v57 }
 0x1f3   : > { %v3362_v51 = vpop.f32.mrf.mxu0 }
 0x1f4   : > { %v3528_v26 = vpop.f32.mrf.mxu1  ;;  %v3425_v0 = vadd.f32 %v3362_v51, %v3259_v37  ;;  %v9323_v47 = vadd.f32 %v7277_v14, %v3427_v43 }
 0x1f5   : > { %v7260_v40 = vpop.f32.mrf.mxu0 }
 0x1f6   : > { %v7278_v45 = vpop.f32.mrf.mxu1  ;;  %v3428_v62 = vadd.f32 %v7260_v40, %v3262_v25  ;;  %v9325_v24 = vadd.f32 %v3528_v26, %v3425_v0 }
 0x1f7   : > { %v3365_v46 = vpop.f32.mrf.mxu0 }
 0x1f8   : > { %v3531_v38 = vpop.f32.mrf.mxu1  ;;  %v3426_v50 = vadd.f32 %v3365_v46, %v3260_v27  ;;  %v9329_v6 = vadd.f32 %v7278_v45, %v3428_v62 }
 0x1f9   : > { %v7263_v57 = vpop.f32.mrf.mxu0 }
 0x1fa   : > { %v7281_v29 = vpop.f32.mrf.mxu1  ;;  %v3431_v37 = vadd.f32 %v7263_v57, %v9282_v28  ;;  %v9332_v52 = vadd.f32 %v3531_v38, %v3426_v50  ;;  %v2935_v28 = vadd.f32 %v9245_v23, %v9248_v42 }
 0x1fb   : > { %v3378_v61 = vpop.f32.mrf.mxu0 }
 0x1fc   : > { %v3544_v1 = vpop.f32.mrf.mxu1  ;;  %v3429_v25 = vadd.f32 %v3378_v61, %v9285_v3  ;;  %v9335_v56 = vadd.f32 %v7281_v29, %v3431_v37  ;;  %v3101_v16 = vadd.f32 %v3064_v54, %v2935_v28 }
 0x1fd   : > { %v7264_v12 = vpop.f32.mrf.mxu0 }
 0x1fe   : > { %v7282_v18 = vpop.f32.mrf.mxu1  ;;  %v3432_v63 = vadd.f32 %v7264_v12, %v9289_v17  ;;  %v9339_v15 = vadd.f32 %v3544_v1, %v3429_v25 }
 0x1ff   : > { %v3381_v58 = vpop.f32.mrf.mxu0 }
 0x200   : > { %v3547_v33 = vpop.f32.mrf.mxu1  ;;  %v3430_v44 = vadd.f32 %v3381_v58, %v3264_v19  ;;  %v9343_v32 = vadd.f32 %v7282_v18, %v3432_v63 }
 0x201   : > { %v7267_v4 = vpop.f32.mrf.mxu0 }
 0x202   : > { %v7285_v3 = vpop.f32.mrf.mxu1  ;;  %v3435_v31 = vadd.f32 %v7267_v4, %v9297_v49  ;;  %v9346_v30 = vadd.f32 %v3547_v33, %v3430_v44  ;;  %v3268_v49 = vadd.f32 %v9303_v39, %v3101_v16 }
 0x203   : > { %v3394_v17 = vpop.f32.mrf.mxu0 }
 0x204   : > { %v3560_v53 = vpop.f32.mrf.mxu1  ;;  %v3433_v23 = vadd.f32 %v3394_v17, %v9301_v60  ;;  %v9353_v42 = vadd.f32 %v7285_v3, %v3435_v31  ;;  %v2939_v60 = vadd.f32 %v9263_v59, %v9266_v5 }
 0x205   : > { %v7268_v35 = vpop.f32.mrf.mxu0 }
 0x206   : > { %v7286_v54 = vpop.f32.mrf.mxu1  ;;  %v3436_v22 = vadd.f32 %v7268_v35, %v9305_v48  ;;  %v9358_v11 = vadd.f32 %v3560_v53, %v3433_v23  ;;  %v3105_v0 = vadd.f32 %v9315_v2, %v2939_v60 }
 0x207   : > { %v3397_v41 = vpop.f32.mrf.mxu0 }
 0x208   : > { %v3563_v14 = vpop.f32.mrf.mxu1  ;;  %v3434_v34 = vadd.f32 %v3397_v41, %v3268_v49  ;;  %v3602_v43 = vadd.f32 %v7286_v54, %v3436_v22  ;;  %v3272_v21 = vadd.f32 %v9317_v20, %v3105_v0 }
 0x209   : > { %v7271_v51 = vpop.f32.mrf.mxu0 }
 0x20a   : > { %v7289_v26 = vpop.f32.mrf.mxu1  ;;  %v3439_v40 = vadd.f32 %v7271_v51, %v9310_v7  ;;  %v3600_v39 = vadd.f32 %v3563_v14, %v3434_v34 }
 0x20b   : > { %v3410_v45 = vpop.f32.mrf.mxu0 }
 0x20c   : > { %v3576_v48 = vpop.f32.mrf.mxu1  ;;  %v3437_v27 = vadd.f32 %v3410_v45, %v9313_v9  ;;  %v3605_v62 = vadd.f32 %v7289_v26, %v3439_v40 }
 0x20d   : > { %v7272_v46 = vpop.f32.mrf.mxu0 }
 0x20e   : > { %v7290_v38 = vpop.f32.mrf.mxu1  ;;  %v3440_v59 = vadd.f32 %v7272_v46, %v9321_v36  ;;  %v3603_v5 = vadd.f32 %v3576_v48, %v3437_v27 }
 0x20f   : > { %v3413_v50 = vpop.f32.mrf.mxu0 }
 0x210   : > { %v3579_v57 = vpop.f32.mrf.mxu1  ;;  %v3438_v29 = vadd.f32 %v3413_v50, %v3272_v21  ;;  %v3606_v8 = vadd.f32 %v7290_v38, %v3440_v59 }
 0x211   : > { %v7295_v2 = vpop.f32.mrf.mxu0 }
 0x212   : > { %v7313_v37 = vpop.f32.mrf.mxu1  ;;  %v3604_v7 = vadd.f32 %v3579_v57, %v3438_v29  ;;  %v3760_v61 = vadd.f32 %v7295_v2, %v9323_v47 }
 0x213   : > { %v3695_v1 = vpop.f32.mrf.mxu0 }
 0x214   : > { %v3861_v25 = vpop.f32.mrf.mxu1  ;;  %v3758_v9 = vadd.f32 %v3695_v1, %v9325_v24  ;;  %v3926_v12 = vadd.f32 %v7313_v37, %v3760_v61 }
 0x215   : > { %v7296_v18 = vpop.f32.mrf.mxu0 }
 0x216   : > { %v7314_v19 = vpop.f32.mrf.mxu1  ;;  %v3761_v20 = vadd.f32 %v7296_v18, %v9329_v6  ;;  %v3924_v36 = vadd.f32 %v3861_v25, %v3758_v9 }
 0x217   : > { %v3698_v63 = vpop.f32.mrf.mxu0 }
 0x218   : > { %v3864_v58 = vpop.f32.mrf.mxu1  ;;  %v3759_v33 = vadd.f32 %v3698_v63, %v9332_v52  ;;  %v3927_v28 = vadd.f32 %v7314_v19, %v3761_v20 }
 0x219   : > { %v7299_v44 = vpop.f32.mrf.mxu0 }
 0x21a   : > { %v7317_v4 = vpop.f32.mrf.mxu1  ;;  %v3764_v3 = vadd.f32 %v7299_v44, %v9335_v56  ;;  %v3925_v47 = vadd.f32 %v3864_v58, %v3759_v33 }
 0x21b   : > { %v3711_v16 = vpop.f32.mrf.mxu0 }
 0x21c   : > { %v3877_v31 = vpop.f32.mrf.mxu1  ;;  %v3762_v24 = vadd.f32 %v3711_v16, %v9339_v15  ;;  %v3930_v13 = vadd.f32 %v7317_v4, %v3764_v3 }
 0x21d   : > { %v7300_v17 = vpop.f32.mrf.mxu0 }
 0x21e   : > { %v7318_v53 = vpop.f32.mrf.mxu1  ;;  %v3765_v6 = vadd.f32 %v7300_v17, %v9343_v32  ;;  %v3928_v23 = vadd.f32 %v3877_v31, %v3762_v24 }
 0x21f   : > { %v3714_v10 = vpop.f32.mrf.mxu0 }
 0x220   : > { %v3880_v35 = vpop.f32.mrf.mxu1  ;;  %v3763_v52 = vadd.f32 %v3714_v10, %v9346_v30  ;;  %v3931_v54 = vadd.f32 %v7318_v53, %v3765_v6 }
 0x221   : > { %v7303_v49 = vpop.f32.mrf.mxu0 }
 0x222   : > { %v7321_v22 = vpop.f32.mrf.mxu1  ;;  %v3768_v56 = vadd.f32 %v7303_v49, %v9353_v42  ;;  %v3929_v41 = vadd.f32 %v3880_v35, %v3763_v52 }
 0x223   : > { %v3727_v14 = vpop.f32.mrf.mxu0 }
 0x224   : > { %v3893_v60 = vpop.f32.mrf.mxu1  ;;  %v3766_v15 = vadd.f32 %v3727_v14, %v9358_v11  ;;  %v3934_v34 = vadd.f32 %v7321_v22, %v3768_v56 }
 0x225   : > { %v7304_v51 = vpop.f32.mrf.mxu0 }
 0x226   : > { %v7322_v26 = vpop.f32.mrf.mxu1  ;;  %v3769_v0 = vadd.f32 %v7304_v51, %v3602_v43  ;;  %v3932_v32 = vadd.f32 %v3893_v60, %v3766_v15 }
 0x227   : > { %v3730_v40 = vpop.f32.mrf.mxu0 }
 0x228   : > { %v3896_v45 = vpop.f32.mrf.mxu1  ;;  %v3767_v48 = vadd.f32 %v3730_v40, %v3600_v39  ;;  %v3935_v27 = vadd.f32 %v7322_v26, %v3769_v0 }
 0x229   : > { %v7307_v30 = vpop.f32.mrf.mxu0 }
 0x22a   : > { %v7325_v46 = vpop.f32.mrf.mxu1  ;;  %v3772_v38 = vadd.f32 %v7307_v30, %v3605_v62  ;;  %v3933_v21 = vadd.f32 %v3896_v45, %v3767_v48 }
 0x22b   : > { %v3743_v59 = vpop.f32.mrf.mxu0 }
 0x22c   : > { %v3909_v42 = vpop.f32.mrf.mxu1  ;;  %v3770_v50 = vadd.f32 %v3743_v59, %v3603_v5  ;;  %v3938_v57 = vadd.f32 %v7325_v46, %v3772_v38 }
 0x22d   : > { %v7308_v29 = vpop.f32.mrf.mxu0 }
 0x22e   : > { %v7326_v2 = vpop.f32.mrf.mxu1  ;;  %v3773_v11 = vadd.f32 %v7308_v29, %v3606_v8  ;;  %v3936_v37 = vadd.f32 %v3909_v42, %v3770_v50 }
 0x22f   : > { %v3746_v61 = vpop.f32.mrf.mxu0 }
 0x230   : > { %v3912_v1 = vpop.f32.mrf.mxu1  ;;  %v3771_v43 = vadd.f32 %v3746_v61, %v3604_v7  ;;  %v3939_v25 = vadd.f32 %v7326_v2, %v3773_v11 }
 0x231   : > { %v7331_v9 = vpop.f32.mrf.mxu0 }
 0x232   : > { %v9378_v18 = vpop.f32.mrf.mxu1  ;;  %v3937_v39 = vadd.f32 %v3912_v1, %v3771_v43  ;;  %v9380_v19 = vadd.f32 %v7331_v9, %v3926_v12 }
 0x233   : > { %v4027_v62 = vpop.f32.mrf.mxu0 }
 0x234   : > { %v9382_v20 = vpop.f32.mrf.mxu1  ;;  %v9384_v63 = vadd.f32 %v4027_v62, %v3924_v36 }
 0x235   : > { %v7332_v5 = vpop.f32.mrf.mxu0 }
 0x236   : > { %v9386_v58 = vpop.f32.mrf.mxu1  ;;  %v9388_v8 = vadd.f32 %v7332_v5, %v3927_v28 }
 0x237   : > { %v4030_v33 = vpop.f32.mrf.mxu0 }
 0x238   : > { %v9390_v44 = vpop.f32.mrf.mxu1  ;;  %v9392_v7 = vadd.f32 %v4030_v33, %v3925_v47 }
 0x239   : > { %v7335_v4 = vpop.f32.mrf.mxu0 }
 0x23a   : > { %v9394_v3 = vpop.f32.mrf.mxu1  ;;  %v9396_v12 = vadd.f32 %v7335_v4, %v3930_v13 }
 0x23b   : > { %v4043_v16 = vpop.f32.mrf.mxu0 }
 0x23c   : > { %v9398_v31 = vpop.f32.mrf.mxu1  ;;  %v9400_v36 = vadd.f32 %v4043_v16, %v3928_v23 }
 0x23d   : > { %v7336_v24 = vpop.f32.mrf.mxu0 }
 0x23e   : > { %v9402_v17 = vpop.f32.mrf.mxu1  ;;  %v9404_v28 = vadd.f32 %v7336_v24, %v3931_v54 }
 0x23f   : > { %v4046_v53 = vpop.f32.mrf.mxu0 }
 0x240   : > { %v9406_v6 = vpop.f32.mrf.mxu1  ;;  %v9408_v47 = vadd.f32 %v4046_v53, %v3929_v41 }
 0x241   : > { %v7339_v10 = vpop.f32.mrf.mxu0 }
 0x242   : > { %v7357_v35 = vpop.f32.mrf.mxu1  ;;  %v4100_v52 = vadd.f32 %v7339_v10, %v3934_v34 }
 0x243   : > { %v4059_v13 = vpop.f32.mrf.mxu0 }
 0x244   : > { %v9410_v49 = vpop.f32.mrf.mxu1  ;;  %v9412_v22 = vadd.f32 %v4059_v13, %v3932_v32  ;;  %v4267_v23 = vadd.f32 %v7357_v35, %v4100_v52 }
 0x245   : > { %v7340_v56 = vpop.f32.mrf.mxu0 }
 0x246   : > { %v9414_v14 = vpop.f32.mrf.mxu1  ;;  %v9416_v60 = vadd.f32 %v7340_v56, %v3935_v27 }
 0x247   : > { %v4062_v54 = vpop.f32.mrf.mxu0 }
 0x248   : > { %v9418_v15 = vpop.f32.mrf.mxu1  ;;  %v9420_v51 = vadd.f32 %v4062_v54, %v3933_v21 }
 0x249   : > { %v7343_v41 = vpop.f32.mrf.mxu0 }
 0x24a   : > { %v7361_v26 = vpop.f32.mrf.mxu1  ;;  %v4104_v0 = vadd.f32 %v7343_v41, %v3938_v57 }
 0x24b   : > { %v4075_v34 = vpop.f32.mrf.mxu0 }
 0x24c   : > { %v9422_v40 = vpop.f32.mrf.mxu1  ;;  %v9424_v45 = vadd.f32 %v4075_v34, %v3936_v37  ;;  %v4271_v32 = vadd.f32 %v7361_v26, %v4104_v0 }
 0x24d   : > { %v7344_v48 = vpop.f32.mrf.mxu0 }
 0x24e   : > { %v9426_v30 = vpop.f32.mrf.mxu1  ;;  %v9428_v46 = vadd.f32 %v7344_v48, %v3939_v25 }
 0x24f   : > { %v4078_v27 = vpop.f32.mrf.mxu0 }
 0x250   : > { %v9430_v38 = vpop.f32.mrf.mxu1  ;;  %v9432_v59 = vadd.f32 %v4078_v27, %v3937_v39 }
 0x251   : > { %v7367_v21 = vpop.f32.mrf.mxu0 }
 0x252   : > { %v7385_v42 = vpop.f32.mrf.mxu1 }
 0x253   : > { %v4360_v50 = vpop.f32.mrf.mxu0 }
 0x254   : > { %v4526_v57 = vpop.f32.mrf.mxu1 }
 0x255   : > { %v7368_v29 = vpop.f32.mrf.mxu0 }
 0x256   : > { %v9434_v2 = vpop.f32.mrf.mxu1 }
 0x257   : > { %v4363_v11 = vpop.f32.mrf.mxu0 }
 0x258   : > { %v9436_v37 = vpop.f32.mrf.mxu1 }
 0x259   : > { %v9438_v61 = vpop.f32.mrf.mxu0 }
 0x25a   : > { %v9440_v1 = vpop.f32.mrf.mxu1 }
 0x25b   : > { %v9442_v43 = vpop.f32.mrf.mxu0 }
 0x25c   : > { %v9444_v25 = vpop.f32.mrf.mxu1 }
 0x25d   : > { %v9446_v9 = vpop.f32.mrf.mxu0 }
 0x25e   : > { %v9448_v39 = vpop.f32.mrf.mxu1 }
 0x25f   : > { %v9450_v62 = vpop.f32.mrf.mxu0 }
 0x260   : > { %v9452_v5 = vpop.f32.mrf.mxu1 }
 0x261   : > { %10110 = vst [vmem:[#allocation3_spill] sm:$0xff] %v9452_v5  ;;  %v7375_v33 = vpop.f32.mrf.mxu0 }
 0x262   : > { %v9454_v4 = vpop.f32.mrf.mxu1  ;;  %v9456_v16 = vadd.f32 %v7375_v33, %v4267_v23 }
 0x263   : > { %10111 = vst [vmem:[#allocation4_spill] sm:$0xff] %v9454_v4  ;;  %v9458_v24 = vpop.f32.mrf.mxu0  ;;  %v4259_v4 = vadd.f32 %v9378_v18, %v9380_v19 }
 0x264   : > { %10112 = vst [vmem:[#allocation5_spill] sm:$0xff] %v9456_v16  ;;  %10113 = vst [vmem:[#allocation6_spill] sm:$0xff] %v9458_v24  ;;  %v9460_v53 = vpop.f32.mrf.mxu1 }
 0x265   : > { %10114 = vst [vmem:[#allocation7_spill] sm:$0xff] %v9460_v53  ;;  %v9462_v10 = vpop.f32.mrf.mxu0  ;;  %v4425_v24 = vadd.f32 %v7367_v21, %v4259_v4 }
 0x266   : > { %10115 = vst [vmem:[#allocation8_spill] sm:$0xff] %v9462_v10  ;;  %v9464_v35 = vpop.f32.mrf.mxu1  ;;  %v4257_v10 = vadd.f32 %v9382_v20, %v9384_v63  ;;  %v4263_v20 = vadd.f32 %v9394_v3, %v9396_v12 }
 0x267   : > { %10116 = vst [vmem:[#allocation9_spill] sm:$0xff] %v9464_v35  ;;  %v9466_v52 = vpop.f32.mrf.mxu0  ;;  %v4591_v18 = vadd.f32 %v7385_v42, %v4425_v24 }
 0x268   : > { %10117 = vst [vmem:[#allocation10_spill] sm:$0xff] %v9466_v52  ;;  %v9468_v13 = vpop.f32.mrf.mxu1 }
 0x269   : > { %10118 = vst [vmem:[#allocation11_spill] sm:$0xff] %v9468_v13  ;;  %v7379_v56 = vpop.f32.mrf.mxu0 }
 0x26a   : > { %v9470_v54 = vpop.f32.mrf.mxu1  ;;  %v9472_v41 = vadd.f32 %v7379_v56, %v4271_v32 }
 0x26b   : > { %10119 = vst [vmem:[#allocation12_spill] sm:$0xff] %v9470_v54  ;;  %v9474_v26 = vpop.f32.mrf.mxu0 }
 0x26c   : > { %10120 = vst [vmem:[#allocation13_spill] sm:$0xff] %v9472_v41  ;;  %10121 = vst [vmem:[#allocation14_spill] sm:$0xff] %v9474_v26  ;;  %v9476_v23 = vpop.f32.mrf.mxu1 }
 0x26d   : > { %10122 = vst [vmem:[#allocation15_spill] sm:$0xff] %v9476_v23  ;;  %v9478_v0 = vpop.f32.mrf.mxu0 }
 0x26e   : > { %10123 = vst [vmem:[#allocation16_spill] sm:$0xff] %v9478_v0  ;;  %v9480_v34 = vpop.f32.mrf.mxu1 }
 0x26f   : > { %10124 = vst [vmem:[#allocation17_spill] sm:$0xff] %v9480_v34  ;;  %v9482_v48 = vpop.f32.mrf.mxu0 }
 0x270   : > { %10125 = vst [vmem:[#allocation18_spill] sm:$0xff] %v9482_v48  ;;  %v9484_v27 = vpop.f32.mrf.mxu1 }
 0x271   : > { %10126 = vst [vmem:[#allocation19_spill] sm:$0xff] %v9484_v27  ;;  %v7403_v33 = vpop.f32.mrf.mxu0 }
 0x272   : > { %v7421_v55 = vpop.f32.mrf.mxu1  ;;  %v4758_v4 = vadd.f32 %v7403_v33, %v4591_v18 }
 0x273   : > { %v4693_v13 = vpop.f32.mrf.mxu0 }
 0x274   : > { %v4859_v35 = vpop.f32.mrf.mxu1  ;;  %v4924_v12 = vadd.f32 %v7421_v55, %v4758_v4 }
 0x275   : > { %v7404_v52 = vpop.f32.mrf.mxu0 }
 0x276   : > { %v7422_v32 = vpop.f32.mrf.mxu1 }
 0x277   : > { %v4696_v54 = vpop.f32.mrf.mxu0 }
 0x278   : > { %v9486_v41 = vpop.f32.mrf.mxu1 }
 0x279   : > { %v7407_v56 = vpop.f32.mrf.mxu0 }
 0x27a   : > { %v9490_v0 = vpop.f32.mrf.mxu1 }
 0x27b   : > { %v4709_v26 = vpop.f32.mrf.mxu0  ;;  %10128 = vst [vmem:[#allocation21_spill] sm:$0xff] %v9490_v0 }
 0x27c   : > { %v9496_v27 = vpop.f32.mrf.mxu1 }
 0x27d   : > { %v9488_v23 = vpop.f32.mrf.mxu0  ;;  %10131 = vst [vmem:[#allocation24_spill] sm:$0xff] %v9496_v27 }
 0x27e   : > { %10127 = vst [vmem:[#allocation20_spill] sm:$0xff] %v9488_v23  ;;  %v9506_v23 = vpop.f32.mrf.mxu1 }
 0x27f   : > { %v9492_v34 = vpop.f32.mrf.mxu0 }
 0x280   : > { %10129 = vst [vmem:[#allocation22_spill] sm:$0xff] %v9492_v34  ;;  %v4423_v34 = vadd.f32 %v4360_v50, %v4257_v10 }
 0x281   : > { %v9494_v48 = vpop.f32.mrf.mxu0 }
 0x282   : > { %10130 = vst [vmem:[#allocation23_spill] sm:$0xff] %v9494_v48  ;;  %v4260_v48 = vadd.f32 %v9386_v58, %v9388_v8  ;;  %v4589_v63 = vadd.f32 %v4526_v57, %v4423_v34  ;;  %v4261_v58 = vadd.f32 %v9398_v31, %v9400_v36  ;;  %v4264_v31 = vadd.f32 %v9402_v17, %v9404_v28  ;;  %v10137_v18 = vld [vmem:[#allocation21_spill] sm:$0xff] }
 0x283   : > { %v9498_v53 = vpop.f32.mrf.mxu0  ;;  %v4262_v36 = vadd.f32 %v9406_v6, %v9408_v47  ;;  %v4268_v17 = vadd.f32 %v9414_v14, %v9416_v60  ;;  %v4269_v14 = vadd.f32 %v9422_v40, %v9424_v45  ;;  %v4272_v60 = vadd.f32 %v9426_v30, %v9428_v46  ;;  %v10134_v45 = vld [vmem:[#allocation3_spill] sm:$0xff]  ;;  %v10135_v30 = vld [vmem:[#allocation6_spill] sm:$0xff] }
 0x284   : > { %10132 = vst [vmem:[#allocation25_spill] sm:$0xff] %v9498_v53  ;;  %v4258_v53 = vadd.f32 %v9390_v44, %v9392_v7  ;;  %v4426_v19 = vadd.f32 %v7368_v29, %v4260_v48  ;;  %v4429_v44 = vadd.f32 %v9438_v61, %v4263_v20  ;;  %v4756_v7 = vadd.f32 %v4693_v13, %v4589_v63  ;;  %v9543_v61 = vld [vmem:[%s10056_s3] ss:$0 sm:$0xff]  ;;  %v10139_v63 = vld [vmem:[#allocation4_spill] sm:$0xff] }
 0x285   : > { %v9502_v16 = vpop.f32.mrf.mxu0  ;;  %v4427_v42 = vadd.f32 %v9442_v43, %v4261_v58  ;;  %v4430_v28 = vadd.f32 %v9446_v9, %v4264_v31  ;;  %v4428_v47 = vadd.f32 %v9450_v62, %v4262_v36  ;;  %v9563_v9 = vld [vmem:[%s10057_s4] ss:$0 sm:$0xff]  ;;  %v10140_v4 = vld [vmem:[#allocation20_spill] sm:$0xff] }
 0x286   : > { %10133 = vst [vmem:[#allocation26_spill] sm:$0xff] %v9502_v16  ;;  %v9516_v16 = vpop.f32.mrf.mxu1  ;;  %v4424_v21 = vadd.f32 %v4363_v11, %v4258_v53  ;;  %v4592_v50 = vadd.f32 %v9434_v2, %v4426_v19  ;;  %v4265_v2 = vadd.f32 %v9410_v49, %v9412_v22  ;;  %v4595_v43 = vadd.f32 %v9440_v1, %v4429_v44  ;;  %v10141_v58 = vld [vmem:[#allocation24_spill] sm:$0xff]  ;;  %v10143_v36 = vld [vmem:[#allocation7_spill] sm:$0xff] }
 0x287   : > { %v9508_v0 = vpop.f32.mrf.mxu0  ;;  %v4593_v6 = vadd.f32 %v9444_v25, %v4427_v42  ;;  %v4596_v40 = vadd.f32 %v9448_v39, %v4430_v28  ;;  %v4594_v48 = vadd.f32 %v10134_v45, %v4428_v47  ;;  %v10142_v44 = vld [vmem:[#allocation22_spill] sm:$0xff] }
 0x288   : > { %v9529_v29 = vpop.f32.mrf.mxu1  ;;  %v4590_v3 = vadd.f32 %v9436_v37, %v4424_v21  ;;  %v4759_v57 = vadd.f32 %v7404_v52, %v4592_v50  ;;  %v4922_v37 = vadd.f32 %v4859_v35, %v4756_v7  ;;  %v4762_v52 = vadd.f32 %v7407_v56, %v4595_v43 }
 0x289   : > { %v9512_v27 = vpop.f32.mrf.mxu0  ;;  %v4266_v35 = vadd.f32 %v9418_v15, %v9420_v51  ;;  %v4760_v25 = vadd.f32 %v4709_v26, %v4593_v6  ;;  %v4431_v46 = vadd.f32 %v10135_v30, %v4265_v2  ;;  %v10136_v26 = vld [vmem:[#allocation8_spill] sm:$0xff]  ;;  %v4763_v39 = vadd.f32 %v10140_v4, %v4596_v40 }
 0x28a   : > { %v4757_v55 = vadd.f32 %v4696_v54, %v4590_v3  ;;  %v9551_v49 = vpop.f32.mrf.mxu1  ;;  %v4925_v10 = vadd.f32 %v7422_v32, %v4759_v57  ;;  %v4270_v54 = vadd.f32 %v9430_v38, %v9432_v59  ;;  %v4434_v33 = vadd.f32 %v10136_v26, %v4268_v17 }
 0x28b   : > { %v9518_v5 = vpop.f32.mrf.mxu0  ;;  %v4928_v19 = vadd.f32 %v10137_v18, %v4762_v52  ;;  %v4926_v50 = vadd.f32 %v10141_v58, %v4760_v25  ;;  %v4761_v7 = vadd.f32 %v10142_v44, %v4594_v48  ;;  %v4597_v2 = vadd.f32 %v10143_v36, %v4431_v46  ;;  %v10147_v25 = vld [vmem:[#allocation25_spill] sm:$0xff]  ;;  %v10148_v48 = vld [vmem:[#allocation11_spill] sm:$0xff]  ;;  %v10149_v46 = vld [vmem:[#allocation14_spill] sm:$0xff] }
 0x28c   : > { %v4923_v34 = vadd.f32 %v9486_v41, %v4757_v55  ;;  %v7430_v32 = vpop.f32.mrf.mxu1  ;;  %v10138_v41 = vld [vmem:[#allocation5_spill] sm:$0xff]  ;;  %v4435_v26 = vadd.f32 %v10149_v46, %v4269_v14 }
 0x28d   : > { %v9524_v8 = vpop.f32.mrf.mxu0  ;;  %v4599_v21 = vadd.f32 %v10139_v63, %v10138_v41 }
 0x28e   : > { %v4894_v28 = vpop.f32.mrf.mxu1 }
 0x28f   : > { %v9531_v24 = vpop.f32.mrf.mxu0 }
 0x290   : > { %v7433_v18 = vpop.f32.mrf.mxu1 }
 0x291   : > { %v7439_v11 = vpop.f32.mrf.mxu0 }
 0x292   : > { %v5090_v53 = vadd.f32 %v7439_v11, %v4924_v12  ;;  %v10144_v11 = vld [vmem:[#allocation10_spill] sm:$0xff] }
 0x293   : > { %v5025_v22 = vpop.f32.mrf.mxu0  ;;  %v4432_v43 = vadd.f32 %v10144_v11, %v4266_v35 }
 0x294   : > { %v5113_v13 = vmul.f32 %v9543_v61, %v5090_v53  ;;  %v5088_v1 = vadd.f32 %v5025_v22, %v4922_v37  ;;  %v10145_v37 = vld [vmem:[#allocation9_spill] sm:$0xff]  ;;  %v10146_v53 = vld [vmem:[#allocation23_spill] sm:$0xff] }
 0x295   : > { %v7440_v62 = vpop.f32.mrf.mxu0  ;;  %v4600_v55 = vadd.f32 %v10145_v37, %v4434_v33  ;;  %v4766_v17 = vadd.f32 %v10146_v53, %v4599_v21  ;;  %v4598_v30 = vadd.f32 %v10148_v48, %v4432_v43  ;;  %v10150_v33 = vld [vmem:[#allocation26_spill] sm:$0xff]  ;;  %v10153_v21 = vld [vmem:[#allocation16_spill] sm:$0xff] }
 0x296   : > { %v5111_v15 = vmul.f32 %v9543_v61, %v5088_v1  ;;  %v5091_v51 = vadd.f32 %v7440_v62, %v4925_v10  ;;  %v5136_v20 = vadd.f32 %v9563_v9, %v5113_v13  ;;  %v4929_v13 = vadd.f32 %v9506_v23, %v4763_v39  ;;  %v10154_v39 = vld [vmem:[#allocation18_spill] sm:$0xff] }
 0x297   : > { %v5028_v56 = vpop.f32.mrf.mxu0  ;;  %v4927_v1 = vadd.f32 %v9516_v16, %v4761_v7  ;;  %v4764_v62 = vadd.f32 %v10147_v25, %v4597_v2  ;;  %v10151_v16 = vld [vmem:[#allocation13_spill] sm:$0xff]  ;;  %v4438_v4 = vadd.f32 %v10153_v21, %v4272_v60  ;;  %v4436_v58 = vadd.f32 %v10154_v39, %v4270_v54  ;;  %v4907_v54 = vpop.f32.mrf.mxu1 }
 0x298   : > { %v5114_v38 = vmul.f32 %v9543_v61, %v5091_v51  ;;  %v5089_v59 = vadd.f32 %v5028_v56, %v4923_v34  ;;  %v5134_v3 = vadd.f32 %v9563_v9, %v5111_v15  ;;  %v5152_v47 = vmax.f32 %v5136_v20, 0.0  ;;  %v10152_v20 = vld [vmem:[#allocation12_spill] sm:$0xff] }
 0x299   : > { %v7443_v42 = vpop.f32.mrf.mxu0  ;;  %v4767_v56 = vadd.f32 %v10150_v33, %v4600_v55  ;;  %v4930_v7 = vadd.f32 %v9551_v49, %v4764_v62  ;;  %v4765_v60 = vadd.f32 %v9508_v0, %v4598_v30  ;;  %v10156_v55 = vld [vmem:[#allocation17_spill] sm:$0xff]  ;;  %v7434_v25 = vpop.f32.mrf.mxu1 }
 0x29a   : > { %v5137_v12 = vadd.f32 %v9563_v9, %v5114_v38  ;;  %v5112_v57 = vmul.f32 %v9543_v61, %v5089_v59  ;;  %v5094_v31 = vadd.f32 %v7443_v42, %v4928_v19  ;;  %v5150_v15 = vmax.f32 %v5134_v3, 0.0 }
 0x29b   : > { %v5041_v6 = vpop.f32.mrf.mxu0  ;;  %v4603_v38 = vadd.f32 %v10152_v20, %v10151_v16  ;;  %v4932_v59 = vadd.f32 %v9529_v29, %v4766_v17  ;;  %v10155_v29 = vld [vmem:[#allocation15_spill] sm:$0xff]  ;;  %v4604_v53 = vadd.f32 %v10156_v55, %v4438_v4  ;;  %v4910_v33 = vpop.f32.mrf.mxu1 }
 0x29c   : > { %v5153_v22 = vmax.f32 %v5137_v12, 0.0  ;;  %v5135_v10 = vadd.f32 %v9563_v9, %v5112_v57  ;;  %v5092_v52 = vadd.f32 %v5041_v6, %v4926_v50  ;;  %v5117_v34 = vmul.f32 %v9543_v61, %v5094_v31  ;;  %v10157_v17 = vld [vmem:[#allocation19_spill] sm:$0xff] }
 0x29d   : > { %v7444_v35 = vpop.f32.mrf.mxu0  ;;  %v4601_v57 = vadd.f32 %v10155_v29, %v4435_v26  ;;  %v4933_v31 = vadd.f32 %v7430_v32, %v4767_v56  ;;  %v4770_v49 = vadd.f32 %v9512_v27, %v4603_v38  ;;  %v4602_v6 = vadd.f32 %v10157_v17, %v4436_v58  ;;  %v9664_v55 = vld [vmem:[%s10059_s6] ss:$0 sm:$0xff] }
 0x29e   : > { %v5167_v51 = vpack.c.bf16 %v5153_v22, %v5152_v47  ;;  %v5151_v40 = vmax.f32 %v5135_v10, 0.0  ;;  %v5115_v45 = vmul.f32 %v9543_v61, %v5092_v52  ;;  %v5095_v23 = vadd.f32 %v7444_v35, %v4929_v13  ;;  %v9669_v17 = vld [vmem:[%s10060_s7] ss:$0 sm:$0xff] }
 0x29f   : > { %v5044_v19 = vpop.f32.mrf.mxu0  ;;  %v5140_v50 = vadd.f32 %v9563_v9, %v5117_v34  ;;  %v4768_v22 = vadd.f32 %v9518_v5, %v4601_v57  ;;  %v4771_v27 = vadd.f32 %v9524_v8, %v4604_v53  ;;  %v4769_v46 = vadd.f32 %v9531_v24, %v4602_v6 }
 0x2a0   : > { %v5166_v41 = vpack.c.bf16 %v5151_v40, %v5150_v15  ;;  %v5093_v63 = vadd.f32 %v5044_v19, %v4927_v1  ;;  %v5118_v14 = vmul.f32 %v9543_v61, %v5095_v23  ;;  %v5138_v42 = vadd.f32 %v9563_v9, %v5115_v45 }
 0x2a1   : > { %v7447_v44 = vpop.f32.mrf.mxu0  ;;  %v5156_v47 = vmax.f32 %v5140_v50, 0.0  ;;  %v4931_v1 = vadd.f32 %v4894_v28, %v4765_v60  ;;  %v4936_v15 = vadd.f32 %v7433_v18, %v4770_v49  ;;  %v4934_v5 = vadd.f32 %v4907_v54, %v4768_v22 }
 0x2a2   : > { %v5116_v3 = vmul.f32 %v9543_v61, %v5093_v63  ;;  %v5098_v12 = vadd.f32 %v7447_v44, %v4932_v59  ;;  %7455 = vmatprep.mubr.msk.bf16.mxu1 %vm516_vm1, %v5166_v41  ;;  %v5141_v36 = vadd.f32 %v9563_v9, %v5118_v14  ;;  %v5154_v10 = vmax.f32 %v5138_v42, 0.0 }
 0x2a3   : > { %v5057_v2 = vpop.f32.mrf.mxu0  ;;  %7456 = vmatmul.mubr.msk.bf16.vlgmr.msra.gmra.mxu1 %vm516_vm1, %v5167_v51  ;;  %v4937_v8 = vadd.f32 %v7434_v25, %v4771_v27  ;;  %v4935_v41 = vadd.f32 %v4910_v33, %v4769_v46 }
 0x2a4   : > { %v5139_v11 = vadd.f32 %v9563_v9, %v5116_v3  ;;  %v5121_v43 = vmul.f32 %v9543_v61, %v5098_v12  ;;  %v5096_v37 = vadd.f32 %v5057_v2, %v4930_v7  ;;  %v5157_v0 = vmax.f32 %v5141_v36, 0.0 }
 0x2a5   : > { %v7448_v32 = vpop.f32.mrf.mxu0 }
 0x2a6   : > { %v5155_v52 = vmax.f32 %v5139_v11, 0.0  ;;  %v5099_v13 = vadd.f32 %v7448_v32, %v4933_v31  ;;  %v5169_v62 = vpack.c.bf16 %v5157_v0, %v5156_v47  ;;  %v5119_v34 = vmul.f32 %v9543_v61, %v5096_v37 }
 0x2a7   : > { %v5060_v35 = vpop.f32.mrf.mxu0  ;;  %v5144_v40 = vadd.f32 %v9563_v9, %v5121_v43  ;;  %v6616_v43 = vld [vmem:[%s10061_s8 + $0x2] sm:$0x3] }
 0x2a8   : > { %v5168_v51 = vpack.c.bf16 %v5155_v52, %v5154_v10  ;;  %v5122_v45 = vmul.f32 %v9543_v61, %v5099_v13  ;;  %v5097_v48 = vadd.f32 %v5060_v35, %v4931_v1  ;;  %v5142_v56 = vadd.f32 %v9563_v9, %v5119_v34 }
 0x2a9   : > { %v7451_v30 = vpop.f32.mrf.mxu0  ;;  %v5160_v19 = vmax.f32 %v5144_v40, 0.0  ;;  %v9657_v37 = vsel %vm722_vm0, %v6616_v43, 0 }
 0x2aa   : > { %v5145_v28 = vadd.f32 %v9563_v9, %v5122_v45  ;;  %v5102_v26 = vadd.f32 %v7451_v30, %v4936_v15  ;;  %7459 = vmatprep.mubr.msk.bf16.mxu1 %vm516_vm1, %v5168_v51  ;;  %v5120_v18 = vmul.f32 %v9543_v61, %v5097_v48  ;;  %v5158_v39 = vmax.f32 %v5142_v56, 0.0  ;;  %7472 = vmatpush3.bf16.msra.mxu0 %v9657_v37 }
 0x2ab   : > { %v5073_v23 = vpop.f32.mrf.mxu0  ;;  %7460 = vmatmul.mubr.msk.bf16.gmra.mxu1 %vm516_vm1, %v5169_v62 }
 0x2ac   : > { %v5161_v16 = vmax.f32 %v5145_v28, 0.0  ;;  %v5125_v20 = vmul.f32 %v9543_v61, %v5102_v26  ;;  %v5100_v38 = vadd.f32 %v5073_v23, %v4934_v5  ;;  %v5143_v24 = vadd.f32 %v9563_v9, %v5120_v18 }
 0x2ad   : > { %v7452_v59 = vpop.f32.mrf.mxu0 }
 0x2ae   : > { %v5171_v63 = vpack.c.bf16 %v5161_v16, %v5160_v19  ;;  %v5123_v21 = vmul.f32 %v9543_v61, %v5100_v38  ;;  %v5103_v4 = vadd.f32 %v7452_v59, %v4937_v8  ;;  %v5159_v58 = vmax.f32 %v5143_v24, 0.0 }
 0x2af   : > { %v5076_v50 = vpop.f32.mrf.mxu0  ;;  %v5148_v14 = vadd.f32 %v9563_v9, %v5125_v20 }
 0x2b0   : > { %v5126_v44 = vmul.f32 %v9543_v61, %v5103_v4  ;;  %v5101_v7 = vadd.f32 %v5076_v50, %v4935_v41  ;;  %v5170_v42 = vpack.c.bf16 %v5159_v58, %v5158_v39  ;;  %v5146_v3 = vadd.f32 %v9563_v9, %v5123_v21 }
 0x2b1   : > { %v5164_v57 = vmax.f32 %v5148_v14, 0.0 }
 0x2b2   : > { %v5149_v12 = vadd.f32 %v9563_v9, %v5126_v44  ;;  %v5124_v29 = vmul.f32 %v9543_v61, %v5101_v7  ;;  %7463 = vmatprep.mubr.msk.bf16.mxu1 %vm516_vm1, %v5170_v42  ;;  %v5162_v54 = vmax.f32 %v5146_v3, 0.0  ;;  %v5442_v61 = vld [vmem:[%s10061_s8] sm:$0x3] }
 0x2b3   : > { %7464 = vmatmul.mubr.msk.bf16.gmra.mxu1 %vm516_vm1, %v5171_v63  ;;  %v9645_v11 = vsel %vm722_vm0, %v5442_v61, 0 }
 0x2b4   : > { %v5165_v60 = vmax.f32 %v5149_v12, 0.0  ;;  %v5147_v31 = vadd.f32 %v9563_v9, %v5124_v29  ;;  %7478 = vmatpush3.bf16.msra.mxu1 %v9645_v11  ;;  %v10158_v9 = vmov 0.0  }
 0x2b5   : > { %7489 = vmatprep.subr.bf16.mxu1 %v10158_v9  ;;  %7473 = vmatprep.mubr.msk.bf16.mxu0 %vm7583_vm3, %v10158_v9 }
 0x2b6   : > { %v5173_v36 = vpack.c.bf16 %v5165_v60, %v5164_v57  ;;  %v5163_v2 = vmax.f32 %v5147_v31, 0.0  ;;  %7483 = vmatprep.subr.bf16.mxu0 %v10158_v9 }
 0x2b8   : > { %v5172_v49 = vpack.c.bf16 %v5163_v2, %v5162_v54 }
 0x2ba   : > { %7467 = vmatprep.mubr.msk.bf16.mxu1 %vm516_vm1, %v5172_v49 }
 0x2bb   : > { %7468 = vmatmul.mubr.msk.bf16.gmra.mxu1 %vm516_vm1, %v5173_v36 }
 0x2bc   : > { %7479 = vmatprep.mubr.msk.bf16.mxu1 %vm7583_vm3, %v10158_v9 }
 0x363   : > { %v7457_v53 = vpop.f32.mrf.mxu1 }
 0x364   : > { %v5308_v6 = vmul.f32 %v7457_v53, %v9664_v55 }
 0x365   : > { %v5236_v47 = vpop.f32.mrf.mxu1 }
 0x366   : > { %v9673_v0 = vadd.f32 %v9669_v17, %v5308_v6  ;;  %v5306_v32 = vmul.f32 %v9664_v55, %v5236_v47 }
 0x367   : > { %v7458_v22 = vpop.f32.mrf.mxu1 }
 0x368   : > { %v5347_v10 = vmax.f32 %v9673_v0, 0.0  ;;  %v9678_v52 = vadd.f32 %v9669_v17, %v5306_v32  ;;  %v5309_v13 = vmul.f32 %v7458_v22, %v9664_v55 }
 0x369   : > { %v5239_v1 = vpop.f32.mrf.mxu1 }
 0x36a   : > { %v9684_v27 = vsel %vm516_vm1, %v5347_v10, 0.0  ;;  %v5345_v25 = vmax.f32 %v9678_v52, 0.0  ;;  %v9688_v62 = vadd.f32 %v9669_v17, %v5309_v13  ;;  %v5307_v34 = vmul.f32 %v9664_v55, %v5239_v1 }
 0x36b   : > { %v5376_v35 = vrot.slane %v9684_v27, 4  ;;  %v7461_v15 = vpop.f32.mrf.mxu1 }
 0x36c   : > { %v5361_v51 = vsel %vm516_vm1, %v5345_v25, 0.0  ;;  %v5348_v40 = vmax.f32 %v9688_v62, 0.0  ;;  %v9697_v45 = vadd.f32 %v9669_v17, %v5307_v34  ;;  %v5312_v48 = vmul.f32 %v7461_v15, %v9664_v55 }
 0x36d   : > { %v5377_v30 = vadd.f32 %v5376_v35, %v9684_v27  ;;  %v5362_v5 = vrot.slane %v5361_v51, 4  ;;  %v5252_v46 = vpop.f32.mrf.mxu1 }
 0x36e   : > { %v9704_v28 = vsel %vm516_vm1, %v5348_v40, 0.0  ;;  %v5346_v26 = vmax.f32 %v9697_v45, 0.0  ;;  %v9708_v8 = vadd.f32 %v9669_v17, %v5312_v48  ;;  %v5310_v33 = vmul.f32 %v9664_v55, %v5252_v46 }
 0x36f   : > { %v5378_v56 = vrot.slane %v5377_v30, 2  ;;  %v5363_v18 = vadd.f32 %v5362_v5, %v5361_v51  ;;  %v5383_v23 = vrot.slane %v9704_v28, 4  ;;  %v7462_v19 = vpop.f32.mrf.mxu1 }
 0x370   : > { %v5368_v16 = vsel %vm516_vm1, %v5346_v26, 0.0  ;;  %v5351_v20 = vmax.f32 %v9708_v8, 0.0  ;;  %v9717_v38 = vadd.f32 %v9669_v17, %v5310_v33  ;;  %v5313_v24 = vmul.f32 %v7462_v19, %v9664_v55 }
 0x371   : > { %v5379_v59 = vadd.f32 %v5378_v56, %v5377_v30  ;;  %v5364_v41 = vrot.slane %v5363_v18, 2  ;;  %v5384_v63 = vadd.f32 %v5383_v23, %v9704_v28  ;;  %v5369_v21 = vrot.slane %v5368_v16, 4  ;;  %v5255_v4 = vpop.f32.mrf.mxu1 }
 0x372   : > { %v9724_v39 = vsel %vm516_vm1, %v5351_v20, 0.0  ;;  %v5349_v58 = vmax.f32 %v9717_v38, 0.0  ;;  %v9728_v50 = vadd.f32 %v9669_v17, %v5313_v24  ;;  %v5426_v47 = vadd.f32 %v5368_v16, %v5361_v51  ;;  %v6013_v38 = vld [vmem:[%s9938_s24 + $0x18] sm:$0xff] }
 0x373   : > { %v5365_v14 = vadd.f32 %v5364_v41, %v5363_v18  ;;  %v5385_v44 = vrot.slane %v5384_v63, 2  ;;  %v5370_v7 = vadd.f32 %v5369_v21, %v5368_v16  ;;  %v5404_v42 = vrot.slane %v9724_v39, 4  ;;  %v7465_v29 = vpop.f32.mrf.mxu1 }
 0x374   : > { %v5389_v3 = vsel %vm516_vm1, %v5349_v58, 0.0  ;;  %v5352_v12 = vmax.f32 %v9728_v50, 0.0  ;;  %v5380_v57 = vrot.slane %v5379_v59, 1  ;;  %v5311_v46 = vmul.f32 %v9664_v55, %v5255_v4 }
 0x375   : > { %v5366_v60 = vrot.slane %v5365_v14, 1  ;;  %v5386_v31 = vadd.f32 %v5385_v44, %v5384_v63  ;;  %v5371_v54 = vrot.slane %v5370_v7, 2  ;;  %v5405_v36 = vadd.f32 %v5404_v42, %v9724_v39  ;;  %v5268_v6 = vpop.f32.mrf.mxu1 }
 0x376   : > { %v5390_v2 = vrot.slane %v5389_v3, 4  ;;  %v9739_v49 = vsel %vm516_vm1, %v5352_v12, 0.0  ;;  %v5381_v1 = vadd.f32 %v5380_v57, %v5379_v59  ;;  %v5427_v18 = vadd.f32 %v5426_v47, %v9684_v27 }
 0x377   : > { %v5367_v61 = vadd.f32 %v5366_v60, %v5365_v14  ;;  %v5387_v43 = vrot.slane %v5386_v31, 1  ;;  %v5372_v53 = vadd.f32 %v5371_v54, %v5370_v7  ;;  %v5406_v32 = vrot.slane %v5405_v36, 2  ;;  %v7466_v56 = vpop.f32.mrf.mxu1 }
 0x378   : > { %v5391_v22 = vadd.f32 %v5390_v2, %v5389_v3  ;;  %v5411_v13 = vrot.slane %v9739_v49, 4  ;;  %v9746_v19 = vadd.f32 %v9669_v17, %v5311_v46  ;;  %v5420_v16 = vmul.f32 0.125, %v5381_v1 }
 0x379   : > { %v5418_v34 = vmul.f32 0.125, %v5367_v61  ;;  %v5388_v35 = vadd.f32 %v5387_v43, %v5386_v31  ;;  %v5373_v15 = vrot.slane %v5372_v53, 1  ;;  %v5407_v48 = vadd.f32 %v5406_v32, %v5405_v36  ;;  %v5271_v57 = vpop.f32.mrf.mxu1 }
 0x37a   : > { %v5392_v30 = vrot.slane %v5391_v22, 2  ;;  %v5412_v5 = vadd.f32 %v5411_v13, %v9739_v49  ;;  %v5316_v41 = vmul.f32 %v7465_v29, %v9664_v55  ;;  %v5350_v44 = vmax.f32 %v9746_v19, 0.0 }
 0x37b   : > { %v5374_v33 = vadd.f32 %v5373_v15, %v5372_v53  ;;  %v5434_v24 = vpack.c.bf16 %v5418_v34, %v5418_v34  ;;  %v5421_v63 = vmul.f32 0.125, %v5388_v35  ;;  %v5408_v21 = vrot.slane %v5407_v48, 1 }
 0x37c   : > { %v5393_v23 = vadd.f32 %v5392_v30, %v5391_v22  ;;  %v5413_v51 = vrot.slane %v5412_v5, 2  ;;  %v9751_v42 = vadd.f32 %v9669_v17, %v5316_v41  ;;  %v5314_v27 = vmul.f32 %v9664_v55, %v5268_v6 }
 0x37d   : > { %v5419_v59 = vmul.f32 0.125, %v5374_v33  ;;  %v5428_v60 = vadd.f32 %v5427_v18, %v9704_v28  ;;  %v5396_v31 = vsel %vm516_vm1, %v5350_v44, 0.0  ;;  %v5436_v29 = vpack.c.bf16 %v5420_v16, %v5420_v16  ;;  %v7469_v28 = vpop.f32.mrf.mxu1 }
 0x37e   : > { %v5394_v14 = vrot.slane %v5393_v23, 1  ;;  %v5414_v7 = vadd.f32 %v5413_v51, %v5412_v5  ;;  %v5397_v2 = vrot.slane %v5396_v31, 4  ;;  %v5437_v61 = vpack.c.bf16 %v5421_v63, %v5421_v63 }
 0x37f   : > { %v5435_v4 = vpack.c.bf16 %v5419_v59, %v5419_v59  ;;  %v10085_v43 = vmax.f32 %v9751_v42, 0.0  ;;  %v9760_v53 = vadd.f32 %v9669_v17, %v5314_v27  ;;  %v5611_v47 = vunpack.c.l.b16 %v5434_v24  ;;  %v5284_v51 = vpop.f32.mrf.mxu1 }
 0x380   : > { %v5395_v36 = vadd.f32 %v5394_v14, %v5393_v23  ;;  %v5409_v6 = vadd.f32 %v5408_v21, %v5407_v48  ;;  %v5415_v32 = vrot.slane %v5414_v7, 1  ;;  %v5398_v22 = vadd.f32 %v5397_v2, %v5396_v31 }
 0x381   : > { %v5612_v54 = vunpack.c.l.b16 %v5435_v4  ;;  %v5429_v13 = vadd.f32 %v5428_v60, %v5389_v3  ;;  %v5613_v1 = vunpack.c.l.b16 %v5436_v29  ;;  %v5614_v30 = vunpack.c.l.b16 %v5437_v61 }
 0x382   : > { %v5422_v35 = vmul.f32 0.125, %v5395_v36  ;;  %v5399_v15 = vrot.slane %v5398_v22, 2  ;;  %v9766_v5 = vsel %vm516_vm1, %v10085_v43, 0.0  ;;  %v5353_v46 = vmax.f32 %v9760_v53, 0.0  ;;  %v6640_v53 = vld [vmem:[%s9938_s24 + $0x48] sm:$0xff] }
 0x383   : > { %v5619_v34 = vsel %vm5542_vm4, %v5612_v54, %v5611_v47  ;;  %v5317_v48 = vmul.f32 %v7466_v56, %v9664_v55  ;;  %v5424_v33 = vmul.f32 0.125, %v5409_v6  ;;  %v5416_v18 = vadd.f32 %v5415_v32, %v5414_v7  ;;  %v7470_v6 = vpop.f32.mrf.mxu1 }
 0x384   : > { %v5400_v3 = vadd.f32 %v5399_v15, %v5398_v22  ;;  %v5315_v23 = vmul.f32 %v9664_v55, %v5271_v57  ;;  %v5620_v16 = vsel %vm5544_vm5, %v5613_v1, %v5619_v34  ;;  %v5430_v24 = vadd.f32 %v5429_v13, %v5396_v31 }
 0x385   : > { %v9775_v59 = vsel %vm516_vm1, %v5353_v46, 0.0  ;;  %v9778_v41 = vadd.f32 %v9669_v17, %v5317_v48  ;;  %v5438_v56 = vpack.c.bf16 %v5422_v35, %v5422_v35  ;;  %v5459_v21 = vrot.slane %v9766_v5, 4 }
 0x386   : > { %v5401_v63 = vrot.slane %v5400_v3, 1  ;;  %v5445_v14 = vrot.slane %v9775_v59, 4  ;;  %v9784_v7 = vadd.f32 %v9669_v17, %v5315_v23  ;;  %v5320_v27 = vmul.f32 %v7469_v28, %v9664_v55 }
 0x387   : > { %v10083_v4 = vmax.f32 %v9778_v41, 0.0  ;;  %v5318_v57 = vmul.f32 %v9664_v55, %v5284_v51  ;;  %v5440_v60 = vpack.c.bf16 %v5424_v33, %v5424_v33  ;;  %v5425_v31 = vmul.f32 0.125, %v5416_v18 }
 0x388   : > { %v5402_v29 = vadd.f32 %v5401_v63, %v5400_v3  ;;  %v5446_v54 = vadd.f32 %v5445_v14, %v9775_v59  ;;  %v5354_v2 = vmax.f32 %v9784_v7, 0.0  ;;  %v9796_v61 = vadd.f32 %v9669_v17, %v5320_v27 }
 0x389   : > { %v9792_v36 = vsel %vm516_vm1, %v10083_v4, 0.0  ;;  %v9799_v47 = vadd.f32 %v9669_v17, %v5318_v57  ;;  %v5621_v32 = vsel %vm5546_vm6, %v5614_v30, %v5620_v16  ;;  %v5460_v28 = vadd.f32 %v5459_v21, %v9766_v5 }
 0x38a   : > { %v5423_v22 = vmul.f32 0.125, %v5402_v29  ;;  %v5466_v13 = vrot.slane %v9792_v36, 4  ;;  %v5615_v1 = vunpack.c.l.b16 %v5438_v56  ;;  %v5451_v34 = vsel %vm516_vm1, %v5354_v2, 0.0 }
 0x38b   : > { %v10084_v35 = vmax.f32 %v9796_v61, 0.0  ;;  %v5357_v15 = vmax.f32 %v9799_v47, 0.0  ;;  %v5441_v48 = vpack.c.bf16 %v5425_v31, %v5425_v31  ;;  %v5447_v18 = vrot.slane %v5446_v54, 2 }
 0x38c   : > { %v5439_v33 = vpack.c.bf16 %v5423_v22, %v5423_v22  ;;  %v5321_v3 = vmul.f32 %v7470_v6, %v9664_v55  ;;  %v5431_v30 = vadd.f32 %v5430_v24, %v9724_v39  ;;  %v5452_v23 = vrot.slane %v5451_v34, 4 }
 0x38d   : > { %v9814_v51 = vsel %vm516_vm1, %v10084_v35, 0.0  ;;  %v9819_v16 = vsel %vm516_vm1, %v5357_v15, 0.0  ;;  %v5617_v56 = vunpack.c.l.b16 %v5440_v60  ;;  %v5461_v21 = vrot.slane %v5460_v28, 2  ;;  %v5287_v35 = vpop.f32.mrf.mxu1 }
 0x38e   : > { %v5616_v63 = vunpack.c.l.b16 %v5439_v33  ;;  %v5467_v14 = vadd.f32 %v5466_v13, %v9792_v36  ;;  %v5622_v27 = vsel %vm5548_vm7, %v5615_v1, %v5621_v32  ;;  %v5453_v57 = vadd.f32 %v5452_v23, %v5451_v34 }
 0x38f   : > { %v5487_v39 = vrot.slane %v9814_v51, 4  ;;  %v5473_v24 = vrot.slane %v9819_v16, 4  ;;  %v5618_v31 = vunpack.c.l.b16 %v5441_v48  ;;  %v5448_v6 = vadd.f32 %v5447_v18, %v5446_v54 }
 0x390   : > { %v5623_v29 = vsel %vm5550_vm8, %v5616_v63, %v5622_v27  ;;  %v9827_v22 = vadd.f32 %v9669_v17, %v5321_v3  ;;  %v5432_v60 = vadd.f32 %v5431_v30, %v9739_v49  ;;  %v5454_v4 = vrot.slane %v5453_v57, 2 }
 0x391   : > { %v5624_v33 = vsel %vm5552_vm9, %v5617_v56, %v5623_v29  ;;  %v5474_v13 = vadd.f32 %v5473_v24, %v9819_v16  ;;  %v5462_v1 = vadd.f32 %v5461_v21, %v5460_v28  ;;  %v5468_v23 = vrot.slane %v5467_v14, 2 }
 0x392   : > { %v5625_v32 = vsel %vm5554_vm10, %v5618_v31, %v5624_v33  ;;  %v5455_v48 = vadd.f32 %v5454_v4, %v5453_v57  ;;  %v5488_v63 = vadd.f32 %v5487_v39, %v9814_v51  ;;  %v5449_v18 = vrot.slane %v5448_v6, 1 }
 0x393   : > { %v5626_v43 = vpack.c.b16 %v5625_v32, %v5625_v32  ;;  %v5475_v54 = vrot.slane %v5474_v13, 2  ;;  %v10086_v3 = vmax.f32 %v9827_v22, 0.0  ;;  %v5433_v27 = vmul.f32 0.125, %v5432_v60 }
 0x394   : > { %v5456_v49 = vrot.slane %v5455_v48, 1  ;;  %v5319_v30 = vmul.f32 %v9664_v55, %v5287_v35  ;;  %v5463_v56 = vrot.slane %v5462_v1, 1  ;;  %v5469_v24 = vadd.f32 %v5468_v23, %v5467_v14 }
 0x395   : > { %7480 = vmatmul.mubr.msk.bf16.vlgmr.msra.gmra.mxu1 %vm516_vm1, %v5626_v43  ;;  %v9840_v28 = vsel %vm516_vm1, %v10086_v3, 0.0  ;;  %v5489_v21 = vrot.slane %v5488_v63, 2  ;;  %v5476_v57 = vadd.f32 %v5475_v54, %v5474_v13  ;;  %v5450_v55 = vadd.f32 %v5449_v18, %v5448_v6 }
 0x396   : > { %7490 = vmatpush3.bf16.msra.mxu1 %v9645_v11  ;;  %7491 = vmatprep.mubr.msk.bf16.mxu1 %vm7583_vm3, %v10158_v9  ;;  %v5457_v4 = vadd.f32 %v5456_v49, %v5455_v48  ;;  %v5494_v39 = vrot.slane %v9840_v28, 4  ;;  %v9848_v43 = vadd.f32 %v9669_v17, %v5319_v30  ;;  %v5443_v35 = vpack.c.bf16 %v5433_v27, %v5433_v27 }
 0x397   : > { %7501 = vmatprep.subr.bf16.mxu1 %v10158_v9  ;;  %v5464_v31 = vadd.f32 %v5463_v56, %v5462_v1  ;;  %v5470_v29 = vrot.slane %v5469_v24, 1  ;;  %v5508_v33 = vadd.f32 %v5451_v34, %v9775_v59  ;;  %v5490_v32 = vadd.f32 %v5489_v21, %v5488_v63 }
 0x398   : > { %v5495_v14 = vadd.f32 %v5494_v39, %v9840_v28  ;;  %v5501_v11 = vmul.f32 0.125, %v5457_v4  ;;  %v5358_v60 = vmax.f32 %v9848_v43, 0.0  ;;  %v5477_v13 = vrot.slane %v5476_v57, 1  ;;  %v6646_v43 = vld [vmem:[%s9938_s24 + $0x78] sm:$0xff] }
 0x399   : > { %v5500_v48 = vmul.f32 0.125, %v5450_v55  ;;  %v5471_v54 = vadd.f32 %v5470_v29, %v5469_v24  ;;  %v5502_v27 = vmul.f32 0.125, %v5464_v31  ;;  %v5509_v59 = vadd.f32 %v5508_v33, %v9766_v5 }
 0x39a   : > { %v5496_v23 = vrot.slane %v5495_v14, 2  ;;  %v5479_v6 = vsel %vm516_vm1, %v5358_v60, 0.0  ;;  %v5517_v18 = vpack.c.bf16 %v5501_v11, %v5501_v11  ;;  %v5491_v34 = vrot.slane %v5490_v32, 1 }
 0x39b   : > { %v5480_v1 = vrot.slane %v5479_v6, 4  ;;  %v5478_v63 = vadd.f32 %v5477_v13, %v5476_v57  ;;  %v5516_v49 = vpack.c.bf16 %v5500_v48, %v5500_v48  ;;  %v5503_v4 = vmul.f32 0.125, %v5471_v54 }
 0x39c   : > { %v5497_v17 = vadd.f32 %v5496_v23, %v5495_v14  ;;  %v5535_v21 = vunpack.c.l.b16 %v5517_v18  ;;  %v5518_v55 = vpack.c.bf16 %v5502_v27, %v5502_v27  ;;  %v5492_v14 = vadd.f32 %v5491_v34, %v5490_v32 }
 0x39d   : > { %7492 = vmatmul.mubr.msk.bf16.vlgmr.msra.gmra.mxu1 %vm516_vm1, %v5443_v35  ;;  %v5481_v56 = vadd.f32 %v5480_v1, %v5479_v6  ;;  %v5504_v35 = vmul.f32 0.125, %v5478_v63  ;;  %v5510_v24 = vadd.f32 %v5509_v59, %v9792_v36  ;;  %v5534_v29 = vunpack.c.l.b16 %v5516_v49 }
 0x39e   : > { %7503 = vmatprep.mubr.msk.bf16.mxu1 %vm7583_vm3, %v10158_v9  ;;  %v5498_v30 = vrot.slane %v5497_v17, 1  ;;  %v5519_v3 = vpack.c.bf16 %v5503_v4, %v5503_v4  ;;  %v5536_v33 = vunpack.c.l.b16 %v5518_v55  ;;  %v5506_v57 = vmul.f32 0.125, %v5492_v14 }
 0x39f   : > { %v5482_v39 = vrot.slane %v5481_v56, 2  ;;  %v5543_v31 = vsel %vm5542_vm4, %v5535_v21, %v5534_v29  ;;  %v5511_v13 = vadd.f32 %v5510_v24, %v9819_v16  ;;  %v5520_v48 = vpack.c.bf16 %v5504_v35, %v5504_v35 }
 0x3a0   : > { %v5499_v11 = vadd.f32 %v5498_v30, %v5497_v17  ;;  %v5545_v1 = vsel %vm5544_vm5, %v5536_v33, %v5543_v31  ;;  %v5537_v32 = vunpack.c.l.b16 %v5519_v3  ;;  %v5522_v34 = vpack.c.bf16 %v5506_v57, %v5506_v57 }
 0x3a1   : > { %v5483_v23 = vadd.f32 %v5482_v39, %v5481_v56  ;;  %v5538_v36 = vunpack.c.l.b16 %v5520_v48  ;;  %v5512_v59 = vadd.f32 %v5511_v13, %v5479_v6  ;;  %v10160_v47 = vmax.f32 %v9796_v61, 0.0 }
 0x3a2   : > { %v5507_v54 = vmul.f32 0.125, %v5499_v11  ;;  %v5547_v17 = vsel %vm5546_vm6, %v5537_v32, %v5545_v1  ;;  %v5540_v56 = vunpack.c.l.b16 %v5522_v34  ;;  %v6622_v32 = vld [vmem:[%s10063_s10] ss:$0 sm:$0xff] }
 0x3a3   : > { %v5484_v5 = vrot.slane %v5483_v23, 1  ;;  %v5549_v4 = vsel %vm5548_vm7, %v5538_v36, %v5547_v17  ;;  %v5513_v16 = vadd.f32 %v5512_v59, %v9814_v51 }
 0x3a4   : > { %v5523_v63 = vpack.c.bf16 %v5507_v54, %v5507_v54 }
 0x3a5   : > { %v5485_v18 = vadd.f32 %v5484_v5, %v5483_v23  ;;  %v5514_v14 = vadd.f32 %v5513_v16, %v9840_v28  ;;  %v5781_v28 = vld [vmem:[%s10064_s11] sm:$0xf] }
 0x3a6   : > { %v5541_v21 = vunpack.c.l.b16 %v5523_v63  ;;  %v5795_v24 = vsel %vm5793_vm11, %v5781_v28, 0  ;;  %v6629_v63 = vld [vmem:[%s10064_s11 + $0x4] sm:$0xf] }
 0x3a7   : > { %v5505_v27 = vmul.f32 0.125, %v5485_v18  ;;  %v5515_v35 = vmul.f32 0.125, %v5514_v14  ;;  %v6621_v18 = vld [vmem:[%s10062_s9] ss:$0 sm:$0xff]  ;;  %v6045_v16 = vsel %vm5793_vm11, %v6629_v63, 0 }
 0x3a8   : > { %v6636_v63 = vld [vmem:[%s10067_s14 + $0x1] ss:$0 sm:$0xff] }
 0x3a9   : > { %v5521_v49 = vpack.c.bf16 %v5505_v27, %v5505_v27  ;;  %v5673_v51 = vpack.c.bf16 %v5515_v35, %v5515_v35 }
 0x3ab   : > { %v5539_v30 = vunpack.c.l.b16 %v5521_v49 }
 0x3ad   : > { %v5551_v39 = vsel %vm5550_vm8, %v5539_v30, %v5549_v4 }
 0x3ae   : > { %v5553_v55 = vsel %vm5552_vm9, %v5540_v56, %v5551_v39 }
 0x3af   : > { %v5555_v3 = vsel %vm5554_vm10, %v5541_v21, %v5553_v55 }
 0x3b0   : > { %v5556_v6 = vpack.c.b16 %v5555_v3, %v5555_v3 }
 0x3b2   : > { %7474 = vmatmul.mubr.msk.bf16.vlgmr.msra.gmra.mxu0 %vm516_vm1, %v5556_v6  ;;  %v6634_v6 = vld [vmem:[%s10066_s13 + $0x4] sm:$0xf] }
 0x3b3   : > { %7484 = vmatpush3.bf16.msra.mxu0 %v9657_v37  ;;  %7485 = vmatprep.mubr.msk.bf16.mxu0 %vm7583_vm3, %v10158_v9  ;;  %v5844_v37 = vld [vmem:[%s10066_s13] sm:$0xf]  ;;  %v6104_v28 = vsel %vm5793_vm11, %v6634_v6, 0  ;;  %v5909_v6 = vlaneseq }
 0x3b4   : > { %7495 = vmatprep.subr.bf16.mxu0 %v10158_v9  ;;  %v5856_v29 = vsel %vm5793_vm11, %v5844_v37, 0 }
 0x3b5   : > { %7502 = vmatpush3.bf16.msra.mxu1 %v5856_v29 }
 0x3b6   : > { %7513 = vmatprep.subr.bf16.mxu1 %v10158_v9 }
 0x3ba   : > { %7486 = vmatmul.mubr.msk.bf16.vlgmr.msra.gmra.mxu0 %vm516_vm1, %v5673_v51 }
 0x3bb   : > { %7497 = vmatprep.mubr.msk.bf16.mxu0 %vm7583_vm3, %v10158_v9  ;;  %7496 = vmatpush3.bf16.msra.mxu0 %v5795_v24  ;;  %v6623_v24 = vld [vmem:[%s10065_s12] ss:$0 sm:$0xff] }
 0x3bc   : > { %7507 = vmatprep.subr.bf16.mxu0 %v10158_v9 }
 0x455   : > { %v5667_v11 = vpop.f32.mrf.mxu1 }
 0x457   : > { %v7481_v23 = vpop.f32.mrf.mxu1 }
 0x459   : > { %v5670_v31 = vpop.f32.mrf.mxu1 }
 0x45b   : > { %v7482_v5 = vpop.f32.mrf.mxu1 }
 0x45d   : > { %v5754_v33 = vpop.f32.mrf.mxu1 }
 0x45f   : > { %v7493_v57 = vpop.f32.mrf.mxu1 }
 0x461   : > { %v5757_v13 = vpop.f32.mrf.mxu1 }
 0x463   : > { %v7494_v48 = vpop.f32.mrf.mxu1 }
 0x472   : > { %v5597_v54 = vpop.f32.mrf.mxu0 }
 0x473   : > { %v5668_v1 = vadd.f32 %v5667_v11, %v5597_v54 }
 0x474   : > { %v7475_v27 = vpop.f32.mrf.mxu0 }
 0x475   : > { %v5767_v34 = vmul.f32 %v6621_v18, %v5668_v1 }
 0x476   : > { %v5600_v36 = vpop.f32.mrf.mxu0 }
 0x477   : > { %v5775_v59 = vadd.f32 %v6622_v32, %v5767_v34 }
 0x478   : > { %v7476_v17 = vpop.f32.mrf.mxu0 }
 0x479   : > { %v5776_v49 = vmax.f32 %v5775_v59, 0.0 }
 0x47a   : > { %v5711_v30 = vpop.f32.mrf.mxu0 }
 0x47b   : > { %v5780_v56 = vpack.c.bf16 %v5776_v49, %v5776_v49  ;;  %v5755_v4 = vadd.f32 %v5754_v33, %v5711_v30  ;;  %v6626_v33 = vld [vmem:[%s10067_s14] ss:$0 sm:$0xff] }
 0x47c   : > { %v7487_v21 = vpop.f32.mrf.mxu0 }
 0x47d   : > { %v5777_v39 = vmul.f32 %v6621_v18, %v5755_v4  ;;  %7498 = vmatmul.mubr.msk.bf16.vlgmr.msra.gmra.mxu0 %vm5789_vm12, %v5780_v56 }
 0x47e   : > { %7508 = vmatpush3.bf16.msra.mxu0 %v6045_v16  ;;  %v5714_v55 = vpop.f32.mrf.mxu0  ;;  %7509 = vmatprep.mubr.msk.bf16.mxu0 %vm7583_vm3, %v10158_v9 }
 0x47f   : > { %v5778_v3 = vadd.f32 %v6622_v32, %v5777_v39 }
 0x480   : > { %v7488_v14 = vpop.f32.mrf.mxu0 }
 0x481   : > { %v5779_v35 = vmax.f32 %v5778_v3, 0.0  ;;  %v7584_v3 = vmov 1966171168  }
 0x482   : > { %v5907_v14 = vunpack.c.l.s4 %v7584_v3 }
 0x483   : > { %v5843_v51 = vpack.c.bf16 %v5779_v35, %v5779_v35 }
 0x485   : > { %7504 = vmatmul.mubr.msk.bf16.vlgmr.msra.gmra.mxu1 %vm5789_vm12, %v5843_v51  ;;  %7510 = vmatmul.mubr.msk.bf16.vlgmr.msra.gmra.mxu0 %vm5789_vm12, %v5780_v56 }
 0x486   : > { %7514 = vmatpush3.bf16.msra.mxu1 %v6104_v28  ;;  %7515 = vmatprep.mubr.msk.bf16.mxu1 %vm7583_vm3, %v10158_v9  ;;  %v6631_v9 = vld [vmem:[%s10065_s12 + $0x1] ss:$0 sm:$0xff]  ;;  %v5908_v28 = vunpack.c.0.s8 %v5907_v14 }
 0x48d   : > { %7516 = vmatmul.mubr.msk.bf16.vlgmr.msra.gmra.mxu1 %vm5789_vm12, %v5843_v51 }
 0x53d   : > { %v5831_v37 = vpop.f32.mrf.mxu0 }
 0x53e   : > { %v5832_v29 = vadd.f32 %v6623_v24, %v5831_v37  ;;  %v5910_v24 = vshrl.u32 %v5909_v6, 7 }
 0x53f   : > { %v7499_v11 = vpop.f32.mrf.mxu0 }
 0x540   : > { %v6625_v23 = vmul.f32 -1.442695, %v5832_v29  ;;  %v9923_v11 = vsub.s32 %v5908_v28, %v5910_v24  ;;  %v6012_v28 = vld [vmem:[%s9938_s24 + $0x10] sm:$0xff] }
 0x541   : > { %v5834_v31 = vpop.f32.mrf.mxu0 }
 0x542   : > { %7558 = vpow2.f32 %v6625_v23 }
 0x543   : > { %v7500_v5 = vpop.f32.mrf.mxu0 }
 0x545   : > { %v5892_v57 = vpop.f32.mrf.mxu1  ;;  %v6081_v13 = vpop.f32.mrf.mxu0 }
 0x546   : > { %v5893_v48 = vadd.f32 %v6626_v33, %v5892_v57  ;;  %v6082_v54 = vadd.f32 %v6631_v9, %v6081_v13  ;;  %v9926_v9 = vsub.s32 0, %v5910_v24  ;;  %v6014_v24 = vld [vmem:[%s9938_s24 + $0x20] sm:$0xff] }
 0x547   : > { %v7505_v18 = vpop.f32.mrf.mxu1  ;;  %v7511_v1 = vpop.f32.mrf.mxu0 }
 0x548   : > { %v6628_v32 = vmul.f32 -1.442695, %v5893_v48  ;;  %v6633_v27 = vmul.f32 -1.442695, %v6082_v54 }
 0x549   : > { %v5895_v34 = vpop.f32.mrf.mxu1  ;;  %v6084_v36 = vpop.f32.mrf.mxu0 }
 0x54a   : > { %7560 = vpow2.f32 %v6628_v32 }
 0x54b   : > { %7562 = vpow2.f32 %v6633_v27  ;;  %v7506_v59 = vpop.f32.mrf.mxu1  ;;  %v7512_v17 = vpop.f32.mrf.mxu0 }
 0x54d   : > { %v6140_v49 = vpop.f32.mrf.mxu1 }
 0x54e   : > { %v6141_v30 = vadd.f32 %v6636_v63, %v6140_v49 }
 0x54f   : > { %v7559_v56 = vpop.eup %7558  ;;  %v7517_v4 = vpop.f32.mrf.mxu1 }
 0x550   : > { %v5840_v16 = vadd.f32 1.0, %v7559_v56  ;;  %v6638_v21 = vmul.f32 -1.442695, %v6141_v30 }
 0x551   : > { %v6143_v39 = vpop.f32.mrf.mxu1 }
 0x552   : > { %7564 = vrcp.f32 %v5840_v16  ;;  %v6010_v16 = vld [vmem:[%s9938_s24] sm:$0xff] }
 0x553   : > { %7566 = vpow2.f32 %v6638_v21  ;;  %v7518_v55 = vpop.f32.mrf.mxu1 }
 0x557   : > { %v7561_v35 = vpop.eup %7560 }
 0x558   : > { %v7563_v51 = vpop.eup %7562  ;;  %v5901_v37 = vadd.f32 1.0, %v7561_v35 }
 0x559   : > { %v6090_v29 = vadd.f32 1.0, %v7563_v51  ;;  %v6011_v51 = vld [vmem:[%s9938_s24 + $0x8] sm:$0xff] }
 0x55a   : > { %7568 = vrcp.f32 %v5901_v37  ;;  %v6016_v37 = vld [vmem:[%s9938_s24 + $0x30] sm:$0xff] }
 0x55b   : > { %7570 = vrcp.f32 %v6090_v29 }
 0x55f   : > { %v7565_v23 = vpop.eup %7564 }
 0x560   : > { %v7567_v31 = vpop.eup %7566  ;;  %v5905_v5 = vcombine.high %v7565_v23, %v7565_v23  ;;  %v5912_v33 = vrot.slane %v7565_v23, %v9923_v11 }
 0x561   : > { %v6149_v54 = vadd.f32 1.0, %v7567_v31 }
 0x562   : > { %v5919_v57 = vrot.slane %v5905_v5, %v9923_v11  ;;  %v5920_v13 = vcombine.high %v5912_v33, %v5912_v33  ;;  %v5928_v48 = vrot.slane %v5912_v33, %v9923_v11  ;;  %v6017_v33 = vld [vmem:[%s9938_s24 + $0x38] sm:$0xff] }
 0x563   : > { %7572 = vrcp.f32 %v6149_v54 }
 0x564   : > { %v5921_v18 = vcombine.high %v5919_v57, %v5919_v57  ;;  %v5935_v1 = vrot.slane %v5919_v57, %v9923_v11  ;;  %v5942_v32 = vrot.slane %v5920_v13, %v9923_v11  ;;  %v5950_v27 = vcombine.high %v5928_v48, %v5928_v48 }
 0x565   : > { %v5957_v34 = vrot.slane %v5928_v48, %v9926_v9 }
 0x566   : > { %v5949_v36 = vrot.slane %v5921_v18, %v9923_v11  ;;  %v5951_v59 = vcombine.high %v5935_v1, %v5935_v1  ;;  %v5952_v17 = vcombine.high %v5942_v32, %v5942_v32  ;;  %v5961_v63 = vrot.slane %v5942_v32, %v9926_v9 }
 0x567   : > { %v7569_v49 = vpop.eup %7568  ;;  %v5965_v30 = vrot.slane %v5950_v27, %v9926_v9  ;;  %v5973_v56 = vrot.slane %v5935_v1, %v9926_v9  ;;  %v5994_v4 = vmul.f32 %v5957_v34, %v5345_v25 }
 0x568   : > { %v5953_v21 = vcombine.high %v5949_v36, %v5949_v36  ;;  %v5969_v39 = vrot.slane %v5952_v17, %v9926_v9  ;;  %v5977_v55 = vrot.slane %v5949_v36, %v9926_v9  ;;  %v5981_v3 = vrot.slane %v5951_v59, %v9926_v9  ;;  %v7571_v35 = vpop.eup %7570 }
 0x569   : > { %v5995_v14 = vmul.f32 %v5961_v63, %v5346_v26  ;;  %v5996_v52 = vmul.f32 %v5965_v30, %v5347_v10  ;;  %v5998_v25 = vmul.f32 %v5973_v56, %v5349_v58  ;;  %v6002_v6 = vmul.f32 %v7569_v49, %v5994_v4  ;;  %v6015_v58 = vld [vmem:[%s9938_s24 + $0x28] sm:$0xff] }
 0x56a   : > { %v5985_v45 = vrot.slane %v5953_v21, %v9926_v9  ;;  %v5997_v0 = vmul.f32 %v5969_v39, %v5348_v40  ;;  %v5999_v10 = vmul.f32 %v5977_v55, %v5350_v44  ;;  %v6000_v26 = vmul.f32 %v5981_v3, %v5351_v20 }
 0x56b   : > { %v6003_v29 = vmul.f32 %v7569_v49, %v5995_v14  ;;  %v6004_v23 = vmul.f32 %v7569_v49, %v5996_v52  ;;  %v6006_v31 = vmul.f32 %v7569_v49, %v5998_v25  ;;  %v6018_v5 = vadd.f32 %v6010_v16, %v6002_v6  ;;  %v6639_v6 = vld [vmem:[%s9938_s24 + $0x40] sm:$0xff] }
 0x56c   : > { %v6001_v62 = vmul.f32 %v5985_v45, %v5352_v12  ;;  %v6005_v40 = vmul.f32 %v7569_v49, %v5997_v0  ;;  %v6007_v19 = vmul.f32 %v7569_v49, %v5999_v10  ;;  %v6008_v44 = vmul.f32 %v7569_v49, %v6000_v26  ;;  %v6641_v10 = vld [vmem:[%s9938_s24 + $0x50] sm:$0xff] }
 0x56d   : > { %v6019_v8 = vadd.f32 %v6011_v51, %v6003_v29  ;;  %v6020_v20 = vadd.f32 %v6012_v28, %v6004_v23  ;;  %v6022_v57 = vadd.f32 %v6014_v24, %v6006_v31  ;;  %6026 = vst.msk [vmem:[%s9962_s27] sm:$0xff] %vm516_vm1, %v6018_v5  ;;  %v6153_v13 = vcombine.high %v7571_v35, %v7571_v35  ;;  %v6642_v31 = vld [vmem:[%s9938_s24 + $0x58] sm:$0xff] }
 0x56e   : > { %v6009_v48 = vmul.f32 %v7569_v49, %v6001_v62  ;;  %v6021_v54 = vadd.f32 %v6013_v38, %v6005_v40  ;;  %v6023_v50 = vadd.f32 %v6015_v58, %v6007_v19  ;;  %v6024_v18 = vadd.f32 %v6016_v37, %v6008_v44  ;;  %v6644_v58 = vld [vmem:[%s9938_s24 + $0x68] sm:$0xff]  ;;  %v6645_v37 = vld [vmem:[%s9938_s24 + $0x70] sm:$0xff] }
 0x56f   : > { %6027 = vst.msk [vmem:[%s9962_s27 + $0x8] sm:$0xff] %vm516_vm1, %v6019_v8  ;;  %6028 = vst.msk [vmem:[%s9962_s27 + $0x10] sm:$0xff] %vm516_vm1, %v6020_v20  ;;  %v6160_v12 = vrot.slane %v7571_v35, %v9923_v11  ;;  %v6167_v1 = vrot.slane %v6153_v13, %v9923_v11  ;;  %v6643_v35 = vld [vmem:[%s9938_s24 + $0x60] sm:$0xff]  ;;  %v10159_v45 = vmax.f32 %v9751_v42, 0.0 }
 0x570   : > { %6030 = vst.msk [vmem:[%s9962_s27 + $0x20] sm:$0xff] %vm516_vm1, %v6022_v57  ;;  %v6025_v32 = vadd.f32 %v6017_v33, %v6009_v48  ;;  %6029 = vst.msk [vmem:[%s9962_s27 + $0x18] sm:$0xff] %vm516_vm1, %v6021_v54  ;;  %v7573_v56 = vpop.eup %7572 }
 0x571   : > { %6031 = vst.msk [vmem:[%s9962_s27 + $0x28] sm:$0xff] %vm516_vm1, %v6023_v50  ;;  %6032 = vst.msk [vmem:[%s9962_s27 + $0x30] sm:$0xff] %vm516_vm1, %v6024_v18  ;;  %v6168_v27 = vcombine.high %v6160_v12, %v6160_v12  ;;  %v6169_v34 = vcombine.high %v6167_v1, %v6167_v1  ;;  %v6176_v36 = vrot.slane %v6160_v12, %v9923_v11 }
 0x572   : > { %v6183_v59 = vrot.slane %v6167_v1, %v9923_v11  ;;  %6033 = vst.msk [vmem:[%s9962_s27 + $0x38] sm:$0xff] %vm516_vm1, %v6025_v32 }
 0x573   : > { %v6190_v17 = vrot.slane %v6168_v27, %v9923_v11  ;;  %v6197_v63 = vrot.slane %v6169_v34, %v9923_v11  ;;  %v6198_v49 = vcombine.high %v6176_v36, %v6176_v36  ;;  %v6205_v4 = vrot.slane %v6176_v36, %v9926_v9 }
 0x574   : > { %v6199_v30 = vcombine.high %v6183_v59, %v6183_v59  ;;  %v6221_v16 = vrot.slane %v6183_v59, %v9926_v9 }
 0x575   : > { %v6200_v21 = vcombine.high %v6190_v17, %v6190_v17  ;;  %v6201_v39 = vcombine.high %v6197_v63, %v6197_v63  ;;  %v6209_v55 = vrot.slane %v6190_v17, %v9926_v9  ;;  %v6213_v3 = vrot.slane %v6198_v49, %v9926_v9 }
 0x576   : > { %v6225_v14 = vrot.slane %v6197_v63, %v9926_v9  ;;  %v6229_v11 = vrot.slane %v6199_v30, %v9926_v9  ;;  %v6242_v52 = vmul.f32 %v6205_v4, %v5353_v46  ;;  %v6246_v25 = vmul.f32 %v6221_v16, %v5357_v15 }
 0x577   : > { %v6217_v51 = vrot.slane %v6200_v21, %v9926_v9  ;;  %v6233_v28 = vrot.slane %v6201_v39, %v9926_v9  ;;  %v6243_v24 = vmul.f32 %v6209_v55, %v5354_v2  ;;  %v6244_v0 = vmul.f32 %v6213_v3, %v10159_v45 }
 0x578   : > { %v6247_v46 = vmul.f32 %v6225_v14, %v5358_v60  ;;  %v6248_v15 = vmul.f32 %v6229_v11, %v10160_v47  ;;  %v6250_v26 = vmul.f32 %v7573_v56, %v6242_v52  ;;  %v6254_v38 = vmul.f32 %v7573_v56, %v6246_v25 }
 0x579   : > { %v10161_v9 = vmax.f32 %v9778_v41, 0.0  ;;  %v10162_v2 = vmax.f32 %v9827_v22, 0.0  ;;  %v6251_v29 = vmul.f32 %v7573_v56, %v6243_v24  ;;  %v6252_v23 = vmul.f32 %v7573_v56, %v6244_v0 }
 0x57a   : > { %v6255_v61 = vmul.f32 %v7573_v56, %v6247_v46  ;;  %v6256_v60 = vmul.f32 %v7573_v56, %v6248_v15  ;;  %v6267_v5 = vadd.f32 %v6639_v6, %v6250_v26  ;;  %v6271_v62 = vadd.f32 %v6643_v35, %v6254_v38 }
 0x57b   : > { %v6245_v7 = vmul.f32 %v6217_v51, %v10161_v9  ;;  %v6249_v42 = vmul.f32 %v6233_v28, %v10162_v2  ;;  %v6268_v22 = vadd.f32 %v6640_v53, %v6251_v29  ;;  %v6269_v19 = vadd.f32 %v6641_v10, %v6252_v23 }
 0x57c   : > { %v6272_v44 = vadd.f32 %v6644_v58, %v6255_v61  ;;  %v6273_v33 = vadd.f32 %v6645_v37, %v6256_v60  ;;  %6647 = vst.msk [vmem:[%s9962_s27 + $0x40] sm:$0xff] %vm516_vm1, %v6267_v5  ;;  %6651 = vst.msk [vmem:[%s9962_s27 + $0x60] sm:$0xff] %vm516_vm1, %v6271_v62 }
 0x57d   : > { %v6253_v41 = vmul.f32 %v7573_v56, %v6245_v7  ;;  %v6257_v40 = vmul.f32 %v7573_v56, %v6249_v42  ;;  %6648 = vst.msk [vmem:[%s9962_s27 + $0x48] sm:$0xff] %vm516_vm1, %v6268_v22  ;;  %6649 = vst.msk [vmem:[%s9962_s27 + $0x50] sm:$0xff] %vm516_vm1, %v6269_v19 }
 0x57e   : > { %6652 = vst.msk [vmem:[%s9962_s27 + $0x68] sm:$0xff] %vm516_vm1, %v6272_v44  ;;  %6653 = vst.msk [vmem:[%s9962_s27 + $0x70] sm:$0xff] %vm516_vm1, %v6273_v33 }
 0x57f   : > { %v6270_v8 = vadd.f32 %v6642_v31, %v6253_v41  ;;  %v6274_v20 = vadd.f32 %v6646_v43, %v6257_v40 }
 0x581   : > { %6650 = vst.msk [vmem:[%s9962_s27 + $0x58] sm:$0xff] %vm516_vm1, %v6270_v8  ;;  %6654 = vst.msk [vmem:[%s9962_s27 + $0x78] sm:$0xff] %vm516_vm1, %v6274_v20 }
 0x582 PF: > { %s25_s18 = sadd.s32 1, %s7580_s18  }
 0x583   : > { %p22_p4 = scmp.ge.s32.totalorder %s25_s18, 4  }
 0x585   :  { %24 = sbr.rel (!%p22_p4) target bundleno = 1 (0x1), region = 154 }

</bundles_post_ra>
